<compile_context>
chip_gen: v7x
topology: tpu7x:2x2x1
jax: 0.10.0
libtpu: 0.0.40
codegen_flags: <defaults>
</compile_context>

<pallas_src>
import functools

import jax
import jax.numpy as jnp
from jax.experimental import pallas as pl
from jax.experimental.pallas import tpu as pltpu

EPS = 1e-5
MM_DTYPE = jnp.bfloat16        # MXU operand / intermediate-storage dtype


# --------------------------- sizing helpers ----------------------------------
def _vmem_limit_bytes():
    """Generation-aware VMEM limit (~75% of capacity, capped at 100 MiB)."""
    try:
        cap = int(pltpu.get_tpu_info().vmem_capacity_bytes)
    except Exception:
        cap = 64 * 1024 * 1024          # conservative (v7x per-TC) fallback
    return int(min(cap * 3 // 4, 100 * 1024 * 1024))


_VMEM_LIMIT = _vmem_limit_bytes()


def _pick_band(Hp, Wp, Cin, Cmid, Cout, budget):
    """Largest divisor of Hp whose per-step VMEM estimate fits the budget."""
    best = 1
    for bh in range(1, Hp + 1):
        if Hp % bh:
            continue
        est1 = (2 * 4 * bh * Wp * Cin * 4            # x band block (f32, 2-buf)
                + 4 * 4 * Wp * Cin * 4               # x halo rows
                + 2 * bh * Wp * Cmid * 2             # h1 out (bf16, 2-buf)
                + 2 * bh * Wp * Cout * 2             # adj out (bf16, 2-buf)
                + (bh + 2) * (Wp + 2) * Cin * 2      # pad scratch
                + bh * Wp * (Cin + Cmid + Cout) * 4  # f32 in-kernel temps
                + 2 * (9 * Cin * Cmid + Cin * Cout) * 2)
        est2 = (2 * bh * Wp * Cmid * 2 + 4 * Wp * Cmid * 2
                + 2 * bh * Wp * Cout * 2
                + (bh + 2) * (Wp + 2) * Cmid * 2
                + bh * Wp * (Cmid + 2 * Cout) * 4
                + 2 * 9 * Cmid * Cout * 2)
        if max(est1, est2) <= budget:
            best = bh
    return best


# --------------------------- in-kernel helpers --------------------------------
def _fill_padded(pad_ref, interior, top, bot):
    """Fill a (bh+2, Wp+2, C) scratch: zero halo columns, interior, halo rows.

    `top`/`bot` are (1, Wp, C) rows already masked (zero at image edges).
    Only the halo strips + interior are written -- no full re-zero per step.
    """
    bh, Wp, C = interior.shape
    zcol = jnp.zeros((bh + 2, 1, C), pad_ref.dtype)
    pad_ref[:, 0:1, :] = zcol
    pad_ref[:, Wp + 1:Wp + 2, :] = zcol
    pad_ref[0:1, 1:Wp + 1, :] = top
    pad_ref[bh + 1:bh + 2, 1:Wp + 1, :] = bot
    pad_ref[1:bh + 1, 1:Wp + 1, :] = interior


def _conv3x3_9mm(pad_ref, w_ref):
    """3x3 'same' conv as 9 accumulating MXU matmuls (no im2col temp).

    pad_ref: (bh+2, Wp+2, C) zero-halo scratch (bf16).
    w_ref  : (9*C, Cout) weights (HWIO flattened row-major over (kh, kw, cin)).
    Returns (bh*Wp, Cout) f32.
    """
    bh = pad_ref.shape[0] - 2
    Wp = pad_ref.shape[1] - 2
    C = pad_ref.shape[2]
    acc = None
    for k in range(9):
        di, dj = k // 3, k % 3
        win = pad_ref[di:di + bh, dj:dj + Wp, :].reshape(bh * Wp, C)
        part = jnp.dot(win, w_ref[k * C:(k + 1) * C, :],
                       preferred_element_type=jnp.float32)
        acc = part if acc is None else acc + part
    return acc


def _tile_stats(vals_f32):
    """Per-tile BN stats from the stored values: [sum, sum((x-mean_tile)^2)]."""
    m = vals_f32.shape[0]
    s = jnp.sum(vals_f32, axis=0, keepdims=True)            # (1, C)
    d = vals_f32 - s * (1.0 / m)
    m2 = jnp.sum(d * d, axis=0, keepdims=True)               # (1, C)
    return jnp.concatenate([s, m2], axis=0)                  # (2, C)


def _pool4(ref6):
    """MaxPool2d(2) over the four pre-split pooling phases of a 6-D block."""
    return jnp.maximum(jnp.maximum(ref6[0, 0, 0], ref6[0, 0, 1]),
                       jnp.maximum(ref6[0, 1, 0], ref6[0, 1, 1]))


# ------------------------------- kernels --------------------------------------
def _pool_conv1_adj_kernel(x_ref, xt_ref, xb_ref, w1_ref, wa_ref, ba_ref,
                           h1_ref, adj_ref, st1_ref, pad_ref):
    bh, Wp, Cin = x_ref.shape[3], x_ref.shape[4], x_ref.shape[5]
    b = pl.program_id(1)
    nb = pl.num_programs(1)

    # MaxPool2d(2) on the band and on the two halo pooled rows (pure VPU, f32).
    p = _pool4(x_ref)                                  # (bh, Wp, Cin)
    pt = _pool4(xt_ref)                                # (1, Wp, Cin)
    pb = _pool4(xb_ref)                                # (1, Wp, Cin)
    p_mm = p.astype(MM_DTYPE)

    # 1x1 channel_adjust right after the pool (ends p's live range early).
    adj = jnp.dot(p_mm.reshape(bh * Wp, Cin), wa_ref[...],
                  preferred_element_type=jnp.float32) + ba_ref[...]
    adj_ref[0] = adj.reshape(bh, Wp, adj.shape[-1]).astype(adj_ref.dtype)

    # conv1 (bias dropped: cancelled exactly by training-mode BN mean).
    # Halo pooled rows are zero outside the image ('same' padding on p).
    top = jnp.where(b > 0, pt, 0.0).astype(MM_DTYPE)
    bot = jnp.where(b < nb - 1, pb, 0.0).astype(MM_DTYPE)
    _fill_padded(pad_ref, p_mm, top, bot)
    h1 = _conv3x3_9mm(pad_ref, w1_ref)                 # (bh*Wp, Cmid) f32

    # Store bf16; BN stats are computed from the *stored* (cast) values.
    h1c = h1.astype(MM_DTYPE)
    h1_ref[0] = h1c.reshape(bh, Wp, h1c.shape[-1])
    st1_ref[0, 0, :, :] = _tile_stats(h1c.astype(jnp.float32))


def _bn_relu_conv2_kernel(h1_ref, ht_ref, hb_ref, s1_ref, t1_ref, w2_ref,
                          h2_ref, st2_ref, pad_ref):
    bh, Wp = h1_ref.shape[1], h1_ref.shape[2]
    b = pl.program_id(1)
    nb = pl.num_programs(1)
    s1 = s1_ref[...]
    t1 = t1_ref[...]

    # Folded BN1 affine fused with ReLU (f32 elementwise math).
    y = jnp.maximum(h1_ref[0].astype(jnp.float32) * s1 + t1, 0.0)
    yt = jnp.maximum(ht_ref[0].astype(jnp.float32) * s1 + t1, 0.0)
    yb = jnp.maximum(hb_ref[0].astype(jnp.float32) * s1 + t1, 0.0)

    # Halo rows are zero *in y-space* outside the image ('same' padding on y).
    top = jnp.where(b > 0, yt, 0.0).astype(MM_DTYPE)
    bot = jnp.where(b < nb - 1, yb, 0.0).astype(MM_DTYPE)
    _fill_padded(pad_ref, y.astype(MM_DTYPE), top, bot)

    h2 = _conv3x3_9mm(pad_ref, w2_ref)                 # (bh*Wp, Cout) f32
    h2c = h2.astype(MM_DTYPE)
    h2_ref[0] = h2c.reshape(bh, Wp, h2c.shape[-1])
    st2_ref[0, 0, :, :] = _tile_stats(h2c.astype(jnp.float32))


def _bn_relu_residual_kernel(h2_ref, s2_ref, t2_ref, adj_ref, o_ref):
    y = jnp.maximum(h2_ref[0].astype(jnp.float32) * s2_ref[...] + t2_ref[...],
                    0.0)
    o_ref[0] = (y + adj_ref[0].astype(jnp.float32)).astype(o_ref.dtype)


# ------------------------------ host wrapper ----------------------------------
def _fold_bn(stats, gamma, beta, tile_count):
    """Combine per-tile [sum, M2] + gamma/beta into y = x*scale + shift."""
    C = stats.shape[-1]
    s = stats.reshape(-1, 2, C)
    sums, m2s = s[:, 0, :], s[:, 1, :]
    total = s.shape[0] * tile_count
    mean_t = sums / tile_count
    mean = jnp.sum(sums, axis=0) / total
    var = (jnp.sum(m2s, axis=0)
           + tile_count * jnp.sum((mean_t - mean) ** 2, axis=0)) / total
    scale = gamma.reshape(-1) * jax.lax.rsqrt(var + EPS)
    shift = beta.reshape(-1) - mean * scale
    return (scale.reshape(1, -1).astype(jnp.float32),
            shift.reshape(1, -1).astype(jnp.float32))


@functools.partial(jax.jit, static_argnames=("band_rows",))
def res_down(x_nchw, params, band_rows=None):
    """Pallas ResDown forward: (N, Cin, H, W) -> (N, Cout, H//2, W//2)."""
    N, Cin, H, W = x_nchw.shape
    Hp, Wp = H // 2, W // 2
    # PyTorch MaxPool2d(2) floors odd spatial dims: crop explicitly.
    x_nchw = x_nchw[:, :, :2 * Hp, :2 * Wp]
    Cmid = params["w1"].shape[-1]
    Cout = params["w2"].shape[-1]
    out_dtype = x_nchw.dtype
    f32 = jnp.float32

    # Row-band tiling of the pooled rows (generation-aware VMEM budget).
    if band_rows is None:
        bh = _pick_band(Hp, Wp, Cin, Cmid, Cout, budget=_VMEM_LIMIT // 2)
    else:
        if Hp % band_rows or not (1 <= band_rows <= Hp):
            raise ValueError(f"band_rows={band_rows} must divide Hp={Hp}")
        bh = band_rows
    nb = Hp // bh

    # Single fused XLA relayout: NCHW -> (N, 2, 2, Hp, Wp, Cin) pooling phases,
    # channels on the lane axis for the kernels.
    x_split = x_nchw.reshape(N, Cin, Hp, 2, Wp, 2).transpose(0, 3, 5, 2, 4, 1)

    # Weights: HWIO flattened for the 9 per-offset matmuls, bf16 MXU operands.
    w1_r = params["w1"].reshape(9 * Cin, Cmid).astype(MM_DTYPE)
    w2_r = params["w2"].reshape(9 * Cmid, Cout).astype(MM_DTYPE)
    wa = params["wa"].astype(MM_DTYPE)
    ba = params["ba"].astype(f32)
    # NOTE: conv biases b1/b2 are intentionally unused (cancelled by BN).

    cparams = pltpu.CompilerParams(
        dimension_semantics=(pltpu.PARALLEL, pltpu.PARALLEL),
        vmem_limit_bytes=_VMEM_LIMIT)

    r = N * Hp * Wp              # total BN reduction count
    tile_count = bh * Wp         # elements per stats tile

    # Clamped element-row indices for the 1-row conv halos (block size 1 along
    # the pooled-row axis => block index == row index).  Out-of-range rows are
    # clamped (valid fetch) and masked to zero inside the kernel.
    def _top_row(b):
        return jnp.maximum(b * bh - 1, 0)

    def _bot_row(b):
        return jnp.minimum((b + 1) * bh, Hp - 1)

    # ---- pass 1: pool + conv1 + channel_adjust + BN1 partial stats ----------
    h1, adj, st1 = pl.pallas_call(
        _pool_conv1_adj_kernel,
        grid=(N, nb),
        in_specs=[
            pl.BlockSpec((1, 2, 2, bh, Wp, Cin),
                         lambda n, b: (n, 0, 0, b, 0, 0)),
            pl.BlockSpec((1, 2, 2, 1, Wp, Cin),
                         lambda n, b: (n, 0, 0, _top_row(b), 0, 0)),
            pl.BlockSpec((1, 2, 2, 1, Wp, Cin),
                         lambda n, b: (n, 0, 0, _bot_row(b), 0, 0)),
            pl.BlockSpec((9 * Cin, Cmid), lambda n, b: (0, 0)),
            pl.BlockSpec((Cin, Cout), lambda n, b: (0, 0)),
            pl.BlockSpec((1, Cout), lambda n, b: (0, 0)),
        ],
        out_specs=(
            pl.BlockSpec((1, bh, Wp, Cmid), lambda n, b: (n, b, 0, 0)),
            pl.BlockSpec((1, bh, Wp, Cout), lambda n, b: (n, b, 0, 0)),
            pl.BlockSpec((1, 1, 2, Cmid), lambda n, b: (n, b, 0, 0)),
        ),
        out_shape=(
            jax.ShapeDtypeStruct((N, Hp, Wp, Cmid), MM_DTYPE),
            jax.ShapeDtypeStruct((N, Hp, Wp, Cout), MM_DTYPE),
            jax.ShapeDtypeStruct((N, nb, 2, Cmid), f32),
        ),
        scratch_shapes=[pltpu.VMEM((bh + 2, Wp + 2, Cin), MM_DTYPE)],
        compiler_params=cparams,
        cost_estimate=pl.CostEstimate(
            flops=int(r * (2 * 9 * Cin * Cmid + 2 * Cin * Cout
                           + 3 * Cin + 6 * Cmid)),
            transcendentals=0,
            bytes_accessed=int(4 * x_split.size
                               + 2 * (w1_r.size + wa.size)
                               + 2 * r * (Cmid + Cout)
                               + 4 * N * nb * 2 * Cmid)),
    )(x_split, x_split, x_split, w1_r, wa, ba)

    s1, t1 = _fold_bn(st1, params["g1"], params["be1"], tile_count)

    # ---- pass 2: BN1(affine)+ReLU + conv2 + BN2 partial stats ----------------
    h2, st2 = pl.pallas_call(
        _bn_relu_conv2_kernel,
        grid=(N, nb),
        in_specs=[
            pl.BlockSpec((1, bh, Wp, Cmid), lambda n, b: (n, b, 0, 0)),
            pl.BlockSpec((1, 1, Wp, Cmid),
                         lambda n, b: (n, _top_row(b), 0, 0)),
            pl.BlockSpec((1, 1, Wp, Cmid),
                         lambda n, b: (n, _bot_row(b), 0, 0)),
            pl.BlockSpec((1, Cmid), lambda n, b: (0, 0)),
            pl.BlockSpec((1, Cmid), lambda n, b: (0, 0)),
            pl.BlockSpec((9 * Cmid, Cout), lambda n, b: (0, 0)),
        ],
        out_specs=(
            pl.BlockSpec((1, bh, Wp, Cout), lambda n, b: (n, b, 0, 0)),
            pl.BlockSpec((1, 1, 2, Cout), lambda n, b: (n, b, 0, 0)),
        ),
        out_shape=(
            jax.ShapeDtypeStruct((N, Hp, Wp, Cout), MM_DTYPE),
            jax.ShapeDtypeStruct((N, nb, 2, Cout), f32),
        ),
        scratch_shapes=[pltpu.VMEM((bh + 2, Wp + 2, Cmid), MM_DTYPE)],
        compiler_params=cparams,
        cost_estimate=pl.CostEstimate(
            flops=int(r * (2 * 9 * Cmid * Cout + 4 * Cmid + 6 * Cout)),
            transcendentals=0,
            bytes_accessed=int(2 * r * Cmid + 2 * w2_r.size
                               + 2 * r * Cout + 4 * N * nb * 2 * Cout)),
    )(h1, h1, h1, s1, t1, w2_r)

    s2, t2 = _fold_bn(st2, params["g2"], params["be2"], tile_count)

    # ---- pass 3: BN2(affine)+ReLU + residual add of channel_adjust ----------
    out_nhwc = pl.pallas_call(
        _bn_relu_residual_kernel,
        grid=(N, nb),
        in_specs=[
            pl.BlockSpec((1, bh, Wp, Cout), lambda n, b: (n, b, 0, 0)),
            pl.BlockSpec((1, Cout), lambda n, b: (0, 0)),
            pl.BlockSpec((1, Cout), lambda n, b: (0, 0)),
            pl.BlockSpec((1, bh, Wp, Cout), lambda n, b: (n, b, 0, 0)),
        ],
        out_specs=pl.BlockSpec((1, bh, Wp, Cout), lambda n, b: (n, b, 0, 0)),
        out_shape=jax.ShapeDtypeStruct((N, Hp, Wp, Cout), out_dtype),
        compiler_params=cparams,
        cost_estimate=pl.CostEstimate(
            flops=int(r * 4 * Cout), transcendentals=0,
            bytes_accessed=int(2 * 2 * r * Cout + 4 * r * Cout)),
    )(h2, s2, t2, adj)

    return jnp.transpose(out_nhwc, (0, 3, 1, 2))      # NHWC -> NCHW


# ------------------------- pure-JAX reference (XLA) ---------------------------
def res_down_ref(x_nchw, params, mm_dtype=jnp.float32):
    """Reference ResDown.  `mm_dtype` sets matmul-operand precision so the
    kernel's bf16-operand / f32-accumulation choice can be checked against a
    matched-precision reference in addition to a loose full-f32 comparison."""
    p = jax.lax.reduce_window(x_nchw, -jnp.inf, jax.lax.max,
                              (1, 1, 2, 2), (1, 1, 2, 2), "VALID")

    def conv(inp, w_hwio, b):
        y = jax.lax.conv_general_dilated(
            inp.astype(mm_dtype), w_hwio.astype(mm_dtype), (1, 1), "SAME",
            dimension_numbers=("NCHW", "HWIO", "NCHW"),
            preferred_element_type=jnp.float32,
            precision=jax.lax.Precision.HIGHEST)
        return y + b.reshape(1, -1, 1, 1)

    def bn(inp, g, be):
        mean = jnp.mean(inp, axis=(0, 2, 3), keepdims=True)
        var = jnp.mean((inp - mean) ** 2, axis=(0, 2, 3), keepdims=True)
        return ((inp - mean) * jax.lax.rsqrt(var + EPS)
                * g.reshape(1, -1, 1, 1) + be.reshape(1, -1, 1, 1))

    h = jax.nn.relu(bn(conv(p, params["w1"], params["b1"]),
                       params["g1"], params["be1"]))
    h = jax.nn.relu(bn(conv(h, params["w2"], params["b2"]),
                       params["g2"], params["be2"]))
    Cin, Cout = params["wa"].shape
    adj = conv(p, params["wa"].reshape(1, 1, Cin, Cout), params["ba"])
    return h + adj


def init_params(key, Cin, Cout, K=3):
    Cmid = Cout  # mid_channels defaults to out_channels
    ks = jax.random.split(key, 10)
    n = jax.random.normal
    return {
        "w1": 0.2 * n(ks[0], (K, K, Cin, Cmid), jnp.float32),    # HWIO
        "b1": 0.1 * n(ks[1], (1, Cmid), jnp.float32),
        "g1": 1.0 + 0.1 * n(ks[2], (1, Cmid), jnp.float32),
        "be1": 0.1 * n(ks[3], (1, Cmid), jnp.float32),
        "w2": 0.2 * n(ks[4], (K, K, Cmid, Cout), jnp.float32),
        "b2": 0.1 * n(ks[5], (1, Cout), jnp.float32),
        "g2": 1.0 + 0.1 * n(ks[6], (1, Cout), jnp.float32),
        "be2": 0.1 * n(ks[7], (1, Cout), jnp.float32),
        "wa": 0.2 * n(ks[8], (Cin, Cout), jnp.float32),          # 1x1 conv
        "ba": 0.1 * n(ks[9], (1, Cout), jnp.float32),
    }


if __name__ == "__main__":
    key = jax.random.PRNGKey(0)
    kp, kx = jax.random.split(key)
    N, Cin, Cout, H, W = 2, 4, 8, 16, 16
    params = init_params(kp, Cin, Cout, K=3)
    x = jax.random.normal(kx, (N, Cin, H, W), jnp.float32)

    # References: matched precision (bf16 matmul operands) and full f32.
    ref_mm = res_down_ref(x, params, mm_dtype=MM_DTYPE)
    ref_f32 = res_down_ref(x, params, mm_dtype=jnp.float32)

    # Run with the default (auto) band sizing AND with a forced 2-band split so
    # the cross-band conv-halo path is actually exercised and validated.
    for band in (None, 4):
        out = jax.block_until_ready(res_down(x, params, band_rows=band))
        assert out.shape == (N, Cout, H // 2, W // 2), out.shape

        err_mm = float(jnp.max(jnp.abs(out - ref_mm)))
        mae_mm = float(jnp.mean(jnp.abs(out - ref_mm)))
        err_f32 = float(jnp.max(jnp.abs(out - ref_f32)))
        assert err_mm < 1.2e-1, f"band={band}: matched max abs err {err_mm}"
        assert mae_mm < 3e-2, f"band={band}: matched mean abs err {mae_mm}"
        assert err_f32 < 1.8e-1, f"band={band}: f32-ref max abs err {err_f32}"

    print("KERNEL_OK")
</pallas_src>

<mosaic_0001>
module attributes {stable_mosaic.version = 11 : i64} {
  func.func @_pool_conv1_adj_kernel(%arg0: i32, %arg1: i32, %arg2: memref<1x2x2x8x8x4xf32, #tpu.memory_space<vmem>>, %arg3: memref<1x2x2x1x8x4xf32, #tpu.memory_space<vmem>>, %arg4: memref<1x2x2x1x8x4xf32, #tpu.memory_space<vmem>>, %arg5: memref<36x8xbf16, #tpu.memory_space<vmem>>, %arg6: memref<4x8xbf16, #tpu.memory_space<vmem>>, %arg7: memref<1x8xf32, #tpu.memory_space<vmem>>, %arg8: memref<1x8x8x8xbf16, #tpu.memory_space<vmem>>, %arg9: memref<1x8x8x8xbf16, #tpu.memory_space<vmem>>, %arg10: memref<1x1x2x8xf32, #tpu.memory_space<vmem>>, %arg11: memref<10x10x4xbf16, #tpu.memory_space<vmem>>) attributes {dimension_semantics = [#tpu.dimension_semantics<parallel>, #tpu.dimension_semantics<parallel>], iteration_bounds = array<i64: 2, 1>, scalar_prefetch = 0 : i64, scratch_operands = 1 : i64, tpu.core_type = #tpu.core_type<tc>, window_params = [{transform_indices = @transform_0, window_bounds = array<i64: 1, 2, 2, 8, 8, 4>}, {transform_indices = @transform_1, window_bounds = array<i64: 1, 2, 2, 1, 8, 4>}, {transform_indices = @transform_2, window_bounds = array<i64: 1, 2, 2, 1, 8, 4>}, {pipeline_mode = #tpu.pipeline_mode<synchronous>, transform_indices = @transform_3, window_bounds = array<i64: 36, 8>}, {pipeline_mode = #tpu.pipeline_mode<synchronous>, transform_indices = @transform_4, window_bounds = array<i64: 4, 8>}, {pipeline_mode = #tpu.pipeline_mode<synchronous>, transform_indices = @transform_5, window_bounds = array<i64: 1, 8>}, {transform_indices = @transform_6, window_bounds = array<i64: 1, 8, 8, 8>}, {transform_indices = @transform_7, window_bounds = array<i64: 1, 8, 8, 8>}, {transform_indices = @transform_8, window_bounds = array<i64: 1, 1, 2, 8>}]} {
    %c0 = arith.constant 0 : index
    %c0_0 = arith.constant 0 : index
    %c0_1 = arith.constant 0 : index
    %c0_2 = arith.constant 0 : index
    %c0_3 = arith.constant 0 : index
    %c0_4 = arith.constant 0 : index
    %0 = vector.load %arg2[%c0, %c0_0, %c0_1, %c0_2, %c0_3, %c0_4] : memref<1x2x2x8x8x4xf32, #tpu.memory_space<vmem>>, vector<1x1x1x8x8x4xf32>
    %1 = vector.shape_cast %0 : vector<1x1x1x8x8x4xf32> to vector<8x8x4xf32>
    %c0_5 = arith.constant 0 : index
    %c0_6 = arith.constant 0 : index
    %c1 = arith.constant 1 : index
    %c0_7 = arith.constant 0 : index
    %c0_8 = arith.constant 0 : index
    %c0_9 = arith.constant 0 : index
    %2 = vector.load %arg2[%c0_5, %c0_6, %c1, %c0_7, %c0_8, %c0_9] : memref<1x2x2x8x8x4xf32, #tpu.memory_space<vmem>>, vector<1x1x1x8x8x4xf32>
    %3 = vector.shape_cast %2 : vector<1x1x1x8x8x4xf32> to vector<8x8x4xf32>
    %4 = arith.maximumf %1, %3 : vector<8x8x4xf32>
    %c0_10 = arith.constant 0 : index
    %c1_11 = arith.constant 1 : index
    %c0_12 = arith.constant 0 : index
    %c0_13 = arith.constant 0 : index
    %c0_14 = arith.constant 0 : index
    %c0_15 = arith.constant 0 : index
    %5 = vector.load %arg2[%c0_10, %c1_11, %c0_12, %c0_13, %c0_14, %c0_15] : memref<1x2x2x8x8x4xf32, #tpu.memory_space<vmem>>, vector<1x1x1x8x8x4xf32>
    %6 = vector.shape_cast %5 : vector<1x1x1x8x8x4xf32> to vector<8x8x4xf32>
    %c0_16 = arith.constant 0 : index
    %c1_17 = arith.constant 1 : index
    %c1_18 = arith.constant 1 : index
    %c0_19 = arith.constant 0 : index
    %c0_20 = arith.constant 0 : index
    %c0_21 = arith.constant 0 : index
    %7 = vector.load %arg2[%c0_16, %c1_17, %c1_18, %c0_19, %c0_20, %c0_21] : memref<1x2x2x8x8x4xf32, #tpu.memory_space<vmem>>, vector<1x1x1x8x8x4xf32>
    %8 = vector.shape_cast %7 : vector<1x1x1x8x8x4xf32> to vector<8x8x4xf32>
    %9 = arith.maximumf %6, %8 : vector<8x8x4xf32>
    %10 = arith.maximumf %4, %9 : vector<8x8x4xf32>
    %c0_22 = arith.constant 0 : index
    %c0_23 = arith.constant 0 : index
    %c0_24 = arith.constant 0 : index
    %c0_25 = arith.constant 0 : index
    %c0_26 = arith.constant 0 : index
    %c0_27 = arith.constant 0 : index
    %11 = vector.load %arg3[%c0_22, %c0_23, %c0_24, %c0_25, %c0_26, %c0_27] : memref<1x2x2x1x8x4xf32, #tpu.memory_space<vmem>>, vector<1x1x1x1x8x4xf32>
    %12 = vector.shape_cast %11 : vector<1x1x1x1x8x4xf32> to vector<1x8x4xf32>
    %c0_28 = arith.constant 0 : index
    %c0_29 = arith.constant 0 : index
    %c1_30 = arith.constant 1 : index
    %c0_31 = arith.constant 0 : index
    %c0_32 = arith.constant 0 : index
    %c0_33 = arith.constant 0 : index
    %13 = vector.load %arg3[%c0_28, %c0_29, %c1_30, %c0_31, %c0_32, %c0_33] : memref<1x2x2x1x8x4xf32, #tpu.memory_space<vmem>>, vector<1x1x1x1x8x4xf32>
    %14 = vector.shape_cast %13 : vector<1x1x1x1x8x4xf32> to vector<1x8x4xf32>
    %15 = arith.maximumf %12, %14 : vector<1x8x4xf32>
    %c0_34 = arith.constant 0 : index
    %c1_35 = arith.constant 1 : index
    %c0_36 = arith.constant 0 : index
    %c0_37 = arith.constant 0 : index
    %c0_38 = arith.constant 0 : index
    %c0_39 = arith.constant 0 : index
    %16 = vector.load %arg3[%c0_34, %c1_35, %c0_36, %c0_37, %c0_38, %c0_39] : memref<1x2x2x1x8x4xf32, #tpu.memory_space<vmem>>, vector<1x1x1x1x8x4xf32>
    %17 = vector.shape_cast %16 : vector<1x1x1x1x8x4xf32> to vector<1x8x4xf32>
    %c0_40 = arith.constant 0 : index
    %c1_41 = arith.constant 1 : index
    %c1_42 = arith.constant 1 : index
    %c0_43 = arith.constant 0 : index
    %c0_44 = arith.constant 0 : index
    %c0_45 = arith.constant 0 : index
    %18 = vector.load %arg3[%c0_40, %c1_41, %c1_42, %c0_43, %c0_44, %c0_45] : memref<1x2x2x1x8x4xf32, #tpu.memory_space<vmem>>, vector<1x1x1x1x8x4xf32>
    %19 = vector.shape_cast %18 : vector<1x1x1x1x8x4xf32> to vector<1x8x4xf32>
    %20 = arith.maximumf %17, %19 : vector<1x8x4xf32>
    %21 = arith.maximumf %15, %20 : vector<1x8x4xf32>
    %c0_46 = arith.constant 0 : index
    %c0_47 = arith.constant 0 : index
    %c0_48 = arith.constant 0 : index
    %c0_49 = arith.constant 0 : index
    %c0_50 = arith.constant 0 : index
    %c0_51 = arith.constant 0 : index
    %22 = vector.load %arg4[%c0_46, %c0_47, %c0_48, %c0_49, %c0_50, %c0_51] : memref<1x2x2x1x8x4xf32, #tpu.memory_space<vmem>>, vector<1x1x1x1x8x4xf32>
    %23 = vector.shape_cast %22 : vector<1x1x1x1x8x4xf32> to vector<1x8x4xf32>
    %c0_52 = arith.constant 0 : index
    %c0_53 = arith.constant 0 : index
    %c1_54 = arith.constant 1 : index
    %c0_55 = arith.constant 0 : index
    %c0_56 = arith.constant 0 : index
    %c0_57 = arith.constant 0 : index
    %24 = vector.load %arg4[%c0_52, %c0_53, %c1_54, %c0_55, %c0_56, %c0_57] : memref<1x2x2x1x8x4xf32, #tpu.memory_space<vmem>>, vector<1x1x1x1x8x4xf32>
    %25 = vector.shape_cast %24 : vector<1x1x1x1x8x4xf32> to vector<1x8x4xf32>
    %26 = arith.maximumf %23, %25 : vector<1x8x4xf32>
    %c0_58 = arith.constant 0 : index
    %c1_59 = arith.constant 1 : index
    %c0_60 = arith.constant 0 : index
    %c0_61 = arith.constant 0 : index
    %c0_62 = arith.constant 0 : index
    %c0_63 = arith.constant 0 : index
    %27 = vector.load %arg4[%c0_58, %c1_59, %c0_60, %c0_61, %c0_62, %c0_63] : memref<1x2x2x1x8x4xf32, #tpu.memory_space<vmem>>, vector<1x1x1x1x8x4xf32>
    %28 = vector.shape_cast %27 : vector<1x1x1x1x8x4xf32> to vector<1x8x4xf32>
    %c0_64 = arith.constant 0 : index
    %c1_65 = arith.constant 1 : index
    %c1_66 = arith.constant 1 : index
    %c0_67 = arith.constant 0 : index
    %c0_68 = arith.constant 0 : index
    %c0_69 = arith.constant 0 : index
    %29 = vector.load %arg4[%c0_64, %c1_65, %c1_66, %c0_67, %c0_68, %c0_69] : memref<1x2x2x1x8x4xf32, #tpu.memory_space<vmem>>, vector<1x1x1x1x8x4xf32>
    %30 = vector.shape_cast %29 : vector<1x1x1x1x8x4xf32> to vector<1x8x4xf32>
    %31 = arith.maximumf %28, %30 : vector<1x8x4xf32>
    %32 = arith.maximumf %26, %31 : vector<1x8x4xf32>
    %33 = arith.truncf %10 : vector<8x8x4xf32> to vector<8x8x4xbf16>
    %34 = vector.shape_cast %33 : vector<8x8x4xbf16> to vector<64x4xbf16>
    %c0_70 = arith.constant 0 : index
    %c0_71 = arith.constant 0 : index
    %35 = vector.load %arg6[%c0_70, %c0_71] : memref<4x8xbf16, #tpu.memory_space<vmem>>, vector<4x8xbf16>
    %cst = arith.constant dense<0.000000e+00> : vector<64x8xf32>
    %36 = tpu.matmul %34, %35, %cst {dimension_numbers = #tpu.dot_dimension_numbers<[1], [0], [0], [1], [0, 0, 1, 1], [], []>} : vector<64x4xbf16>, vector<4x8xbf16>, vector<64x8xf32> -> vector<64x8xf32>
    %c0_72 = arith.constant 0 : index
    %c0_73 = arith.constant 0 : index
    %37 = vector.load %arg7[%c0_72, %c0_73] : memref<1x8xf32, #tpu.memory_space<vmem>>, vector<1x8xf32>
    %38 = vector.broadcast %37 : vector<1x8xf32> to vector<64x8xf32>
    %39 = arith.addf %36, %38 : vector<64x8xf32>
    %40 = vector.shape_cast %39 : vector<64x8xf32> to vector<8x8x8xf32>
    %41 = arith.truncf %40 : vector<8x8x8xf32> to vector<8x8x8xbf16>
    %c0_74 = arith.constant 0 : index
    %c0_75 = arith.constant 0 : index
    %c0_76 = arith.constant 0 : index
    %c0_77 = arith.constant 0 : index
    %42 = vector.load %arg9[%c0_74, %c0_75, %c0_76, %c0_77] : memref<1x8x8x8xbf16, #tpu.memory_space<vmem>>, vector<1x8x8x8xbf16>
    %43 = vector.shape_cast %42 : vector<1x8x8x8xbf16> to vector<8x8x8xbf16>
    %44 = vector.shape_cast %41 : vector<8x8x8xbf16> to vector<1x8x8x8xbf16>
    tpu.vector_store %arg9[%c0_74, %c0_75, %c0_76, %c0_77], %44 {strides = array<i32>} : memref<1x8x8x8xbf16, #tpu.memory_space<vmem>>, vector<1x8x8x8xbf16>,
    %c0_i32 = arith.constant 0 : i32
    %45 = arith.cmpi sgt, %arg1, %c0_i32 : i32
    %cst_78 = arith.constant 0.000000e+00 : f32
    %46 = vector.broadcast %cst_78 : f32 to vector<1x8x4xf32>
    %47 = arith.select %45, %21, %46 : vector<1x8x4xf32>
    %48 = arith.truncf %47 : vector<1x8x4xf32> to vector<1x8x4xbf16>
    %c0_i32_79 = arith.constant 0 : i32
    %49 = arith.cmpi slt, %arg1, %c0_i32_79 : i32
    %cst_80 = arith.constant 0.000000e+00 : f32
    %50 = vector.broadcast %cst_80 : f32 to vector<1x8x4xf32>
    %51 = arith.select %49, %32, %50 : vector<1x8x4xf32>
    %52 = arith.truncf %51 : vector<1x8x4xf32> to vector<1x8x4xbf16>
    %cst_81 = arith.constant 0.000000e+00 : bf16
    %53 = vector.broadcast %cst_81 : bf16 to vector<10x1x4xbf16>
    %c0_82 = arith.constant 0 : index
    %c0_83 = arith.constant 0 : index
    %c0_84 = arith.constant 0 : index
    %54 = vector.load %arg11[%c0_82, %c0_83, %c0_84] : memref<10x10x4xbf16, #tpu.memory_space<vmem>>, vector<10x1x4xbf16>
    tpu.vector_store %arg11[%c0_82, %c0_83, %c0_84], %53 {strides = array<i32>} : memref<10x10x4xbf16, #tpu.memory_space<vmem>>, vector<10x1x4xbf16>,
    %c0_85 = arith.constant 0 : index
    %c9 = arith.constant 9 : index
    %c0_86 = arith.constant 0 : index
    %55 = vector.load %arg11[%c0_85, %c9, %c0_86] : memref<10x10x4xbf16, #tpu.memory_space<vmem>>, vector<10x1x4xbf16>
    tpu.vector_store %arg11[%c0_85, %c9, %c0_86], %53 {strides = array<i32>} : memref<10x10x4xbf16, #tpu.memory_space<vmem>>, vector<10x1x4xbf16>,
    %c0_87 = arith.constant 0 : index
    %c1_88 = arith.constant 1 : index
    %c0_89 = arith.constant 0 : index
    %56 = vector.load %arg11[%c0_87, %c1_88, %c0_89] : memref<10x10x4xbf16, #tpu.memory_space<vmem>>, vector<1x8x4xbf16>
    tpu.vector_store %arg11[%c0_87, %c1_88, %c0_89], %48 {strides = array<i32>} : memref<10x10x4xbf16, #tpu.memory_space<vmem>>, vector<1x8x4xbf16>,
    %c9_90 = arith.constant 9 : index
    %c1_91 = arith.constant 1 : index
    %c0_92 = arith.constant 0 : index
    %57 = vector.load %arg11[%c9_90, %c1_91, %c0_92] : memref<10x10x4xbf16, #tpu.memory_space<vmem>>, vector<1x8x4xbf16>
    tpu.vector_store %arg11[%c9_90, %c1_91, %c0_92], %52 {strides = array<i32>} : memref<10x10x4xbf16, #tpu.memory_space<vmem>>, vector<1x8x4xbf16>,
    %c1_93 = arith.constant 1 : index
    %c1_94 = arith.constant 1 : index
    %c0_95 = arith.constant 0 : index
    %58 = vector.load %arg11[%c1_93, %c1_94, %c0_95] : memref<10x10x4xbf16, #tpu.memory_space<vmem>>, vector<8x8x4xbf16>
    tpu.vector_store %arg11[%c1_93, %c1_94, %c0_95], %33 {strides = array<i32>} : memref<10x10x4xbf16, #tpu.memory_space<vmem>>, vector<8x8x4xbf16>,
    %c0_96 = arith.constant 0 : index
    %c0_97 = arith.constant 0 : index
    %c0_98 = arith.constant 0 : index
    %59 = vector.load %arg11[%c0_96, %c0_97, %c0_98] : memref<10x10x4xbf16, #tpu.memory_space<vmem>>, vector<8x8x4xbf16>
    %60 = vector.shape_cast %59 : vector<8x8x4xbf16> to vector<64x4xbf16>
    %c0_99 = arith.constant 0 : index
    %c0_100 = arith.constant 0 : index
    %61 = vector.load %arg5[%c0_99, %c0_100] : memref<36x8xbf16, #tpu.memory_space<vmem>>, vector<4x8xbf16>
    %cst_101 = arith.constant dense<0.000000e+00> : vector<64x8xf32>
    %62 = tpu.matmul %60, %61, %cst_101 {dimension_numbers = #tpu.dot_dimension_numbers<[1], [0], [0], [1], [0, 0, 1, 1], [], []>} : vector<64x4xbf16>, vector<4x8xbf16>, vector<64x8xf32> -> vector<64x8xf32>
    %c0_102 = arith.constant 0 : index
    %c1_103 = arith.constant 1 : index
    %c0_104 = arith.constant 0 : index
    %63 = vector.load %arg11[%c0_102, %c1_103, %c0_104] : memref<10x10x4xbf16, #tpu.memory_space<vmem>>, vector<8x8x4xbf16>
    %64 = vector.shape_cast %63 : vector<8x8x4xbf16> to vector<64x4xbf16>
    %c4 = arith.constant 4 : index
    %c0_105 = arith.constant 0 : index
    %65 = vector.load %arg5[%c4, %c0_105] : memref<36x8xbf16, #tpu.memory_space<vmem>>, vector<4x8xbf16>
    %cst_106 = arith.constant dense<0.000000e+00> : vector<64x8xf32>
    %66 = tpu.matmul %64, %65, %cst_106 {dimension_numbers = #tpu.dot_dimension_numbers<[1], [0], [0], [1], [0, 0, 1, 1], [], []>} : vector<64x4xbf16>, vector<4x8xbf16>, vector<64x8xf32> -> vector<64x8xf32>
    %67 = arith.addf %62, %66 : vector<64x8xf32>
    %c0_107 = arith.constant 0 : index
    %c2 = arith.constant 2 : index
    %c0_108 = arith.constant 0 : index
    %68 = vector.load %arg11[%c0_107, %c2, %c0_108] : memref<10x10x4xbf16, #tpu.memory_space<vmem>>, vector<8x8x4xbf16>
    %69 = vector.shape_cast %68 : vector<8x8x4xbf16> to vector<64x4xbf16>
    %c8 = arith.constant 8 : index
    %c0_109 = arith.constant 0 : index
    %70 = vector.load %arg5[%c8, %c0_109] : memref<36x8xbf16, #tpu.memory_space<vmem>>, vector<4x8xbf16>
    %cst_110 = arith.constant dense<0.000000e+00> : vector<64x8xf32>
    %71 = tpu.matmul %69, %70, %cst_110 {dimension_numbers = #tpu.dot_dimension_numbers<[1], [0], [0], [1], [0, 0, 1, 1], [], []>} : vector<64x4xbf16>, vector<4x8xbf16>, vector<64x8xf32> -> vector<64x8xf32>
    %72 = arith.addf %67, %71 : vector<64x8xf32>
    %c1_111 = arith.constant 1 : index
    %c0_112 = arith.constant 0 : index
    %c0_113 = arith.constant 0 : index
    %73 = vector.load %arg11[%c1_111, %c0_112, %c0_113] : memref<10x10x4xbf16, #tpu.memory_space<vmem>>, vector<8x8x4xbf16>
    %74 = vector.shape_cast %73 : vector<8x8x4xbf16> to vector<64x4xbf16>
    %c12 = arith.constant 12 : index
    %c0_114 = arith.constant 0 : index
    %75 = vector.load %arg5[%c12, %c0_114] : memref<36x8xbf16, #tpu.memory_space<vmem>>, vector<4x8xbf16>
    %cst_115 = arith.constant dense<0.000000e+00> : vector<64x8xf32>
    %76 = tpu.matmul %74, %75, %cst_115 {dimension_numbers = #tpu.dot_dimension_numbers<[1], [0], [0], [1], [0, 0, 1, 1], [], []>} : vector<64x4xbf16>, vector<4x8xbf16>, vector<64x8xf32> -> vector<64x8xf32>
    %77 = arith.addf %72, %76 : vector<64x8xf32>
    %c1_116 = arith.constant 1 : index
    %c1_117 = arith.constant 1 : index
    %c0_118 = arith.constant 0 : index
    %78 = vector.load %arg11[%c1_116, %c1_117, %c0_118] : memref<10x10x4xbf16, #tpu.memory_space<vmem>>, vector<8x8x4xbf16>
    %79 = vector.shape_cast %78 : vector<8x8x4xbf16> to vector<64x4xbf16>
    %c16 = arith.constant 16 : index
    %c0_119 = arith.constant 0 : index
    %80 = vector.load %arg5[%c16, %c0_119] : memref<36x8xbf16, #tpu.memory_space<vmem>>, vector<4x8xbf16>
    %cst_120 = arith.constant dense<0.000000e+00> : vector<64x8xf32>
    %81 = tpu.matmul %79, %80, %cst_120 {dimension_numbers = #tpu.dot_dimension_numbers<[1], [0], [0], [1], [0, 0, 1, 1], [], []>} : vector<64x4xbf16>, vector<4x8xbf16>, vector<64x8xf32> -> vector<64x8xf32>
    %82 = arith.addf %77, %81 : vector<64x8xf32>
    %c1_121 = arith.constant 1 : index
    %c2_122 = arith.constant 2 : index
    %c0_123 = arith.constant 0 : index
    %83 = vector.load %arg11[%c1_121, %c2_122, %c0_123] : memref<10x10x4xbf16, #tpu.memory_space<vmem>>, vector<8x8x4xbf16>
    %84 = vector.shape_cast %83 : vector<8x8x4xbf16> to vector<64x4xbf16>
    %c20 = arith.constant 20 : index
    %c0_124 = arith.constant 0 : index
    %85 = vector.load %arg5[%c20, %c0_124] : memref<36x8xbf16, #tpu.memory_space<vmem>>, vector<4x8xbf16>
    %cst_125 = arith.constant dense<0.000000e+00> : vector<64x8xf32>
    %86 = tpu.matmul %84, %85, %cst_125 {dimension_numbers = #tpu.dot_dimension_numbers<[1], [0], [0], [1], [0, 0, 1, 1], [], []>} : vector<64x4xbf16>, vector<4x8xbf16>, vector<64x8xf32> -> vector<64x8xf32>
    %87 = arith.addf %82, %86 : vector<64x8xf32>
    %c2_126 = arith.constant 2 : index
    %c0_127 = arith.constant 0 : index
    %c0_128 = arith.constant 0 : index
    %88 = vector.load %arg11[%c2_126, %c0_127, %c0_128] : memref<10x10x4xbf16, #tpu.memory_space<vmem>>, vector<8x8x4xbf16>
    %89 = vector.shape_cast %88 : vector<8x8x4xbf16> to vector<64x4xbf16>
    %c24 = arith.constant 24 : index
    %c0_129 = arith.constant 0 : index
    %90 = vector.load %arg5[%c24, %c0_129] : memref<36x8xbf16, #tpu.memory_space<vmem>>, vector<4x8xbf16>
    %cst_130 = arith.constant dense<0.000000e+00> : vector<64x8xf32>
    %91 = tpu.matmul %89, %90, %cst_130 {dimension_numbers = #tpu.dot_dimension_numbers<[1], [0], [0], [1], [0, 0, 1, 1], [], []>} : vector<64x4xbf16>, vector<4x8xbf16>, vector<64x8xf32> -> vector<64x8xf32>
    %92 = arith.addf %87, %91 : vector<64x8xf32>
    %c2_131 = arith.constant 2 : index
    %c1_132 = arith.constant 1 : index
    %c0_133 = arith.constant 0 : index
    %93 = vector.load %arg11[%c2_131, %c1_132, %c0_133] : memref<10x10x4xbf16, #tpu.memory_space<vmem>>, vector<8x8x4xbf16>
    %94 = vector.shape_cast %93 : vector<8x8x4xbf16> to vector<64x4xbf16>
    %c28 = arith.constant 28 : index
    %c0_134 = arith.constant 0 : index
    %95 = vector.load %arg5[%c28, %c0_134] : memref<36x8xbf16, #tpu.memory_space<vmem>>, vector<4x8xbf16>
    %cst_135 = arith.constant dense<0.000000e+00> : vector<64x8xf32>
    %96 = tpu.matmul %94, %95, %cst_135 {dimension_numbers = #tpu.dot_dimension_numbers<[1], [0], [0], [1], [0, 0, 1, 1], [], []>} : vector<64x4xbf16>, vector<4x8xbf16>, vector<64x8xf32> -> vector<64x8xf32>
    %97 = arith.addf %92, %96 : vector<64x8xf32>
    %c2_136 = arith.constant 2 : index
    %c2_137 = arith.constant 2 : index
    %c0_138 = arith.constant 0 : index
    %98 = vector.load %arg11[%c2_136, %c2_137, %c0_138] : memref<10x10x4xbf16, #tpu.memory_space<vmem>>, vector<8x8x4xbf16>
    %99 = vector.shape_cast %98 : vector<8x8x4xbf16> to vector<64x4xbf16>
    %c32 = arith.constant 32 : index
    %c0_139 = arith.constant 0 : index
    %100 = vector.load %arg5[%c32, %c0_139] : memref<36x8xbf16, #tpu.memory_space<vmem>>, vector<4x8xbf16>
    %cst_140 = arith.constant dense<0.000000e+00> : vector<64x8xf32>
    %101 = tpu.matmul %99, %100, %cst_140 {dimension_numbers = #tpu.dot_dimension_numbers<[1], [0], [0], [1], [0, 0, 1, 1], [], []>} : vector<64x4xbf16>, vector<4x8xbf16>, vector<64x8xf32> -> vector<64x8xf32>
    %102 = arith.addf %97, %101 : vector<64x8xf32>
    %103 = arith.truncf %102 : vector<64x8xf32> to vector<64x8xbf16>
    %104 = vector.shape_cast %103 : vector<64x8xbf16> to vector<8x8x8xbf16>
    %c0_141 = arith.constant 0 : index
    %c0_142 = arith.constant 0 : index
    %c0_143 = arith.constant 0 : index
    %c0_144 = arith.constant 0 : index
    %105 = vector.load %arg8[%c0_141, %c0_142, %c0_143, %c0_144] : memref<1x8x8x8xbf16, #tpu.memory_space<vmem>>, vector<1x8x8x8xbf16>
    %106 = vector.shape_cast %105 : vector<1x8x8x8xbf16> to vector<8x8x8xbf16>
    %107 = vector.shape_cast %104 : vector<8x8x8xbf16> to vector<1x8x8x8xbf16>
    tpu.vector_store %arg8[%c0_141, %c0_142, %c0_143, %c0_144], %107 {strides = array<i32>} : memref<1x8x8x8xbf16, #tpu.memory_space<vmem>>, vector<1x8x8x8xbf16>,
    %108 = arith.extf %103 : vector<64x8xbf16> to vector<64x8xf32>
    %cst_145 = arith.constant dense<0.000000e+00> : vector<8xf32>
    %109 = vector.multi_reduction <add>, %108, %cst_145 [0] : vector<64x8xf32> to vector<8xf32>
    %110 = vector.shape_cast %109 : vector<8xf32> to vector<1x8xf32>
    %cst_146 = arith.constant 1.562500e-02 : f32
    %111 = vector.broadcast %cst_146 : f32 to vector<1x8xf32>
    %112 = arith.mulf %110, %111 : vector<1x8xf32>
    %113 = vector.broadcast %112 : vector<1x8xf32> to vector<64x8xf32>
    %114 = arith.subf %108, %113 : vector<64x8xf32>
    %115 = arith.mulf %114, %114 : vector<64x8xf32>
    %cst_147 = arith.constant dense<0.000000e+00> : vector<8xf32>
    %116 = vector.multi_reduction <add>, %115, %cst_147 [0] : vector<64x8xf32> to vector<8xf32>
    %117 = vector.shape_cast %116 : vector<8xf32> to vector<1x8xf32>
    %118 = tpu.concatenate %110, %117 in 0 : vector<1x8xf32>, vector<1x8xf32> -> vector<2x8xf32>
    %c0_148 = arith.constant 0 : index
    %c0_149 = arith.constant 0 : index
    %c0_150 = arith.constant 0 : index
    %c0_151 = arith.constant 0 : index
    %119 = vector.load %arg10[%c0_148, %c0_149, %c0_150, %c0_151] : memref<1x1x2x8xf32, #tpu.memory_space<vmem>>, vector<1x1x2x8xf32>
    %120 = vector.shape_cast %119 : vector<1x1x2x8xf32> to vector<2x8xf32>
    %121 = vector.shape_cast %118 : vector<2x8xf32> to vector<1x1x2x8xf32>
    tpu.vector_store %arg10[%c0_148, %c0_149, %c0_150, %c0_151], %121 {strides = array<i32>} : memref<1x1x2x8xf32, #tpu.memory_space<vmem>>, vector<1x1x2x8xf32>,
    return
  }
  func.func @transform_0(%arg0: i32, %arg1: i32) -> (i32, i32, i32, i32, i32, i32) {
    %c0_i32 = arith.constant 0 : i32
    %c0_i32_0 = arith.constant 0 : i32
    %c0_i32_1 = arith.constant 0 : i32
    %c0_i32_2 = arith.constant 0 : i32
    %c0_i32_3 = arith.constant 0 : i32
    return %arg0, %c0_i32, %c0_i32_0, %arg1, %c0_i32_1, %c0_i32_2 : i32, i32, i32, i32, i32, i32
  }
  func.func @transform_1(%arg0: i32, %arg1: i32) -> (i32, i32, i32, i32, i32, i32) {
    %c8_i32 = arith.constant 8 : i32
    %0 = arith.muli %arg1, %c8_i32 : i32
    %c1_i32 = arith.constant 1 : i32
    %1 = arith.subi %0, %c1_i32 : i32
    %c0_i32 = arith.constant 0 : i32
    %2 = arith.maxsi %1, %c0_i32 : i32
    %c0_i32_0 = arith.constant 0 : i32
    %c0_i32_1 = arith.constant 0 : i32
    %c0_i32_2 = arith.constant 0 : i32
    %c0_i32_3 = arith.constant 0 : i32
    %c0_i32_4 = arith.constant 0 : i32
    return %arg0, %c0_i32_0, %c0_i32_1, %2, %c0_i32_2, %c0_i32_3 : i32, i32, i32, i32, i32, i32
  }
  func.func @transform_2(%arg0: i32, %arg1: i32) -> (i32, i32, i32, i32, i32, i32) {
    %c1_i32 = arith.constant 1 : i32
    %0 = arith.addi %arg1, %c1_i32 : i32
    %c8_i32 = arith.constant 8 : i32
    %1 = arith.muli %0, %c8_i32 : i32
    %c7_i32 = arith.constant 7 : i32
    %2 = arith.minsi %1, %c7_i32 : i32
    %c0_i32 = arith.constant 0 : i32
    %c0_i32_0 = arith.constant 0 : i32
    %c0_i32_1 = arith.constant 0 : i32
    %c0_i32_2 = arith.constant 0 : i32
    %c0_i32_3 = arith.constant 0 : i32
    return %arg0, %c0_i32, %c0_i32_0, %2, %c0_i32_1, %c0_i32_2 : i32, i32, i32, i32, i32, i32
  }
  func.func @transform_3(%arg0: i32, %arg1: i32) -> (i32, i32) {
    %c0_i32 = arith.constant 0 : i32
    %c0_i32_0 = arith.constant 0 : i32
    %c0_i32_1 = arith.constant 0 : i32
    return %c0_i32, %c0_i32_0 : i32, i32
  }
  func.func @transform_4(%arg0: i32, %arg1: i32) -> (i32, i32) {
    %c0_i32 = arith.constant 0 : i32
    %c0_i32_0 = arith.constant 0 : i32
    %c0_i32_1 = arith.constant 0 : i32
    return %c0_i32, %c0_i32_0 : i32, i32
  }
  func.func @transform_5(%arg0: i32, %arg1: i32) -> (i32, i32) {
    %c0_i32 = arith.constant 0 : i32
    %c0_i32_0 = arith.constant 0 : i32
    %c0_i32_1 = arith.constant 0 : i32
    return %c0_i32, %c0_i32_0 : i32, i32
  }
  func.func @transform_6(%arg0: i32, %arg1: i32) -> (i32, i32, i32, i32) {
    %c0_i32 = arith.constant 0 : i32
    %c0_i32_0 = arith.constant 0 : i32
    %c0_i32_1 = arith.constant 0 : i32
    return %arg0, %arg1, %c0_i32, %c0_i32_0 : i32, i32, i32, i32
  }
  func.func @transform_7(%arg0: i32, %arg1: i32) -> (i32, i32, i32, i32) {
    %c0_i32 = arith.constant 0 : i32
    %c0_i32_0 = arith.constant 0 : i32
    %c0_i32_1 = arith.constant 0 : i32
    return %arg0, %arg1, %c0_i32, %c0_i32_0 : i32, i32, i32, i32
  }
  func.func @transform_8(%arg0: i32, %arg1: i32) -> (i32, i32, i32, i32) {
    %c0_i32 = arith.constant 0 : i32
    %c0_i32_0 = arith.constant 0 : i32
    %c0_i32_1 = arith.constant 0 : i32
    return %arg0, %arg1, %c0_i32, %c0_i32_0 : i32, i32, i32, i32
  }
}

module attributes {stable_mosaic.version = 11 : i64} {
  func.func @_bn_relu_residual_kernel(%arg0: i32, %arg1: i32, %arg2: memref<1x8x8x8xbf16, #tpu.memory_space<vmem>>, %arg3: memref<1x8xf32, #tpu.memory_space<vmem>>, %arg4: memref<1x8xf32, #tpu.memory_space<vmem>>, %arg5: memref<1x8x8x8xbf16, #tpu.memory_space<vmem>>, %arg6: memref<1x8x8x8xf32, #tpu.memory_space<vmem>>) attributes {dimension_semantics = [#tpu.dimension_semantics<parallel>, #tpu.dimension_semantics<parallel>], iteration_bounds = array<i64: 2, 1>, scalar_prefetch = 0 : i64, scratch_operands = 0 : i64, tpu.core_type = #tpu.core_type<tc>, window_params = [{transform_indices = @transform_0, window_bounds = array<i64: 1, 8, 8, 8>}, {pipeline_mode = #tpu.pipeline_mode<synchronous>, transform_indices = @transform_1, window_bounds = array<i64: 1, 8>}, {pipeline_mode = #tpu.pipeline_mode<synchronous>, transform_indices = @transform_2, window_bounds = array<i64: 1, 8>}, {transform_indices = @transform_3, window_bounds = array<i64: 1, 8, 8, 8>}, {transform_indices = @transform_4, window_bounds = array<i64: 1, 8, 8, 8>}]} {
    %c0 = arith.constant 0 : index
    %c0_0 = arith.constant 0 : index
    %c0_1 = arith.constant 0 : index
    %c0_2 = arith.constant 0 : index
    %0 = vector.load %arg2[%c0, %c0_0, %c0_1, %c0_2] : memref<1x8x8x8xbf16, #tpu.memory_space<vmem>>, vector<1x8x8x8xbf16>
    %1 = vector.shape_cast %0 : vector<1x8x8x8xbf16> to vector<8x8x8xbf16>
    %2 = arith.extf %1 : vector<8x8x8xbf16> to vector<8x8x8xf32>
    %c0_3 = arith.constant 0 : index
    %c0_4 = arith.constant 0 : index
    %3 = vector.load %arg3[%c0_3, %c0_4] : memref<1x8xf32, #tpu.memory_space<vmem>>, vector<1x8xf32>
    %4 = vector.shape_cast %3 : vector<1x8xf32> to vector<1x1x8xf32>
    %5 = vector.broadcast %4 : vector<1x1x8xf32> to vector<8x8x8xf32>
    %6 = arith.mulf %2, %5 : vector<8x8x8xf32>
    %c0_5 = arith.constant 0 : index
    %c0_6 = arith.constant 0 : index
    %7 = vector.load %arg4[%c0_5, %c0_6] : memref<1x8xf32, #tpu.memory_space<vmem>>, vector<1x8xf32>
    %8 = vector.shape_cast %7 : vector<1x8xf32> to vector<1x1x8xf32>
    %9 = vector.broadcast %8 : vector<1x1x8xf32> to vector<8x8x8xf32>
    %10 = arith.addf %6, %9 : vector<8x8x8xf32>
    %cst = arith.constant 0.000000e+00 : f32
    %11 = vector.broadcast %cst : f32 to vector<8x8x8xf32>
    %12 = arith.maximumf %10, %11 : vector<8x8x8xf32>
    %c0_7 = arith.constant 0 : index
    %c0_8 = arith.constant 0 : index
    %c0_9 = arith.constant 0 : index
    %c0_10 = arith.constant 0 : index
    %13 = vector.load %arg5[%c0_7, %c0_8, %c0_9, %c0_10] : memref<1x8x8x8xbf16, #tpu.memory_space<vmem>>, vector<1x8x8x8xbf16>
    %14 = vector.shape_cast %13 : vector<1x8x8x8xbf16> to vector<8x8x8xbf16>
    %15 = arith.extf %14 : vector<8x8x8xbf16> to vector<8x8x8xf32>
    %16 = arith.addf %12, %15 : vector<8x8x8xf32>
    %c0_11 = arith.constant 0 : index
    %c0_12 = arith.constant 0 : index
    %c0_13 = arith.constant 0 : index
    %c0_14 = arith.constant 0 : index
    %17 = vector.load %arg6[%c0_11, %c0_12, %c0_13, %c0_14] : memref<1x8x8x8xf32, #tpu.memory_space<vmem>>, vector<1x8x8x8xf32>
    %18 = vector.shape_cast %17 : vector<1x8x8x8xf32> to vector<8x8x8xf32>
    %19 = vector.shape_cast %16 : vector<8x8x8xf32> to vector<1x8x8x8xf32>
    tpu.vector_store %arg6[%c0_11, %c0_12, %c0_13, %c0_14], %19 {strides = array<i32>} : memref<1x8x8x8xf32, #tpu.memory_space<vmem>>, vector<1x8x8x8xf32>,
    return
  }
  func.func @transform_0(%arg0: i32, %arg1: i32) -> (i32, i32, i32, i32) {
    %c0_i32 = arith.constant 0 : i32
    %c0_i32_0 = arith.constant 0 : i32
    %c0_i32_1 = arith.constant 0 : i32
    return %arg0, %arg1, %c0_i32, %c0_i32_0 : i32, i32, i32, i32
  }
  func.func @transform_1(%arg0: i32, %arg1: i32) -> (i32, i32) {
    %c0_i32 = arith.constant 0 : i32
    %c0_i32_0 = arith.constant 0 : i32
    %c0_i32_1 = arith.constant 0 : i32
    return %c0_i32, %c0_i32_0 : i32, i32
  }
  func.func @transform_2(%arg0: i32, %arg1: i32) -> (i32, i32) {
    %c0_i32 = arith.constant 0 : i32
    %c0_i32_0 = arith.constant 0 : i32
    %c0_i32_1 = arith.constant 0 : i32
    return %c0_i32, %c0_i32_0 : i32, i32
  }
  func.func @transform_3(%arg0: i32, %arg1: i32) -> (i32, i32, i32, i32) {
    %c0_i32 = arith.constant 0 : i32
    %c0_i32_0 = arith.constant 0 : i32
    %c0_i32_1 = arith.constant 0 : i32
    return %arg0, %arg1, %c0_i32, %c0_i32_0 : i32, i32, i32, i32
  }
  func.func @transform_4(%arg0: i32, %arg1: i32) -> (i32, i32, i32, i32) {
    %c0_i32 = arith.constant 0 : i32
    %c0_i32_0 = arith.constant 0 : i32
    %c0_i32_1 = arith.constant 0 : i32
    return %arg0, %arg1, %c0_i32, %c0_i32_0 : i32, i32, i32, i32
  }
}

module attributes {stable_mosaic.version = 11 : i64} {
  func.func @_bn_relu_conv2_kernel(%arg0: i32, %arg1: i32, %arg2: memref<1x8x8x8xbf16, #tpu.memory_space<vmem>>, %arg3: memref<1x1x8x8xbf16, #tpu.memory_space<vmem>>, %arg4: memref<1x1x8x8xbf16, #tpu.memory_space<vmem>>, %arg5: memref<1x8xf32, #tpu.memory_space<vmem>>, %arg6: memref<1x8xf32, #tpu.memory_space<vmem>>, %arg7: memref<72x8xbf16, #tpu.memory_space<vmem>>, %arg8: memref<1x8x8x8xbf16, #tpu.memory_space<vmem>>, %arg9: memref<1x1x2x8xf32, #tpu.memory_space<vmem>>, %arg10: memref<10x10x8xbf16, #tpu.memory_space<vmem>>) attributes {dimension_semantics = [#tpu.dimension_semantics<parallel>, #tpu.dimension_semantics<parallel>], iteration_bounds = array<i64: 2, 1>, scalar_prefetch = 0 : i64, scratch_operands = 1 : i64, tpu.core_type = #tpu.core_type<tc>, window_params = [{transform_indices = @transform_0, window_bounds = array<i64: 1, 8, 8, 8>}, {transform_indices = @transform_1, window_bounds = array<i64: 1, 1, 8, 8>}, {transform_indices = @transform_2, window_bounds = array<i64: 1, 1, 8, 8>}, {pipeline_mode = #tpu.pipeline_mode<synchronous>, transform_indices = @transform_3, window_bounds = array<i64: 1, 8>}, {pipeline_mode = #tpu.pipeline_mode<synchronous>, transform_indices = @transform_4, window_bounds = array<i64: 1, 8>}, {pipeline_mode = #tpu.pipeline_mode<synchronous>, transform_indices = @transform_5, window_bounds = array<i64: 72, 8>}, {transform_indices = @transform_6, window_bounds = array<i64: 1, 8, 8, 8>}, {transform_indices = @transform_7, window_bounds = array<i64: 1, 1, 2, 8>}]} {
    %c0 = arith.constant 0 : index
    %c0_0 = arith.constant 0 : index
    %0 = vector.load %arg5[%c0, %c0_0] : memref<1x8xf32, #tpu.memory_space<vmem>>, vector<1x8xf32>
    %c0_1 = arith.constant 0 : index
    %c0_2 = arith.constant 0 : index
    %1 = vector.load %arg6[%c0_1, %c0_2] : memref<1x8xf32, #tpu.memory_space<vmem>>, vector<1x8xf32>
    %c0_3 = arith.constant 0 : index
    %c0_4 = arith.constant 0 : index
    %c0_5 = arith.constant 0 : index
    %c0_6 = arith.constant 0 : index
    %2 = vector.load %arg2[%c0_3, %c0_4, %c0_5, %c0_6] : memref<1x8x8x8xbf16, #tpu.memory_space<vmem>>, vector<1x8x8x8xbf16>
    %3 = vector.shape_cast %2 : vector<1x8x8x8xbf16> to vector<8x8x8xbf16>
    %4 = arith.extf %3 : vector<8x8x8xbf16> to vector<8x8x8xf32>
    %5 = vector.shape_cast %0 : vector<1x8xf32> to vector<1x1x8xf32>
    %6 = vector.broadcast %5 : vector<1x1x8xf32> to vector<8x8x8xf32>
    %7 = arith.mulf %4, %6 : vector<8x8x8xf32>
    %8 = vector.shape_cast %1 : vector<1x8xf32> to vector<1x1x8xf32>
    %9 = vector.broadcast %8 : vector<1x1x8xf32> to vector<8x8x8xf32>
    %10 = arith.addf %7, %9 : vector<8x8x8xf32>
    %cst = arith.constant 0.000000e+00 : f32
    %11 = vector.broadcast %cst : f32 to vector<8x8x8xf32>
    %12 = arith.maximumf %10, %11 : vector<8x8x8xf32>
    %c0_7 = arith.constant 0 : index
    %c0_8 = arith.constant 0 : index
    %c0_9 = arith.constant 0 : index
    %c0_10 = arith.constant 0 : index
    %13 = vector.load %arg3[%c0_7, %c0_8, %c0_9, %c0_10] : memref<1x1x8x8xbf16, #tpu.memory_space<vmem>>, vector<1x1x8x8xbf16>
    %14 = vector.shape_cast %13 : vector<1x1x8x8xbf16> to vector<1x8x8xbf16>
    %15 = arith.extf %14 : vector<1x8x8xbf16> to vector<1x8x8xf32>
    %16 = vector.shape_cast %0 : vector<1x8xf32> to vector<1x1x8xf32>
    %17 = vector.broadcast %16 : vector<1x1x8xf32> to vector<1x8x8xf32>
    %18 = arith.mulf %15, %17 : vector<1x8x8xf32>
    %19 = vector.shape_cast %1 : vector<1x8xf32> to vector<1x1x8xf32>
    %20 = vector.broadcast %19 : vector<1x1x8xf32> to vector<1x8x8xf32>
    %21 = arith.addf %18, %20 : vector<1x8x8xf32>
    %cst_11 = arith.constant 0.000000e+00 : f32
    %22 = vector.broadcast %cst_11 : f32 to vector<1x8x8xf32>
    %23 = arith.maximumf %21, %22 : vector<1x8x8xf32>
    %c0_12 = arith.constant 0 : index
    %c0_13 = arith.constant 0 : index
    %c0_14 = arith.constant 0 : index
    %c0_15 = arith.constant 0 : index
    %24 = vector.load %arg4[%c0_12, %c0_13, %c0_14, %c0_15] : memref<1x1x8x8xbf16, #tpu.memory_space<vmem>>, vector<1x1x8x8xbf16>
    %25 = vector.shape_cast %24 : vector<1x1x8x8xbf16> to vector<1x8x8xbf16>
    %26 = arith.extf %25 : vector<1x8x8xbf16> to vector<1x8x8xf32>
    %27 = vector.shape_cast %0 : vector<1x8xf32> to vector<1x1x8xf32>
    %28 = vector.broadcast %27 : vector<1x1x8xf32> to vector<1x8x8xf32>
    %29 = arith.mulf %26, %28 : vector<1x8x8xf32>
    %30 = vector.shape_cast %1 : vector<1x8xf32> to vector<1x1x8xf32>
    %31 = vector.broadcast %30 : vector<1x1x8xf32> to vector<1x8x8xf32>
    %32 = arith.addf %29, %31 : vector<1x8x8xf32>
    %cst_16 = arith.constant 0.000000e+00 : f32
    %33 = vector.broadcast %cst_16 : f32 to vector<1x8x8xf32>
    %34 = arith.maximumf %32, %33 : vector<1x8x8xf32>
    %c0_i32 = arith.constant 0 : i32
    %35 = arith.cmpi sgt, %arg1, %c0_i32 : i32
    %cst_17 = arith.constant 0.000000e+00 : f32
    %36 = vector.broadcast %cst_17 : f32 to vector<1x8x8xf32>
    %37 = arith.select %35, %23, %36 : vector<1x8x8xf32>
    %38 = arith.truncf %37 : vector<1x8x8xf32> to vector<1x8x8xbf16>
    %c0_i32_18 = arith.constant 0 : i32
    %39 = arith.cmpi slt, %arg1, %c0_i32_18 : i32
    %cst_19 = arith.constant 0.000000e+00 : f32
    %40 = vector.broadcast %cst_19 : f32 to vector<1x8x8xf32>
    %41 = arith.select %39, %34, %40 : vector<1x8x8xf32>
    %42 = arith.truncf %41 : vector<1x8x8xf32> to vector<1x8x8xbf16>
    %43 = arith.truncf %12 : vector<8x8x8xf32> to vector<8x8x8xbf16>
    %cst_20 = arith.constant 0.000000e+00 : bf16
    %44 = vector.broadcast %cst_20 : bf16 to vector<10x1x8xbf16>
    %c0_21 = arith.constant 0 : index
    %c0_22 = arith.constant 0 : index
    %c0_23 = arith.constant 0 : index
    %45 = vector.load %arg10[%c0_21, %c0_22, %c0_23] : memref<10x10x8xbf16, #tpu.memory_space<vmem>>, vector<10x1x8xbf16>
    tpu.vector_store %arg10[%c0_21, %c0_22, %c0_23], %44 {strides = array<i32>} : memref<10x10x8xbf16, #tpu.memory_space<vmem>>, vector<10x1x8xbf16>,
    %c0_24 = arith.constant 0 : index
    %c9 = arith.constant 9 : index
    %c0_25 = arith.constant 0 : index
    %46 = vector.load %arg10[%c0_24, %c9, %c0_25] : memref<10x10x8xbf16, #tpu.memory_space<vmem>>, vector<10x1x8xbf16>
    tpu.vector_store %arg10[%c0_24, %c9, %c0_25], %44 {strides = array<i32>} : memref<10x10x8xbf16, #tpu.memory_space<vmem>>, vector<10x1x8xbf16>,
    %c0_26 = arith.constant 0 : index
    %c1 = arith.constant 1 : index
    %c0_27 = arith.constant 0 : index
    %47 = vector.load %arg10[%c0_26, %c1, %c0_27] : memref<10x10x8xbf16, #tpu.memory_space<vmem>>, vector<1x8x8xbf16>
    tpu.vector_store %arg10[%c0_26, %c1, %c0_27], %38 {strides = array<i32>} : memref<10x10x8xbf16, #tpu.memory_space<vmem>>, vector<1x8x8xbf16>,
    %c9_28 = arith.constant 9 : index
    %c1_29 = arith.constant 1 : index
    %c0_30 = arith.constant 0 : index
    %48 = vector.load %arg10[%c9_28, %c1_29, %c0_30] : memref<10x10x8xbf16, #tpu.memory_space<vmem>>, vector<1x8x8xbf16>
    tpu.vector_store %arg10[%c9_28, %c1_29, %c0_30], %42 {strides = array<i32>} : memref<10x10x8xbf16, #tpu.memory_space<vmem>>, vector<1x8x8xbf16>,
    %c1_31 = arith.constant 1 : index
    %c1_32 = arith.constant 1 : index
    %c0_33 = arith.constant 0 : index
    %49 = vector.load %arg10[%c1_31, %c1_32, %c0_33] : memref<10x10x8xbf16, #tpu.memory_space<vmem>>, vector<8x8x8xbf16>
    tpu.vector_store %arg10[%c1_31, %c1_32, %c0_33], %43 {strides = array<i32>} : memref<10x10x8xbf16, #tpu.memory_space<vmem>>, vector<8x8x8xbf16>,
    %c0_34 = arith.constant 0 : index
    %c0_35 = arith.constant 0 : index
    %c0_36 = arith.constant 0 : index
    %50 = vector.load %arg10[%c0_34, %c0_35, %c0_36] : memref<10x10x8xbf16, #tpu.memory_space<vmem>>, vector<8x8x8xbf16>
    %51 = vector.shape_cast %50 : vector<8x8x8xbf16> to vector<64x8xbf16>
    %c0_37 = arith.constant 0 : index
    %c0_38 = arith.constant 0 : index
    %52 = vector.load %arg7[%c0_37, %c0_38] : memref<72x8xbf16, #tpu.memory_space<vmem>>, vector<8x8xbf16>
    %cst_39 = arith.constant dense<0.000000e+00> : vector<64x8xf32>
    %53 = tpu.matmul %51, %52, %cst_39 {dimension_numbers = #tpu.dot_dimension_numbers<[1], [0], [0], [1], [0, 0, 1, 1], [], []>} : vector<64x8xbf16>, vector<8x8xbf16>, vector<64x8xf32> -> vector<64x8xf32>
    %c0_40 = arith.constant 0 : index
    %c1_41 = arith.constant 1 : index
    %c0_42 = arith.constant 0 : index
    %54 = vector.load %arg10[%c0_40, %c1_41, %c0_42] : memref<10x10x8xbf16, #tpu.memory_space<vmem>>, vector<8x8x8xbf16>
    %55 = vector.shape_cast %54 : vector<8x8x8xbf16> to vector<64x8xbf16>
    %c8 = arith.constant 8 : index
    %c0_43 = arith.constant 0 : index
    %56 = vector.load %arg7[%c8, %c0_43] : memref<72x8xbf16, #tpu.memory_space<vmem>>, vector<8x8xbf16>
    %cst_44 = arith.constant dense<0.000000e+00> : vector<64x8xf32>
    %57 = tpu.matmul %55, %56, %cst_44 {dimension_numbers = #tpu.dot_dimension_numbers<[1], [0], [0], [1], [0, 0, 1, 1], [], []>} : vector<64x8xbf16>, vector<8x8xbf16>, vector<64x8xf32> -> vector<64x8xf32>
    %58 = arith.addf %53, %57 : vector<64x8xf32>
    %c0_45 = arith.constant 0 : index
    %c2 = arith.constant 2 : index
    %c0_46 = arith.constant 0 : index
    %59 = vector.load %arg10[%c0_45, %c2, %c0_46] : memref<10x10x8xbf16, #tpu.memory_space<vmem>>, vector<8x8x8xbf16>
    %60 = vector.shape_cast %59 : vector<8x8x8xbf16> to vector<64x8xbf16>
    %c16 = arith.constant 16 : index
    %c0_47 = arith.constant 0 : index
    %61 = vector.load %arg7[%c16, %c0_47] : memref<72x8xbf16, #tpu.memory_space<vmem>>, vector<8x8xbf16>
    %cst_48 = arith.constant dense<0.000000e+00> : vector<64x8xf32>
    %62 = tpu.matmul %60, %61, %cst_48 {dimension_numbers = #tpu.dot_dimension_numbers<[1], [0], [0], [1], [0, 0, 1, 1], [], []>} : vector<64x8xbf16>, vector<8x8xbf16>, vector<64x8xf32> -> vector<64x8xf32>
    %63 = arith.addf %58, %62 : vector<64x8xf32>
    %c1_49 = arith.constant 1 : index
    %c0_50 = arith.constant 0 : index
    %c0_51 = arith.constant 0 : index
    %64 = vector.load %arg10[%c1_49, %c0_50, %c0_51] : memref<10x10x8xbf16, #tpu.memory_space<vmem>>, vector<8x8x8xbf16>
    %65 = vector.shape_cast %64 : vector<8x8x8xbf16> to vector<64x8xbf16>
    %c24 = arith.constant 24 : index
    %c0_52 = arith.constant 0 : index
    %66 = vector.load %arg7[%c24, %c0_52] : memref<72x8xbf16, #tpu.memory_space<vmem>>, vector<8x8xbf16>
    %cst_53 = arith.constant dense<0.000000e+00> : vector<64x8xf32>
    %67 = tpu.matmul %65, %66, %cst_53 {dimension_numbers = #tpu.dot_dimension_numbers<[1], [0], [0], [1], [0, 0, 1, 1], [], []>} : vector<64x8xbf16>, vector<8x8xbf16>, vector<64x8xf32> -> vector<64x8xf32>
    %68 = arith.addf %63, %67 : vector<64x8xf32>
    %c1_54 = arith.constant 1 : index
    %c1_55 = arith.constant 1 : index
    %c0_56 = arith.constant 0 : index
    %69 = vector.load %arg10[%c1_54, %c1_55, %c0_56] : memref<10x10x8xbf16, #tpu.memory_space<vmem>>, vector<8x8x8xbf16>
    %70 = vector.shape_cast %69 : vector<8x8x8xbf16> to vector<64x8xbf16>
    %c32 = arith.constant 32 : index
    %c0_57 = arith.constant 0 : index
    %71 = vector.load %arg7[%c32, %c0_57] : memref<72x8xbf16, #tpu.memory_space<vmem>>, vector<8x8xbf16>
    %cst_58 = arith.constant dense<0.000000e+00> : vector<64x8xf32>
    %72 = tpu.matmul %70, %71, %cst_58 {dimension_numbers = #tpu.dot_dimension_numbers<[1], [0], [0], [1], [0, 0, 1, 1], [], []>} : vector<64x8xbf16>, vector<8x8xbf16>, vector<64x8xf32> -> vector<64x8xf32>
    %73 = arith.addf %68, %72 : vector<64x8xf32>
    %c1_59 = arith.constant 1 : index
    %c2_60 = arith.constant 2 : index
    %c0_61 = arith.constant 0 : index
    %74 = vector.load %arg10[%c1_59, %c2_60, %c0_61] : memref<10x10x8xbf16, #tpu.memory_space<vmem>>, vector<8x8x8xbf16>
    %75 = vector.shape_cast %74 : vector<8x8x8xbf16> to vector<64x8xbf16>
    %c40 = arith.constant 40 : index
    %c0_62 = arith.constant 0 : index
    %76 = vector.load %arg7[%c40, %c0_62] : memref<72x8xbf16, #tpu.memory_space<vmem>>, vector<8x8xbf16>
    %cst_63 = arith.constant dense<0.000000e+00> : vector<64x8xf32>
    %77 = tpu.matmul %75, %76, %cst_63 {dimension_numbers = #tpu.dot_dimension_numbers<[1], [0], [0], [1], [0, 0, 1, 1], [], []>} : vector<64x8xbf16>, vector<8x8xbf16>, vector<64x8xf32> -> vector<64x8xf32>
    %78 = arith.addf %73, %77 : vector<64x8xf32>
    %c2_64 = arith.constant 2 : index
    %c0_65 = arith.constant 0 : index
    %c0_66 = arith.constant 0 : index
    %79 = vector.load %arg10[%c2_64, %c0_65, %c0_66] : memref<10x10x8xbf16, #tpu.memory_space<vmem>>, vector<8x8x8xbf16>
    %80 = vector.shape_cast %79 : vector<8x8x8xbf16> to vector<64x8xbf16>
    %c48 = arith.constant 48 : index
    %c0_67 = arith.constant 0 : index
    %81 = vector.load %arg7[%c48, %c0_67] : memref<72x8xbf16, #tpu.memory_space<vmem>>, vector<8x8xbf16>
    %cst_68 = arith.constant dense<0.000000e+00> : vector<64x8xf32>
    %82 = tpu.matmul %80, %81, %cst_68 {dimension_numbers = #tpu.dot_dimension_numbers<[1], [0], [0], [1], [0, 0, 1, 1], [], []>} : vector<64x8xbf16>, vector<8x8xbf16>, vector<64x8xf32> -> vector<64x8xf32>
    %83 = arith.addf %78, %82 : vector<64x8xf32>
    %c2_69 = arith.constant 2 : index
    %c1_70 = arith.constant 1 : index
    %c0_71 = arith.constant 0 : index
    %84 = vector.load %arg10[%c2_69, %c1_70, %c0_71] : memref<10x10x8xbf16, #tpu.memory_space<vmem>>, vector<8x8x8xbf16>
    %85 = vector.shape_cast %84 : vector<8x8x8xbf16> to vector<64x8xbf16>
    %c56 = arith.constant 56 : index
    %c0_72 = arith.constant 0 : index
    %86 = vector.load %arg7[%c56, %c0_72] : memref<72x8xbf16, #tpu.memory_space<vmem>>, vector<8x8xbf16>
    %cst_73 = arith.constant dense<0.000000e+00> : vector<64x8xf32>
    %87 = tpu.matmul %85, %86, %cst_73 {dimension_numbers = #tpu.dot_dimension_numbers<[1], [0], [0], [1], [0, 0, 1, 1], [], []>} : vector<64x8xbf16>, vector<8x8xbf16>, vector<64x8xf32> -> vector<64x8xf32>
    %88 = arith.addf %83, %87 : vector<64x8xf32>
    %c2_74 = arith.constant 2 : index
    %c2_75 = arith.constant 2 : index
    %c0_76 = arith.constant 0 : index
    %89 = vector.load %arg10[%c2_74, %c2_75, %c0_76] : memref<10x10x8xbf16, #tpu.memory_space<vmem>>, vector<8x8x8xbf16>
    %90 = vector.shape_cast %89 : vector<8x8x8xbf16> to vector<64x8xbf16>
    %c64 = arith.constant 64 : index
    %c0_77 = arith.constant 0 : index
    %91 = vector.load %arg7[%c64, %c0_77] : memref<72x8xbf16, #tpu.memory_space<vmem>>, vector<8x8xbf16>
    %cst_78 = arith.constant dense<0.000000e+00> : vector<64x8xf32>
    %92 = tpu.matmul %90, %91, %cst_78 {dimension_numbers = #tpu.dot_dimension_numbers<[1], [0], [0], [1], [0, 0, 1, 1], [], []>} : vector<64x8xbf16>, vector<8x8xbf16>, vector<64x8xf32> -> vector<64x8xf32>
    %93 = arith.addf %88, %92 : vector<64x8xf32>
    %94 = arith.truncf %93 : vector<64x8xf32> to vector<64x8xbf16>
    %95 = vector.shape_cast %94 : vector<64x8xbf16> to vector<8x8x8xbf16>
    %c0_79 = arith.constant 0 : index
    %c0_80 = arith.constant 0 : index
    %c0_81 = arith.constant 0 : index
    %c0_82 = arith.constant 0 : index
    %96 = vector.load %arg8[%c0_79, %c0_80, %c0_81, %c0_82] : memref<1x8x8x8xbf16, #tpu.memory_space<vmem>>, vector<1x8x8x8xbf16>
    %97 = vector.shape_cast %96 : vector<1x8x8x8xbf16> to vector<8x8x8xbf16>
    %98 = vector.shape_cast %95 : vector<8x8x8xbf16> to vector<1x8x8x8xbf16>
    tpu.vector_store %arg8[%c0_79, %c0_80, %c0_81, %c0_82], %98 {strides = array<i32>} : memref<1x8x8x8xbf16, #tpu.memory_space<vmem>>, vector<1x8x8x8xbf16>,
    %99 = arith.extf %94 : vector<64x8xbf16> to vector<64x8xf32>
    %cst_83 = arith.constant dense<0.000000e+00> : vector<8xf32>
    %100 = vector.multi_reduction <add>, %99, %cst_83 [0] : vector<64x8xf32> to vector<8xf32>
    %101 = vector.shape_cast %100 : vector<8xf32> to vector<1x8xf32>
    %cst_84 = arith.constant 1.562500e-02 : f32
    %102 = vector.broadcast %cst_84 : f32 to vector<1x8xf32>
    %103 = arith.mulf %101, %102 : vector<1x8xf32>
    %104 = vector.broadcast %103 : vector<1x8xf32> to vector<64x8xf32>
    %105 = arith.subf %99, %104 : vector<64x8xf32>
    %106 = arith.mulf %105, %105 : vector<64x8xf32>
    %cst_85 = arith.constant dense<0.000000e+00> : vector<8xf32>
    %107 = vector.multi_reduction <add>, %106, %cst_85 [0] : vector<64x8xf32> to vector<8xf32>
    %108 = vector.shape_cast %107 : vector<8xf32> to vector<1x8xf32>
    %109 = tpu.concatenate %101, %108 in 0 : vector<1x8xf32>, vector<1x8xf32> -> vector<2x8xf32>
    %c0_86 = arith.constant 0 : index
    %c0_87 = arith.constant 0 : index
    %c0_88 = arith.constant 0 : index
    %c0_89 = arith.constant 0 : index
    %110 = vector.load %arg9[%c0_86, %c0_87, %c0_88, %c0_89] : memref<1x1x2x8xf32, #tpu.memory_space<vmem>>, vector<1x1x2x8xf32>
    %111 = vector.shape_cast %110 : vector<1x1x2x8xf32> to vector<2x8xf32>
    %112 = vector.shape_cast %109 : vector<2x8xf32> to vector<1x1x2x8xf32>
    tpu.vector_store %arg9[%c0_86, %c0_87, %c0_88, %c0_89], %112 {strides = array<i32>} : memref<1x1x2x8xf32, #tpu.memory_space<vmem>>, vector<1x1x2x8xf32>,
    return
  }
  func.func @transform_0(%arg0: i32, %arg1: i32) -> (i32, i32, i32, i32) {
    %c0_i32 = arith.constant 0 : i32
    %c0_i32_0 = arith.constant 0 : i32
    %c0_i32_1 = arith.constant 0 : i32
    return %arg0, %arg1, %c0_i32, %c0_i32_0 : i32, i32, i32, i32
  }
  func.func @transform_1(%arg0: i32, %arg1: i32) -> (i32, i32, i32, i32) {
    %c8_i32 = arith.constant 8 : i32
    %0 = arith.muli %arg1, %c8_i32 : i32
    %c1_i32 = arith.constant 1 : i32
    %1 = arith.subi %0, %c1_i32 : i32
    %c0_i32 = arith.constant 0 : i32
    %2 = arith.maxsi %1, %c0_i32 : i32
    %c0_i32_0 = arith.constant 0 : i32
    %c0_i32_1 = arith.constant 0 : i32
    %c0_i32_2 = arith.constant 0 : i32
    return %arg0, %2, %c0_i32_0, %c0_i32_1 : i32, i32, i32, i32
  }
  func.func @transform_2(%arg0: i32, %arg1: i32) -> (i32, i32, i32, i32) {
    %c1_i32 = arith.constant 1 : i32
    %0 = arith.addi %arg1, %c1_i32 : i32
    %c8_i32 = arith.constant 8 : i32
    %1 = arith.muli %0, %c8_i32 : i32
    %c7_i32 = arith.constant 7 : i32
    %2 = arith.minsi %1, %c7_i32 : i32
    %c0_i32 = arith.constant 0 : i32
    %c0_i32_0 = arith.constant 0 : i32
    %c0_i32_1 = arith.constant 0 : i32
    return %arg0, %2, %c0_i32, %c0_i32_0 : i32, i32, i32, i32
  }
  func.func @transform_3(%arg0: i32, %arg1: i32) -> (i32, i32) {
    %c0_i32 = arith.constant 0 : i32
    %c0_i32_0 = arith.constant 0 : i32
    %c0_i32_1 = arith.constant 0 : i32
    return %c0_i32, %c0_i32_0 : i32, i32
  }
  func.func @transform_4(%arg0: i32, %arg1: i32) -> (i32, i32) {
    %c0_i32 = arith.constant 0 : i32
    %c0_i32_0 = arith.constant 0 : i32
    %c0_i32_1 = arith.constant 0 : i32
    return %c0_i32, %c0_i32_0 : i32, i32
  }
  func.func @transform_5(%arg0: i32, %arg1: i32) -> (i32, i32) {
    %c0_i32 = arith.constant 0 : i32
    %c0_i32_0 = arith.constant 0 : i32
    %c0_i32_1 = arith.constant 0 : i32
    return %c0_i32, %c0_i32_0 : i32, i32
  }
  func.func @transform_6(%arg0: i32, %arg1: i32) -> (i32, i32, i32, i32) {
    %c0_i32 = arith.constant 0 : i32
    %c0_i32_0 = arith.constant 0 : i32
    %c0_i32_1 = arith.constant 0 : i32
    return %arg0, %arg1, %c0_i32, %c0_i32_0 : i32, i32, i32, i32
  }
  func.func @transform_7(%arg0: i32, %arg1: i32) -> (i32, i32, i32, i32) {
    %c0_i32 = arith.constant 0 : i32
    %c0_i32_0 = arith.constant 0 : i32
    %c0_i32_1 = arith.constant 0 : i32
    return %arg0, %arg1, %c0_i32, %c0_i32_0 : i32, i32, i32, i32
  }
}

</mosaic_0001>

<bundles_post_ra>
// kernel: res_down.5
= control target key start
LH: loop header
LB: loop body
LE: loop exit
PB: predicated region body
PF: predicated region fallthrough
CT: control target
= control target key end

     0   :  { %s594_s15 = smov 0   ;;  %s596_s16 = smov 0   ;;  %s648_s0 = inlined_call_operand.vmem [shape: bf16[2,8,8,8], index: 0, kind: input, shape index: {}]   ;;  %s649_s1 = inlined_call_operand.vmem [shape: f32[1,8], index: 1, kind: input, shape index: {}]   ;;  %s650_s2 = inlined_call_operand.vmem [shape: f32[1,8], index: 2, kind: input, shape index: {}]   ;;  %s651_s3 = inlined_call_operand.vmem [shape: bf16[2,8,8,8], index: 3, kind: input, shape index: {}]   ;;  %s652_s4 = inlined_call_operand.vmem [shape: f32[2,8,8,8], index: 4, kind: output, shape index: {}]  }
   0x1   :  { %s598_s17 = smov 0  }
   0x2 LB: > { %s26_s18 = sadd.s32 1, %s563_s16  ;;  %p469_p0 = scmp.ge.s32.totalorder %s567_s17, 1  ;;  %s567_s17 = sphi %s598_s17, %s14_s17   ;;  %s563_s16 = sphi %s596_s16, %s654_s16   ;;  %s559_s15 = sphi %s594_s15, %s653_s15  }
   0x3   : > { %p28_p1 = scmp.ge.s32.totalorder %s26_s18, 2  ;;  %p200_p2 = scmp.lt.s32.totalorder %s567_s17, 3 }
   0x5   : > { %s656_s18 = smov (%p28_p1, %s26_s18), 0  ;;  %p201_p3 = pnand %p469_p0, %p200_p2 }
   0x6   : > { %p244_p4 = scmp.lt.s32.totalorder (!%p201_p3), %s559_s15, 1  ;;  %v476_v0 = vld [vmem:[%s649_s1] ss:$0 sm:$0xff] (!%p201_p3)  ;;  %vm351_vm0 = vcmask (!%p201_p3), 64512  }
   0x7   : > { %204 = sbr.rel (%p201_p3) target bundleno = 36 (0x24), region = 36  ;;  %v477_v11 = vld [vmem:[%s650_s2] ss:$0 sm:$0xff] (!%p201_p3) }
   0xe   : > { %s658_s15 = smov (!%p244_p4, %s559_s15), 1 }
   0xf   : > { %s480_s19 = sshll.u32 %s658_s15, 5  ;;  %s482_s30 = sshll.u32 %s658_s15, 6 }
  0x10   : > { %s251_s22 = scalar_lea.vmem %s648_s0, %s480_s19  ;;  %s261_s25 = scalar_lea.vmem %s651_s3, %s480_s19 }
  0x11   : > { %v484_v1 = vld [vmem:[%s251_s22] sm:$0xff]   ;;  %v515_v3 = vld [vmem:[%s251_s22 + $0x8] sm:$0xff]   ;;  %v516_v9 = vld [vmem:[%s251_s22 + $0x10] sm:$0xff]   ;;  %s271_s7 = scalar_lea.vmem %s652_s4, %s482_s30 }
  0x12   : > { %v500_v2 = vld [vmem:[%s261_s25] sm:$0xff]   ;;  %v485_v4 = vunpack.c.l.bf16 %v484_v1  ;;  %v486_v6 = vunpack.c.h.bf16 %v484_v1  ;;  %v518_v8 = vld [vmem:[%s261_s25 + $0x8] sm:$0xff]   ;;  %v519_v10 = vld [vmem:[%s261_s25 + $0x10] sm:$0xff]   ;;  %v489_v12 = vunpack.c.l.bf16 %v515_v3  ;;  %v490_v14 = vunpack.c.h.bf16 %v515_v3 }
  0x13   : > { %v501_v5 = vunpack.c.l.bf16 %v500_v2  ;;  %v502_v7 = vunpack.c.h.bf16 %v500_v2  ;;  %v505_v13 = vunpack.c.l.bf16 %v518_v8  ;;  %v506_v15 = vunpack.c.h.bf16 %v518_v8  ;;  %v517_v16 = vld [vmem:[%s251_s22 + $0x18] sm:$0xff]  }
  0x14   : > { %v296_v17 = vmul.f32 %v485_v4, %v476_v0  ;;  %v297_v18 = vmul.f32 %v486_v6, %v476_v0  ;;  %v493_v19 = vunpack.c.l.bf16 %v516_v9  ;;  %v509_v20 = vunpack.c.l.bf16 %v519_v10  ;;  %v520_v21 = vld [vmem:[%s261_s25 + $0x18] sm:$0xff]  }
  0x15   : > { %v298_v22 = vmul.f32 %v489_v12, %v476_v0  ;;  %v299_v23 = vmul.f32 %v490_v14, %v476_v0  ;;  %v494_v24 = vunpack.c.h.bf16 %v516_v9  ;;  %v510_v25 = vunpack.c.h.bf16 %v519_v10 }
  0x16   : > { %v311_v26 = vadd.f32 %v477_v11, %v296_v17  ;;  %v312_v27 = vadd.f32 %v477_v11, %v297_v18  ;;  %v300_v28 = vmul.f32 %v493_v19, %v476_v0  ;;  %v497_v29 = vunpack.c.l.bf16 %v517_v16 }
  0x17   : > { %v313_v30 = vadd.f32 %v477_v11, %v298_v22  ;;  %v314_v31 = vadd.f32 %v477_v11, %v299_v23  ;;  %v301_v32 = vmul.f32 %v494_v24, %v476_v0  ;;  %v513_v33 = vunpack.c.l.bf16 %v520_v21 }
  0x18   : > { %v319_v34 = vmax.f32 %v311_v26, 0.0  ;;  %v320_v35 = vmax.f32 %v312_v27, 0.0  ;;  %v315_v36 = vadd.f32 %v477_v11, %v300_v28  ;;  %v302_v37 = vmul.f32 %v497_v29, %v476_v0 }
  0x19   : > { %v321_v38 = vmax.f32 %v313_v30, 0.0  ;;  %v322_v39 = vmax.f32 %v314_v31, 0.0  ;;  %v316_v40 = vadd.f32 %v477_v11, %v301_v32  ;;  %v498_v41 = vunpack.c.h.bf16 %v517_v16 }
  0x1a   : > { %v343_v42 = vadd.f32 %v501_v5, %v319_v34  ;;  %v344_v43 = vadd.f32 %v502_v7, %v320_v35  ;;  %v323_v44 = vmax.f32 %v315_v36, 0.0  ;;  %v317_v45 = vadd.f32 %v477_v11, %v302_v37 }
  0x1b   : > { %v345_v46 = vadd.f32 %v505_v13, %v321_v38  ;;  %v346_v47 = vadd.f32 %v506_v15, %v322_v39  ;;  %v324_v48 = vmax.f32 %v316_v40, 0.0  ;;  %v303_v49 = vmul.f32 %v498_v41, %v476_v0 }
  0x1c   : > { %352 = vst.msk [vmem:[%s271_s7] sm:$0xff] %vm351_vm0, %v343_v42  ;;  %353 = vst.msk [vmem:[%s271_s7 + $0x8] sm:$0xff] %vm351_vm0, %v344_v43  ;;  %v347_v50 = vadd.f32 %v509_v20, %v323_v44  ;;  %v325_v51 = vmax.f32 %v317_v45, 0.0  ;;  %v514_v54 = vunpack.c.h.bf16 %v520_v21 }
  0x1d   : > { %354 = vst.msk [vmem:[%s271_s7 + $0x10] sm:$0xff] %vm351_vm0, %v345_v46  ;;  %355 = vst.msk [vmem:[%s271_s7 + $0x18] sm:$0xff] %vm351_vm0, %v346_v47  ;;  %v348_v52 = vadd.f32 %v510_v25, %v324_v48  ;;  %v318_v53 = vadd.f32 %v477_v11, %v303_v49 }
  0x1e   : > { %356 = vst.msk [vmem:[%s271_s7 + $0x20] sm:$0xff] %vm351_vm0, %v347_v50  ;;  %v349_v55 = vadd.f32 %v513_v33, %v325_v51 }
  0x1f   : > { %357 = vst.msk [vmem:[%s271_s7 + $0x28] sm:$0xff] %vm351_vm0, %v348_v52  ;;  %v326_v56 = vmax.f32 %v318_v53, 0.0 }
  0x20   : > { %358 = vst.msk [vmem:[%s271_s7 + $0x30] sm:$0xff] %vm351_vm0, %v349_v55 }
  0x21   : > { %v350_v57 = vadd.f32 %v514_v54, %v326_v56 }
  0x23   : > { %359 = vst.msk [vmem:[%s271_s7 + $0x38] sm:$0xff] %vm351_vm0, %v350_v57 }
  0x24 PF: > { %s14_s17 = sadd.s32 1, %s567_s17   ;;  %s653_s15 = smov %s563_s16 }
  0x25   : > { %p11_p5 = scmp.ge.s32.totalorder %s14_s17, 4   ;;  %s654_s16 = smov %s656_s18 }
  0x27   :  { %13 = sbr.rel (!%p11_p5) target bundleno = 2 (0x2), region = 69 }

// kernel: res_down.4
= control target key start
LH: loop header
LB: loop body
LE: loop exit
PB: predicated region body
PF: predicated region fallthrough
CT: control target
= control target key end

     0   :  { %s3055_s24 = smov 0   ;;  %s3057_s1 = smov 0   ;;  %s3701_s0 = inlined_call_operand.vmem [shape: bf16[2,8,8,8], index: 0, kind: input, shape index: {}, may-alias: {0,1,2}]   ;;  %s3702_s1 = inlined_call_operand.vmem [shape: bf16[2,8,8,8], index: 1, kind: input, shape index: {}, may-alias: {0,1,2}]   ;;  %s3703_s2 = inlined_call_operand.vmem [shape: bf16[2,8,8,8], index: 2, kind: input, shape index: {}, may-alias: {0,1,2}]   ;;  %s3704_s3 = inlined_call_operand.vmem [shape: f32[1,8], index: 3, kind: input, shape index: {}]   ;;  %s3705_s4 = inlined_call_operand.vmem [shape: f32[1,8], index: 4, kind: input, shape index: {}]   ;;  %s3706_s5 = inlined_call_operand.vmem [shape: bf16[72,8], index: 5, kind: input, shape index: {}]   ;;  %s3707_s6 = inlined_call_operand.vmem [shape: bf16[2,8,8,8], index: 6, kind: output, shape index: {0}]   ;;  %s3708_s7 = inlined_call_operand.vmem [shape: f32[2,1,2,8], index: 7, kind: output, shape index: {1}]  }
   0x1   :  { %s3059_s2 = smov 0  }
   0x2 LB: > { %s30_s25 = sadd.s32 1, %s3008_s1  ;;  %p2573_p0 = scmp.ge.s32.totalorder %s3012_s2, 1  ;;  %s3012_s2 = sphi %s3059_s2, %s18_s2   ;;  %s3008_s1 = sphi %s3057_s1, %s3720_s1   ;;  %s3004_s24 = sphi %s3055_s24, %s3719_s24  }
   0x3   : > { %p32_p1 = scmp.ge.s32.totalorder %s30_s25, 2  ;;  %p325_p2 = scmp.lt.s32.totalorder %s3012_s2, 3 }
   0x5   : > { %s3722_s25 = smov (%p32_p1, %s30_s25), 0  ;;  %p326_p3 = pnand %p2573_p0, %p325_p2 }
   0x6   : > { %v931_v0 = vld [vmem:[%s3706_s5 + $0x4] sm:$0xf] (!%p326_p3)  ;;  %vm957_vm0 = vcmask (!%p326_p3), 1043456   ;;  %v1531_v1 = vld [vmem:[%s3706_s5 + $0x10] sm:$0xf] (!%p326_p3)  ;;  %p397_p4 = scmp.lt.s32.totalorder (!%p326_p3), %s3004_s24, 1 }
   0x7   : > { %329 = sbr.rel (%p326_p3) target bundleno = 428 (0x1ac), region = 44  ;;  %2942 = vmatprep.subr.msk.bf16.mxu1 (!%p326_p3), %vm957_vm0, %v931_v0  ;;  %2946 = vmatprep.subr.msk.bf16.mxu0 (!%p326_p3), %vm957_vm0, %v1531_v1  ;;  %v959_v2 = vsel (!%p326_p3), %vm957_vm0, %v931_v0, 0  ;;  %v3083_v3 = vsel (!%p326_p3), %vm957_vm0, %v1531_v1, 0  ;;  %vm540_vm1 = vcmask (!%p326_p3), 57344   ;;  %vm541_vm2 = vsmask.f32 (!%p326_p3), 256 }
   0x8   : > { %2787 = vmatpush3.bf16.msra.mxu1 (!%p326_p3), %v959_v2  ;;  %2827 = vmatpush3.bf16.msra.mxu0 (!%p326_p3), %v3083_v3  ;;  %v543_v4 = vld [vmem:[#allocation2] sm:$0x1] (!%p326_p3)  ;;  %vm3088_vm3 = vmand (!%p326_p3), %vm540_vm1, %vm541_vm2  ;;  %v546_v6 = vld [vmem:[#allocation2 + $0x8] sm:$0x1] (!%p326_p3)  ;;  %vm573_vm4 = vsmask.f32 (!%p326_p3), 7938 }
   0x9   : > { %v575_v7 = vld [vmem:[#allocation2 + $0x4] sm:$0x1] (!%p326_p3)  ;;  %v544_v8 = vsel (!%p326_p3), %vm3088_vm3, 0, %v543_v4  ;;  %v547_v9 = vsel (!%p326_p3), %vm3088_vm3, 0, %v546_v6  ;;  %vm3098_vm5 = vmand (!%p326_p3), %vm540_vm1, %vm573_vm4  ;;  %v578_v11 = vld [vmem:[#allocation2 + $0xc] sm:$0x1] (!%p326_p3) }
   0xa   : > { %545 = vst [vmem:[#allocation2] sm:$0x1] (!%p326_p3), %v544_v8  ;;  %548 = vst [vmem:[#allocation2 + $0x8] sm:$0x1] (!%p326_p3), %v547_v9  ;;  %v576_v12 = vsel (!%p326_p3), %vm3098_vm5, 0, %v575_v7  ;;  %v579_v13 = vsel (!%p326_p3), %vm3098_vm5, 0, %v578_v11 }
   0xb   : > { %v3014_v14 = vmov (!%p326_p3), 0.0|0.0   ;;  %v3116_v16 = vld [vmem:[%s3706_s5] sm:$0xf] (!%p326_p3)  ;;  %577 = vst [vmem:[#allocation2 + $0x4] sm:$0x1] (!%p326_p3), %v576_v12  ;;  %vm618_vm6 = vcmask (!%p326_p3), 60416  }
   0xc   : > { %v2585_v15 = vcombine.low (!%p326_p3), %v3014_v14, %v3014_v14  ;;  %v3121_v17 = vld [vmem:[%s3704_s3] ss:$0 sm:$0xff] (!%p326_p3)  ;;  %580 = vst [vmem:[#allocation2 + $0xc] sm:$0x1] (!%p326_p3), %v579_v13  ;;  %2943 = vmatprep.subr.msk.bf16.mxu1 (!%p326_p3), %vm957_vm0, %v3116_v16  ;;  %v549_v24 = vld [vmem:[#allocation2 + $0x10] sm:$0x1] (!%p326_p3)  ;;  %vm3150_vm7 = vmand (!%p326_p3), %vm618_vm6, %vm573_vm4 }
   0xd   : > { %v3126_v18 = vld [vmem:[%s3705_s4] ss:$0 sm:$0xff] (!%p326_p3)  ;;  %v581_v25 = vld [vmem:[#allocation2 + $0x14] sm:$0x1] (!%p326_p3)  ;;  %v550_v26 = vsel (!%p326_p3), %vm3088_vm3, 0, %v549_v24  ;;  %vm944_vm11 = vcmask (!%p326_p3), 64512  }
   0xe   : > { %s3724_s24 = smov (!%p397_p4, %s3004_s24), 1  ;;  %v609_v21 = vshrl.u32 %v2585_v15, 16  ;;  %v612_v22 = vshll.u32 %v2585_v15, 16  ;;  %v582_v27 = vsel %vm3098_vm5, 0, %v581_v25  ;;  %v3138_v28 = vld [vmem:[%s3706_s5 + $0x14] sm:$0xf] }
   0xf   : > { %s2701_s30 = sshll.u32 %s3724_s24, 5  ;;  %551 = vst [vmem:[#allocation2 + $0x10] sm:$0x1] %v550_v26  ;;  %583 = vst [vmem:[#allocation2 + $0x14] sm:$0x1] %v582_v27  ;;  %2948 = vmatprep.subr.msk.bf16.mxu0 %vm957_vm0, %v3138_v28  ;;  %vm1150_vm12 = vcmask 1042432  }
  0x10   : > { %s3107_s10 = scalar_lea.vmem %s3701_s0, %s2701_s30  ;;  %v3142_v31 = vrot.slane %v609_v21, 7  ;;  %v552_v34 = vld [vmem:[#allocation2 + $0x18] sm:$0x1]  ;;  %v584_v35 = vld [vmem:[#allocation2 + $0x1c] sm:$0x1]  ;;  %vm1151_vm13 = vcmask 1046532   ;;  %s3650_s13 = scalar_lea.vmem %s3707_s6, %s2701_s30 }
  0x11   : > { %v2723_v19 = vld [vmem:[%s3107_s10] sm:$0xff]   ;;  %v2738_v29 = vld [vmem:[%s3107_s10 + $0x8] sm:$0xff]   ;;  %v2739_v36 = vld [vmem:[%s3107_s10 + $0x10] sm:$0xff]   ;;  %v553_v38 = vsel %vm3088_vm3, 0, %v552_v34  ;;  %v585_v39 = vsel %vm3098_vm5, 0, %v584_v35  ;;  %s2582_s30 = sshll.u32 %s3724_s24, 1 }
  0x12   : > { %v2724_v20 = vunpack.c.l.bf16 %v2723_v19  ;;  %v2725_v23 = vunpack.c.h.bf16 %v2723_v19  ;;  %v2728_v33 = vunpack.c.l.bf16 %v2738_v29  ;;  %v2729_v40 = vunpack.c.h.bf16 %v2738_v29  ;;  %v555_v41 = vld [vmem:[#allocation2 + $0x20] sm:$0x1]  ;;  %v587_v42 = vld [vmem:[#allocation2 + $0x24] sm:$0x1]  ;;  %554 = vst [vmem:[#allocation2 + $0x18] sm:$0x1] %v553_v38  ;;  %vm3337_vm14 = vmor %vm1150_vm12, %vm1151_vm13  ;;  %s454_s16 = scalar_lea.vmem %s3708_s7, %s2582_s30 }
  0x13   : > { %v2732_v43 = vunpack.c.l.bf16 %v2739_v36  ;;  %v3160_v45 = vor.u32 %v612_v22, %v3142_v31  ;;  %v615_v46 = vrot.slane %v3142_v31, 4  ;;  %586 = vst [vmem:[#allocation2 + $0x1c] sm:$0x1] %v585_v39  ;;  %v620_v48 = vld [vmem:[#allocation2] sm:$0xf]  ;;  %v556_v51 = vsel %vm3088_vm3, 0, %v555_v41 }
  0x14   : > { %v480_v30 = vmul.f32 %v2724_v20, %v3121_v17  ;;  %v481_v32 = vmul.f32 %v2725_v23, %v3121_v17  ;;  %v482_v49 = vmul.f32 %v2728_v33, %v3121_v17  ;;  %v483_v50 = vmul.f32 %v2729_v40, %v3121_v17  ;;  %v558_v53 = vld [vmem:[#allocation2 + $0x28] sm:$0x1]  ;;  %v623_v56 = vld [vmem:[#allocation2 + $0x4] sm:$0x1]  ;;  %557 = vst [vmem:[#allocation2 + $0x20] sm:$0x1] %v556_v51 }
  0x15   : > { %v588_v52 = vsel %vm3098_vm5, 0, %v587_v42  ;;  %v621_v55 = vsel %vm3150_vm7, %v3160_v45, %v620_v48  ;;  %v484_v58 = vmul.f32 %v2732_v43, %v3121_v17  ;;  %v624_v59 = vsel %vm3088_vm3, %v615_v46, %v623_v56  ;;  %v590_v2 = vld [vmem:[#allocation2 + $0x2c] sm:$0x1]  ;;  %v3186_v4 = vld [vmem:[%s3107_s10 + $0x18] sm:$0xff]   ;;  %v751_v14 = vld [vmem:[#allocation2 + $0x8] sm:$0xf] }
  0x16   : > { %v494_v44 = vadd.f32 %v3126_v18, %v480_v30  ;;  %v495_v47 = vadd.f32 %v3126_v18, %v481_v32  ;;  %589 = vst [vmem:[#allocation2 + $0x24] sm:$0x1] %v588_v52  ;;  %622 = vst [vmem:[#allocation2] sm:$0xf] %v621_v55  ;;  %v496_v60 = vadd.f32 %v3126_v18, %v482_v49  ;;  %v559_v1 = vsel %vm3088_vm3, 0, %v558_v53 }
  0x17   : > { %v497_v61 = vadd.f32 %v3126_v18, %v483_v50  ;;  %625 = vst [vmem:[#allocation2 + $0x4] sm:$0x1] %v624_v59  ;;  %v3181_v0 = vadd.f32 %v3126_v18, %v484_v58  ;;  %560 = vst [vmem:[#allocation2 + $0x28] sm:$0x1] %v559_v1  ;;  %v2733_v8 = vunpack.c.h.bf16 %v2739_v36  ;;  %v591_v20 = vsel %vm3098_vm5, 0, %v590_v2 }
  0x18   : > { %v502_v54 = vmax.f32 %v494_v44, 0.0  ;;  %v503_v57 = vmax.f32 %v495_v47, 0.0  ;;  %v504_v6 = vmax.f32 %v496_v60, 0.0  ;;  %v2736_v21 = vunpack.c.l.bf16 %v3186_v4  ;;  %v754_v23 = vld [vmem:[#allocation2 + $0xc] sm:$0x1] }
  0x19   : > { %v505_v7 = vmax.f32 %v497_v61, 0.0  ;;  %vm816_vm8 = vsmask.f32 3328  ;;  %vm817_vm9 = vsmask.f32 7440  ;;  %v506_v25 = vmax.f32 %v3181_v0, 0.0 }
  0x1a   : > { %v2706_v62 = vpack.c.bf16 %v502_v54, %v502_v54  ;;  %v2707_v63 = vpack.c.bf16 %v503_v57, %v503_v57  ;;  %v2708_v15 = vpack.c.bf16 %v504_v6, %v504_v6  ;;  %592 = vst [vmem:[#allocation2 + $0x2c] sm:$0x1] %v591_v20  ;;  %v485_v26 = vmul.f32 %v2733_v8, %v3121_v17  ;;  %v757_v27 = vld [vmem:[#allocation2 + $0x10] sm:$0xf]  ;;  %v760_v40 = vld [vmem:[#allocation2 + $0x14] sm:$0x1]  ;;  %vm3239_vm10 = vmor %vm816_vm8, %vm817_vm9 }
  0x1b   : > { %v2709_v19 = vpack.c.bf16 %v505_v7, %v505_v7  ;;  %v763_v51 = vld [vmem:[#allocation2 + $0x18] sm:$0xf]  ;;  %v486_v52 = vmul.f32 %v2736_v21, %v3121_v17  ;;  %v766_v57 = vld [vmem:[#allocation2 + $0x1c] sm:$0x1]  ;;  %v769_v58 = vld [vmem:[#allocation2 + $0x20] sm:$0xf]  ;;  %v3213_v2 = vpack.c.bf16 %v506_v25, %v506_v25 }
  0x1c   : > { %v671_v9 = vshrl.u32 %v2706_v62, 16  ;;  %v674_v11 = vshll.u32 %v2706_v62, 16  ;;  %v679_v12 = vshrl.u32 %v2707_v63, 16  ;;  %v682_v13 = vshll.u32 %v2707_v63, 16  ;;  %v561_v7 = vld [vmem:[#allocation2 + $0x30] sm:$0x1] }
  0x1d   : > { %v687_v29 = vshrl.u32 %v2708_v15, 16  ;;  %v690_v30 = vshll.u32 %v2708_v15, 16  ;;  %v695_v32 = vshrl.u32 %v2709_v19, 16  ;;  %v698_v33 = vshll.u32 %v2709_v19, 16  ;;  %v3193_v36 = vld [vmem:[#allocation2] sm:$0xf] }
  0x1e   : > { %v673_v22 = vrot.slane %v671_v9, 7  ;;  %v681_v24 = vrot.slane %v679_v12, 7  ;;  %v3195_v41 = vld [vmem:[#allocation2 + $0x4] sm:$0x1]  ;;  %v820_v42 = vshrl.u32 %v3193_v36, 16  ;;  %v823_v43 = vshll.u32 %v3193_v36, 16 }
  0x1f   : > { %v689_v44 = vrot.slane %v687_v29, 7  ;;  %v697_v47 = vrot.slane %v695_v32, 7  ;;  %v829_v50 = vshll.u32 %v3195_v41, 16  ;;  %v3211_v61 = vsel %vm957_vm0, %v3116_v16, 0  ;;  %v772_v63 = vld [vmem:[#allocation2 + $0x24] sm:$0x1] }
  0x20   : > { %v676_v34 = vor.u32 %v674_v11, %v673_v22  ;;  %v677_v35 = vrot.slane %v673_v22, 4  ;;  %v684_v38 = vor.u32 %v682_v13, %v681_v24  ;;  %v685_v39 = vrot.slane %v681_v24, 4  ;;  %v564_v8 = vld [vmem:[#allocation2 + $0x38] sm:$0x1]  ;;  %v593_v13 = vld [vmem:[#allocation2 + $0x34] sm:$0x1] }
  0x21   : > { %v822_v53 = vrot.slane %v820_v42, 4  ;;  %v825_v54 = vrot.slane %v823_v43, 5  ;;  %v692_v59 = vor.u32 %v690_v30, %v689_v44  ;;  %v693_v60 = vrot.slane %v689_v44, 4 }
  0x22   : > { %v752_v48 = vsel %vm3150_vm7, %v676_v34, %v751_v14  ;;  %v755_v49 = vsel %vm3088_vm3, %v677_v35, %v754_v23  ;;  %v758_v55 = vsel %vm3150_vm7, %v684_v38, %v757_v27  ;;  %v761_v56 = vsel %vm3088_vm3, %v685_v39, %v760_v40  ;;  %v596_v14 = vld [vmem:[#allocation2 + $0x3c] sm:$0x1] }
  0x23   : > { %753 = vst [vmem:[#allocation2 + $0x8] sm:$0xf] %v752_v48  ;;  %756 = vst [vmem:[#allocation2 + $0xc] sm:$0x1] %v755_v49  ;;  %v700_v62 = vor.u32 %v698_v33, %v697_v47  ;;  %v826_v0 = vor.u32 %v825_v54, %v822_v53  ;;  %v701_v1 = vrot.slane %v697_v47, 4  ;;  %v499_v6 = vadd.f32 %v3126_v18, %v485_v26 }
  0x24   : > { %759 = vst [vmem:[#allocation2 + $0x10] sm:$0xf] %v758_v55  ;;  %762 = vst [vmem:[#allocation2 + $0x14] sm:$0x1] %v761_v56  ;;  %v764_v9 = vsel %vm3150_vm7, %v692_v59, %v763_v51  ;;  %v767_v11 = vsel %vm3088_vm3, %v693_v60, %v766_v57  ;;  %v500_v12 = vadd.f32 %v3126_v18, %v486_v52  ;;  %v3223_v15 = vrot.slane %v829_v50, 5 }
  0x25   : > { %v770_v16 = vsel %vm3150_vm7, %v700_v62, %v769_v58  ;;  %765 = vst [vmem:[#allocation2 + $0x18] sm:$0xf] %v764_v9  ;;  %768 = vst [vmem:[#allocation2 + $0x1c] sm:$0x1] %v767_v11  ;;  %v773_v19 = vsel %vm3088_vm3, %v701_v1, %v772_v63  ;;  %v3229_v20 = vsel %vm957_vm0, %v3138_v28, 0  ;;  %v703_v21 = vshrl.u32 %v3213_v2, 16 }
  0x26   : > { %771 = vst [vmem:[#allocation2 + $0x20] sm:$0xf] %v770_v16  ;;  %v827_v22 = vrot.slane %v826_v0, 4  ;;  %774 = vst [vmem:[#allocation2 + $0x24] sm:$0x1] %v773_v19  ;;  %v706_v23 = vshll.u32 %v3213_v2, 16 }
  0x27   : > { %v562_v24 = vsel %vm3088_vm3, 0, %v561_v7  ;;  %v565_v25 = vsel %vm3088_vm3, 0, %v564_v8  ;;  %v507_v28 = vmax.f32 %v499_v6, 0.0  ;;  %v508_v27 = vmax.f32 %v500_v12, 0.0  ;;  %v775_v2 = vld [vmem:[#allocation2 + $0x28] sm:$0xf] }
  0x28   : > { %563 = vst [vmem:[#allocation2 + $0x30] sm:$0x1] %v562_v24  ;;  %566 = vst [vmem:[#allocation2 + $0x38] sm:$0x1] %v565_v25  ;;  %v594_v29 = vsel %vm3098_vm5, 0, %v593_v13  ;;  %v597_v30 = vsel %vm3098_vm5, 0, %v596_v14  ;;  %v832_v43 = vsel %vm3239_vm10, %v827_v22, %v3223_v15 }
  0x29   : > { %595 = vst [vmem:[#allocation2 + $0x34] sm:$0x1] %v594_v29  ;;  %598 = vst [vmem:[#allocation2 + $0x3c] sm:$0x1] %v597_v30  ;;  %v3256_v42 = vrot.slane %v703_v21, 7  ;;  %v3264_v53 = vpack.c.bf16 %v507_v28, %v507_v28  ;;  %v3273_v1 = vpack.c.bf16 %v508_v27, %v508_v27  ;;  %vm2401_vm15 = vcmask 1040384  }
  0x2a   : > { %v3247_v32 = vld [vmem:[#allocation2 + $0x8] sm:$0xf]  ;;  %v3249_v33 = vld [vmem:[#allocation2 + $0xc] sm:$0x1] }
  0x2b   : > { %v1403_v34 = vld [vmem:[#allocation2 + $0x8] sm:$0xf]  ;;  %v834_v35 = vshrl.u32 %v3247_v32, 16  ;;  %v837_v38 = vshll.u32 %v3247_v32, 16  ;;  %v843_v39 = vshll.u32 %v3249_v33, 16 }
  0x2c   : > { %v3254_v40 = vld [vmem:[#allocation2 + $0xc] sm:$0x1]  ;;  %v1405_v44 = vld [vmem:[#allocation2 + $0x10] sm:$0xf]  ;;  %v3261_v47 = vld [vmem:[#allocation2 + $0x14] sm:$0x1] }
  0x2d   : > { %v1420_v48 = vshrl.u32 %v1403_v34, 16  ;;  %v1423_v49 = vshll.u32 %v1403_v34, 16  ;;  %v836_v50 = vrot.slane %v834_v35, 4  ;;  %v839_v51 = vrot.slane %v837_v38, 5  ;;  %v3266_v58 = vld [vmem:[#allocation2 + $0x10] sm:$0xf] }
  0x2e   : > { %v1429_v52 = vshll.u32 %v3254_v40, 16  ;;  %v1434_v56 = vshrl.u32 %v1405_v44, 16  ;;  %v1437_v57 = vshll.u32 %v1405_v44, 16  ;;  %v845_v60 = vrot.slane %v843_v39, 5  ;;  %v3269_v63 = vld [vmem:[#allocation2 + $0x18] sm:$0xf] }
  0x2f   : > { %v1422_v54 = vrot.slane %v1420_v48, 4  ;;  %v1425_v55 = vrot.slane %v1423_v49, 5  ;;  %v840_v59 = vor.u32 %v839_v51, %v836_v50  ;;  %v1443_v62 = vshll.u32 %v3261_v47, 16  ;;  %v3271_v0 = vld [vmem:[#allocation2 + $0x14] sm:$0x1] }
  0x30   : > { %v1431_v7 = vrot.slane %v1429_v52, 5  ;;  %v1436_v8 = vrot.slane %v1434_v56, 4  ;;  %v1439_v9 = vrot.slane %v1437_v57, 5  ;;  %v848_v12 = vshrl.u32 %v3266_v58, 16  ;;  %v3277_v19 = vld [vmem:[#allocation2 + $0x1c] sm:$0x1] }
  0x31   : > { %v1426_v6 = vor.u32 %v1425_v55, %v1422_v54  ;;  %v841_v11 = vrot.slane %v840_v59, 4  ;;  %v1445_v16 = vrot.slane %v1443_v62, 5  ;;  %v851_v13 = vshll.u32 %v3266_v58, 16  ;;  %v1407_v29 = vld [vmem:[#allocation2 + $0x18] sm:$0xf] }
  0x32   : > { %v1440_v15 = vor.u32 %v1439_v9, %v1436_v8  ;;  %v857_v21 = vshll.u32 %v3271_v0, 16  ;;  %v862_v22 = vshrl.u32 %v3269_v63, 16  ;;  %v850_v25 = vrot.slane %v848_v12, 4  ;;  %v3286_v39 = vld [vmem:[#allocation2 + $0x1c] sm:$0x1] }
  0x33   : > { %v1427_v14 = vrot.slane %v1426_v6, 4  ;;  %v846_v24 = vsel %vm3239_vm10, %v841_v11, %v845_v60  ;;  %v853_v28 = vrot.slane %v851_v13, 5  ;;  %v865_v27 = vshll.u32 %v3269_v63, 16  ;;  %v1409_v51 = vld [vmem:[#allocation2 + $0x20] sm:$0xf] }
  0x34   : > { %v2595_v30 = vcombine.low %v832_v43, %v846_v24  ;;  %v1441_v35 = vrot.slane %v1440_v15, 4  ;;  %v859_v38 = vrot.slane %v857_v21, 5  ;;  %v864_v48 = vrot.slane %v862_v22, 4  ;;  %v3293_v54 = vld [vmem:[#allocation2 + $0x24] sm:$0x1] }
  0x35   : > { %v1432_v34 = vsel %vm3239_vm10, %v1427_v14, %v1431_v7  ;;  %v854_v44 = vor.u32 %v853_v28, %v850_v25  ;;  %v867_v49 = vrot.slane %v865_v27, 5  ;;  %v871_v50 = vshll.u32 %v3277_v19, 16  ;;  %v3304_v22 = vld [vmem:[#allocation2 + $0x20] sm:$0xf]  ;;  %v2136_v5 = vld [vmem:[#allocation2 + $0x10] sm:$0xe] }
  0x36   : > { %2788 = vmatprep.mubr.msk.bf16.mxu1 %vm944_vm11, %v2595_v30  ;;  %v1446_v52 = vsel %vm3239_vm10, %v1441_v35, %v1445_v16  ;;  %v1658_v43 = vrot.slane %v3254_v40, 5  ;;  %v1448_v55 = vshrl.u32 %v1407_v29, 16  ;;  %v708_v56 = vor.u32 %v706_v23, %v3256_v42  ;;  %v3312_v30 = vld [vmem:[%s3706_s5 + $0x8] sm:$0xf] }
  0x37   : > { %v2635_v57 = vcombine.low %v1432_v34, %v1446_v52  ;;  %v855_v59 = vrot.slane %v854_v44, 4  ;;  %v868_v60 = vor.u32 %v867_v49, %v864_v48  ;;  %v873_v62 = vrot.slane %v871_v50, 5  ;;  %v3317_v48 = vld [vmem:[#allocation2 + $0x24] sm:$0x1] }
  0x38   : > { %v1450_v6 = vrot.slane %v1448_v55, 4  ;;  %v1451_v7 = vshll.u32 %v1407_v29, 16  ;;  %v1457_v8 = vshll.u32 %v3286_v39, 16  ;;  %v1462_v9 = vshrl.u32 %v1409_v51, 16  ;;  %v778_v29 = vld [vmem:[#allocation2 + $0x2c] sm:$0x1] }
  0x39   : > { %2828 = vmatprep.mubr.msk.bf16.mxu0 %vm944_vm11, %v2635_v57  ;;  %v860_v11 = vsel %vm3239_vm10, %v855_v59, %v859_v38  ;;  %v869_v16 = vrot.slane %v868_v60, 4  ;;  %v1465_v12 = vshll.u32 %v1409_v51, 16  ;;  %v1471_v13 = vshll.u32 %v3293_v54, 16  ;;  %v1632_v59 = vld [vmem:[#allocation2 + $0x8] sm:$0xe] }
  0x3a   : > { %v1662_v23 = vrot.slane %v3261_v47, 5  ;;  %v1453_v14 = vrot.slane %v1451_v7, 5  ;;  %v1459_v15 = vrot.slane %v1457_v8, 5  ;;  %v1464_v21 = vrot.slane %v1462_v9, 4  ;;  %v1633_v60 = vld [vmem:[#allocation2 + $0x10] sm:$0xe] }
  0x3b   : > { %v874_v24 = vsel %vm3239_vm10, %v869_v16, %v873_v62  ;;  %v1467_v25 = vrot.slane %v1465_v12, 5  ;;  %v1473_v28 = vrot.slane %v1471_v13, 5  ;;  %v1666_v27 = vrot.slane %v3286_v39, 5  ;;  %v1634_v13 = vld [vmem:[#allocation2 + $0x18] sm:$0xe] }
  0x3c   : > { %v2596_v34 = vcombine.low %v860_v11, %v874_v24  ;;  %v1454_v35 = vor.u32 %v1453_v14, %v1450_v6  ;;  %v709_v38 = vrot.slane %v3256_v42, 4  ;;  %v776_v44 = vsel %vm3150_vm7, %v708_v56, %v775_v2  ;;  %v781_v2 = vld [vmem:[#allocation2 + $0x30] sm:$0xf]  ;;  %v784_v14 = vld [vmem:[#allocation2 + $0x34] sm:$0x1] }
  0x3d   : > { %v1468_v49 = vor.u32 %v1467_v25, %v1464_v21  ;;  %v1670_v50 = vrot.slane %v3293_v54, 5  ;;  %777 = vst [vmem:[#allocation2 + $0x28] sm:$0xf] %v776_v44  ;;  %v876_v51 = vshrl.u32 %v3304_v22, 16  ;;  %v879_v52 = vshll.u32 %v3304_v22, 16 }
  0x3e   : > { %2789 = vmatmul.mubr.msk.bf16.vlgmr.msra.gmra.mrb[0].mxu1 %vm944_vm11, %v2596_v34  ;;  %v1455_v55 = vrot.slane %v1454_v35, 4  ;;  %v779_v57 = vsel %vm3088_vm3, %v709_v38, %v778_v29  ;;  %v711_v42 = vshrl.u32 %v3264_v53, 16  ;;  %v714_v56 = vshll.u32 %v3264_v53, 16  ;;  %v787_v29 = vld [vmem:[#allocation2 + $0x38] sm:$0xf] }
  0x3f   : > { %2797 = vmatpush3.bf16.msra.mxu1 %v3211_v61  ;;  %v1469_v62 = vrot.slane %v1468_v49, 4  ;;  %780 = vst [vmem:[#allocation2 + $0x2c] sm:$0x1] %v779_v57  ;;  %v878_v6 = vrot.slane %v876_v51, 4  ;;  %v881_v7 = vrot.slane %v879_v52, 5  ;;  %v885_v8 = vshll.u32 %v3317_v48, 16 }
  0x40   : > { %v1460_v9 = vsel %vm3239_vm10, %v1455_v55, %v1459_v15  ;;  %v713_v11 = vrot.slane %v711_v42, 7  ;;  %v719_v16 = vshrl.u32 %v3273_v1, 16  ;;  %v722_v12 = vshll.u32 %v3273_v1, 16  ;;  %2944 = vmatprep.subr.msk.bf16.mxu1 %vm957_vm0, %v3312_v30  ;;  %v1798_v1 = vld [vmem:[%s3706_s5 + $0x18] sm:$0xf] }
  0x41   : > { %v1474_v61 = vsel %vm3239_vm10, %v1469_v62, %v1473_v28  ;;  %v882_v53 = vor.u32 %v881_v7, %v878_v6  ;;  %v887_v35 = vrot.slane %v885_v8, 5  ;;  %v790_v28 = vld [vmem:[#allocation2 + $0x3c] sm:$0x1]  ;;  %v2643_v38 = vrot.slane %v1632_v59, 9  ;;  %v567_v7 = vld [vmem:[#allocation2 + $0x40] sm:$0x1] }
  0x42   : > { %v2636_v21 = vcombine.low %v1460_v9, %v1474_v61  ;;  %v716_v24 = vor.u32 %v714_v56, %v713_v11  ;;  %v717_v15 = vrot.slane %v713_v11, 4  ;;  %v721_v25 = vrot.slane %v719_v16, 7  ;;  %v1635_v56 = vld [vmem:[#allocation2 + $0x20] sm:$0xe] }
  0x43   : > { %v2644_v44 = vrot.slane %v1633_v60, 9  ;;  %v2645_v49 = vrot.slane %v1634_v13, 9  ;;  %v883_v62 = vrot.slane %v882_v53, 4  ;;  %v1659_v6 = vsel %vm3337_vm14, %v2643_v38, %v1658_v43 }
  0x44   : > { %2829 = vmatmul.mubr.msk.bf16.vlgmr.msra.gmra.mrb[0].mxu0 %vm944_vm11, %v2636_v21  ;;  %v3345_v51 = vld [vmem:[#allocation2 + $0x28] sm:$0xf]  ;;  %v724_v52 = vor.u32 %v722_v12, %v721_v25  ;;  %v725_v55 = vrot.slane %v721_v25, 4  ;;  %v782_v57 = vsel %vm3150_vm7, %v716_v24, %v781_v2  ;;  %v785_v42 = vsel %vm3088_vm3, %v717_v15, %v784_v14  ;;  %v599_v2 = vld [vmem:[#allocation2 + $0x44] sm:$0x1] }
  0x45   : > { %2837 = vmatpush3.bf16.msra.mxu0 %v3229_v20  ;;  %v890_v59 = vshrl.u32 %v3345_v51, 16  ;;  %v893_v60 = vshll.u32 %v3345_v51, 16  ;;  %783 = vst [vmem:[#allocation2 + $0x30] sm:$0xf] %v782_v57  ;;  %786 = vst [vmem:[#allocation2 + $0x34] sm:$0x1] %v785_v42  ;;  %v1663_v11 = vsel %vm3337_vm14, %v2644_v44, %v1662_v23  ;;  %v2737_v43 = vunpack.c.h.bf16 %v3186_v4 }
  0x46   : > { %v3358_v8 = vld [vmem:[#allocation2 + $0x2c] sm:$0x1]  ;;  %v788_v9 = vsel %vm3150_vm7, %v724_v52, %v787_v29  ;;  %v791_v20 = vsel %vm3088_vm3, %v725_v55, %v790_v28  ;;  %2949 = vmatprep.subr.msk.bf16.mxu0 %vm957_vm0, %v1798_v1  ;;  %v1636_v16 = vld [vmem:[#allocation2 + $0x28] sm:$0xe]  ;;  %v2651_v53 = vcombine.low %v1659_v6, %v1663_v11  ;;  %v1667_v47 = vsel %vm3337_vm14, %v2645_v49, %v1666_v27 }
  0x47   : > { %v3369_v40 = vld [vmem:[#allocation2 + $0x2c] sm:$0x1]  ;;  %v892_v12 = vrot.slane %v890_v59, 4  ;;  %v895_v13 = vrot.slane %v893_v60, 5  ;;  %v899_v61 = vshll.u32 %v3358_v8, 16  ;;  %v2646_v23 = vrot.slane %v1635_v56, 9 }
  0x48   : > { %789 = vst [vmem:[#allocation2 + $0x38] sm:$0xf] %v788_v9  ;;  %792 = vst [vmem:[#allocation2 + $0x3c] sm:$0x1] %v791_v20  ;;  %2838 = vmatprep.mubr.msk.bf16.mxu0 %vm944_vm11, %v2651_v53  ;;  %v2647_v24 = vrot.slane %v1636_v16, 9  ;;  %v1674_v4 = vrot.slane %v3369_v40, 5  ;;  %v487_v25 = vmul.f32 %v2737_v43, %v3121_v17  ;;  %v888_v29 = vsel %vm3239_vm10, %v883_v62, %v887_v35 }
  0x49   : > { %v896_v14 = vor.u32 %v895_v13, %v892_v12  ;;  %v901_v21 = vrot.slane %v899_v61, 5  ;;  %v1671_v15 = vsel %vm3337_vm14, %v2646_v23, %v1670_v50  ;;  %v568_v39 = vsel %vm3088_vm3, 0, %v567_v7  ;;  %v2035_v20 = vld [vmem:[%s3706_s5 + $0x1c] sm:$0xf] }
  0x4a   : > { %v600_v27 = vsel %vm3098_vm5, 0, %v599_v2  ;;  %v1832_v38 = vsel %vm957_vm0, %v1798_v1, 0  ;;  %569 = vst [vmem:[#allocation2 + $0x40] sm:$0x1] %v568_v39  ;;  %v2652_v50 = vcombine.low %v1667_v47, %v1671_v15  ;;  %v501_v49 = vadd.f32 %v3126_v18, %v487_v25  ;;  %v570_v25 = vld [vmem:[#allocation2 + $0x48] sm:$0x1] }
  0x4b   : > { %v897_v28 = vrot.slane %v896_v14, 4  ;;  %601 = vst [vmem:[#allocation2 + $0x44] sm:$0x1] %v600_v27  ;;  %v1675_v59 = vsel %vm3337_vm14, %v2647_v24, %v1674_v4 }
  0x4c   : > { %v3391_v54 = vld [vmem:[#allocation2 + $0x30] sm:$0xf]  ;;  %v3393_v44 = vld [vmem:[#allocation2 + $0x34] sm:$0x1]  ;;  %v509_v12 = vmax.f32 %v501_v49, 0.0 }
  0x4d   : > { %v3395_v17 = vld [vmem:[#allocation2 + $0x34] sm:$0x1]  ;;  %v902_v52 = vsel %vm3239_vm10, %v897_v28, %v901_v21  ;;  %v904_v55 = vshrl.u32 %v3391_v54, 16  ;;  %v907_v35 = vshll.u32 %v3391_v54, 16  ;;  %v913_v1 = vshll.u32 %v3393_v44, 16 }
  0x4e   : > { %v1637_v57 = vld [vmem:[#allocation2 + $0x30] sm:$0xe]  ;;  %v2597_v42 = vcombine.low %v888_v29, %v902_v52  ;;  %v1678_v18 = vrot.slane %v3395_v17, 5  ;;  %v2713_v23 = vpack.c.bf16 %v509_v12, %v509_v12  ;;  %v2603_v52 = vcombine.low %v3193_v36, %v3247_v32  ;;  %v1129_v36 = vld [vmem:[#allocation2 + $0x18] sm:$0xe] }
  0x4f   : > { %v3403_v56 = vld [vmem:[#allocation2 + $0x38] sm:$0xf]  ;;  %v3405_v62 = vld [vmem:[#allocation2 + $0x3c] sm:$0x1]  ;;  %v2648_v60 = vrot.slane %v1637_v57, 9  ;;  %v906_v6 = vrot.slane %v904_v55, 4 }
  0x50   : > { %v909_v7 = vrot.slane %v907_v35, 5  ;;  %v918_v9 = vshrl.u32 %v3403_v56, 16  ;;  %2792 = vmatprep.mubr.msk.bf16.mxu1 %vm944_vm11, %v2597_v42  ;;  %v921_v11 = vshll.u32 %v3403_v56, 16  ;;  %v927_v16 = vshll.u32 %v3405_v62, 16  ;;  %2839 = vmatmul.mubr.msk.bf16.vlgmr.msra.gmra.mrb[0].mxu0 %vm944_vm11, %v2652_v50  ;;  %v1127_v57 = vld [vmem:[#allocation2 + $0x8] sm:$0xe] }
  0x51   : > { %v1679_v43 = vsel %vm3337_vm14, %v2648_v60, %v1678_v18  ;;  %2847 = vmatpush3.bf16.msra.mxu0 %v1832_v38  ;;  %v915_v2 = vrot.slane %v913_v1, 5  ;;  %v727_v4 = vshrl.u32 %v2713_v23, 16  ;;  %v730_v15 = vshll.u32 %v2713_v23, 16  ;;  %v793_v28 = vld [vmem:[#allocation2 + $0x40] sm:$0xf] }
  0x52   : > { %v910_v13 = vor.u32 %v909_v7, %v906_v6  ;;  %v920_v61 = vrot.slane %v918_v9, 4  ;;  %v2653_v53 = vcombine.low %v1675_v59, %v1679_v43  ;;  %v923_v47 = vrot.slane %v921_v11, 5  ;;  %2950 = vmatprep.subr.msk.bf16.mxu0 %vm957_vm0, %v2035_v20  ;;  %v796_v38 = vld [vmem:[#allocation2 + $0x44] sm:$0x1]  ;;  %v1126_v1 = vld [vmem:[#allocation2] sm:$0xe] }
  0x53   : > { %v929_v24 = vrot.slane %v927_v16, 5  ;;  %v729_v29 = vrot.slane %v727_v4, 7  ;;  %v571_v50 = vsel %vm3088_vm3, 0, %v570_v25  ;;  %v1155_v42 = vrot.slane %v3195_v41, 5  ;;  %v1128_v18 = vld [vmem:[#allocation2 + $0x10] sm:$0xe] }
  0x54   : > { %v911_v14 = vrot.slane %v910_v13, 4  ;;  %2842 = vmatprep.mubr.msk.bf16.mxu0 %vm944_vm11, %v2653_v53  ;;  %v924_v21 = vor.u32 %v923_v47, %v920_v61  ;;  %572 = vst [vmem:[#allocation2 + $0x48] sm:$0x1] %v571_v50  ;;  %v1159_v59 = vrot.slane %v3249_v33, 5  ;;  %v3436_v9 = vld [vmem:[#allocation2 + $0x3c] sm:$0x1]  ;;  %v2604_v53 = vcombine.low %v3266_v58, %v3269_v63 }
  0x55   : > { %v732_v55 = vor.u32 %v730_v15, %v729_v29  ;;  %v733_v35 = vrot.slane %v729_v29, 4  ;;  %v1638_v32 = vld [vmem:[#allocation2 + $0x38] sm:$0xe]  ;;  %v2611_v11 = vrot.slane %v1126_v1, 9  ;;  %v2612_v41 = vrot.slane %v1127_v57, 9 }
  0x56   : > { %v916_v39 = vsel %vm3239_vm10, %v911_v14, %v915_v2  ;;  %v925_v27 = vrot.slane %v924_v21, 4  ;;  %v1163_v33 = vrot.slane %v3271_v0, 5  ;;  %v1294_v16 = vld [vmem:[%s3706_s5 + $0xc] sm:$0xf]  ;;  %v2613_v43 = vrot.slane %v1128_v18, 9 }
  0x57   : > { %v794_v6 = vsel %vm3150_vm7, %v732_v55, %v793_v28  ;;  %v797_v7 = vsel %vm3088_vm3, %v733_v35, %v796_v38  ;;  %v1167_v12 = vrot.slane %v3277_v19, 5  ;;  %v2614_v13 = vrot.slane %v1129_v36, 9  ;;  %v1907_v61 = vld [vmem:[#allocation2 + $0x10] sm:$0xf]  ;;  %v1909_v23 = vld [vmem:[#allocation2 + $0x18] sm:$0xf] }
  0x58   : > { %v930_v49 = vsel %vm3239_vm10, %v925_v27, %v929_v24  ;;  %795 = vst [vmem:[#allocation2 + $0x40] sm:$0xf] %v794_v6  ;;  %798 = vst [vmem:[#allocation2 + $0x44] sm:$0x1] %v797_v7  ;;  %v1211_v2 = vsel %vm957_vm0, %v3312_v30, 0  ;;  %v2649_v47 = vrot.slane %v1638_v32, 9  ;;  %v2605_v14 = vcombine.low %v3304_v22, %v3345_v51 }
  0x59   : > { %v2598_v60 = vcombine.low %v916_v39, %v930_v49  ;;  %v1682_v0 = vrot.slane %v3436_v9, 5  ;;  %v3453_v21 = vsel %vm957_vm0, %v2035_v20, 0  ;;  %v3457_v19 = vsel %vm3337_vm14, %v2611_v11, %v1155_v42  ;;  %v1130_v51 = vld [vmem:[#allocation2 + $0x20] sm:$0xe]  ;;  %v1131_v20 = vld [vmem:[#allocation2 + $0x28] sm:$0xe] }
  0x5a   : > { %v3461_v58 = vsel %vm3337_vm14, %v2612_v41, %v1159_v59  ;;  %v3465_v30 = vsel %vm3337_vm14, %v2613_v43, %v1163_v33  ;;  %v3468_v24 = vsel %vm957_vm0, %v1294_v16, 0  ;;  %v1924_v4 = vshrl.u32 %v1907_v61, 16  ;;  %v3477_v25 = vld [vmem:[#allocation2 + $0x30] sm:$0xe]  ;;  %v1911_v28 = vld [vmem:[#allocation2 + $0x20] sm:$0xf] }
  0x5b   : > { %2793 = vmatmul.mubr.msk.bf16.gmra.mrb[4].mxu1 %vm944_vm11, %v2598_v60  ;;  %v640_v63 = vld [vmem:[#allocation2 + $0x48] sm:$0xf]  ;;  %v3475_v15 = vsel %vm3337_vm14, %v2614_v13, %v1167_v12  ;;  %v1927_v39 = vshll.u32 %v1907_v61, 16  ;;  %v1938_v27 = vshrl.u32 %v1909_v23, 16  ;;  %v1941_v29 = vshll.u32 %v1909_v23, 16 }
  0x5c   : > { %2798 = vmatprep.mubr.msk.bf16.mxu1 %vm944_vm11, %v2603_v52  ;;  %v641_v22 = vsel %vm3150_vm7, %v3160_v45, %v640_v63  ;;  %v1683_v37 = vsel %vm3337_vm14, %v2649_v47, %v1682_v0  ;;  %v2606_v45 = vcombine.low %v3391_v54, %v3403_v56  ;;  %v2619_v49 = vcombine.low %v3457_v19, %v3461_v58  ;;  %v1913_v52 = vld [vmem:[#allocation2 + $0x28] sm:$0xf]  ;;  %v2981_v1 = vld [vmem:[#allocation2 + $0x10] ss:$8 sps:$4 sm:$0xff]   ;;  %v3492_v60 = vld [vmem:[#allocation2 + $0x14] sm:$0x1] }
  0x5d   : > { %642 = vst [vmem:[#allocation2 + $0x48] sm:$0xf] %v641_v22  ;;  %v2615_v57 = vrot.slane %v1130_v51, 9  ;;  %v1171_v42 = vrot.slane %v3317_v48, 5  ;;  %v3490_v59 = vld [vmem:[#allocation2 + $0x38] sm:$0xe]  ;;  %v2620_v54 = vcombine.low %v3465_v30, %v3475_v15 }
  0x5e   : > { %v2616_v56 = vrot.slane %v1131_v20, 9  ;;  %v1175_v18 = vrot.slane %v3358_v8, 5  ;;  %v1926_v6 = vrot.slane %v1924_v4, 4  ;;  %v1915_v7 = vld [vmem:[#allocation2 + $0x30] sm:$0xf]  ;;  %v1929_v48 = vrot.slane %v1927_v39, 5 }
  0x5f   : > { %v3479_v38 = vld [vmem:[#allocation2 + $0x44] sm:$0x1]  ;;  %v1639_v50 = vld [vmem:[#allocation2 + $0x40] sm:$0xe]  ;;  %v1940_v32 = vrot.slane %v1938_v27, 4  ;;  %v1943_v11 = vrot.slane %v1941_v29, 5  ;;  %v3506_v8 = vsel %vm3337_vm14, %v2615_v57, %v1171_v42 }
  0x60   : > { %v2650_v55 = vrot.slane %v1639_v50, 9  ;;  %v1686_v35 = vrot.slane %v3479_v38, 5  ;;  %v2617_v33 = vrot.slane %v3477_v25, 9  ;;  %v3502_v43 = vld [vmem:[#allocation2 + $0x1c] sm:$0x1]  ;;  %v1952_v12 = vshrl.u32 %v1911_v28, 16 }
  0x61   : > { %v1955_v13 = vshll.u32 %v1911_v28, 16  ;;  %v602_v61 = vld [vmem:[#allocation2 + $0x4c] sm:$0x1]  ;;  %v1969_v47 = vshll.u32 %v1913_v52, 16  ;;  %v2618_v0 = vrot.slane %v3490_v59, 9  ;;  %v1183_v23 = vrot.slane %v3405_v62, 5 }
  0x62   : > { %v1687_v36 = vsel %vm3337_vm14, %v2650_v55, %v1686_v35  ;;  %v1980_v19 = vshrl.u32 %v1915_v7, 16  ;;  %v3516_v58 = vsel %vm3337_vm14, %v2616_v56, %v1175_v18  ;;  %v1930_v63 = vor.u32 %v1929_v48, %v1926_v6  ;;  %v3519_v51 = vld [vmem:[#allocation2 + $0x24] sm:$0x1]  ;;  %v2982_v20 = vld [vmem:[#allocation2 + $0x20] ss:$8 sps:$4 sm:$0xff]  }
  0x63   : > { %2799 = vmatmul.mubr.msk.bf16.vlgmr.msra.gmra.mrb[0].mxu1 %vm944_vm11, %v2604_v53  ;;  %v2654_v41 = vcombine.low %v1683_v37, %v1687_v36  ;;  %v1179_v53 = vrot.slane %v3393_v44, 5  ;;  %v1944_v44 = vor.u32 %v1943_v11, %v1940_v32  ;;  %v1947_v22 = vshll.u32 %v3502_v43, 16  ;;  %v3521_v4 = vld [vmem:[#allocation2 + $0x2c] sm:$0x1]  ;;  %v2983_v29 = vld [vmem:[#allocation2 + $0x30] ss:$8 sps:$4 sm:$0xff]  }
  0x64   : > { %2807 = vmatpush3.bf16.msra.mxu1 %v1211_v2  ;;  %2802 = vmatprep.mubr.msk.bf16.mxu1 %vm944_vm11, %v2605_v14  ;;  %v1966_v2 = vshrl.u32 %v1913_v52, 16  ;;  %v1933_v14 = vshll.u32 %v3492_v60, 16  ;;  %v1954_v25 = vrot.slane %v1952_v12, 4  ;;  %v1957_v62 = vrot.slane %v1955_v13, 5  ;;  %v3524_v37 = vld [vmem:[#allocation2 + $0x34] sm:$0x1] }
  0x65   : > { %2945 = vmatprep.subr.msk.bf16.mxu1 %vm957_vm0, %v1294_v16  ;;  %v1917_v16 = vld [vmem:[#allocation2 + $0x38] sm:$0xf]  ;;  %2843 = vmatmul.mubr.msk.bf16.gmra.mrb[4].mxu0 %vm944_vm11, %v2654_v41  ;;  %v1983_v39 = vshll.u32 %v1915_v7, 16  ;;  %v1971_v50 = vrot.slane %v1969_v47, 5  ;;  %v603_v55 = vsel %vm3098_vm5, 0, %v602_v61  ;;  %v3531_v35 = vsel %vm3337_vm14, %v2617_v33, %v1179_v53 }
  0x66   : > { %2848 = vmatprep.mubr.msk.bf16.mxu0 %vm944_vm11, %v2981_v1  ;;  %v1994_v27 = vshrl.u32 %v1917_v16, 16  ;;  %v1968_v28 = vrot.slane %v1966_v2, 4  ;;  %v1997_v52 = vshll.u32 %v1917_v16, 16  ;;  %v1935_v1 = vrot.slane %v1933_v14, 5  ;;  %604 = vst [vmem:[#allocation2 + $0x4c] sm:$0x1] %v603_v55 }
  0x67   : > { %v1982_v57 = vrot.slane %v1980_v19, 4  ;;  %v1985_v42 = vrot.slane %v1983_v39, 5  ;;  %v1931_v59 = vrot.slane %v1930_v63, 4  ;;  %v1961_v56 = vshll.u32 %v3519_v51, 16  ;;  %v1921_v7 = vld [vmem:[#allocation2 + $0x48] sm:$0xf] }
  0x68   : > { %v1996_v18 = vrot.slane %v1994_v27, 4  ;;  %v1999_v6 = vrot.slane %v1997_v52, 5  ;;  %v1945_v36 = vrot.slane %v1944_v44, 4  ;;  %v1949_v10 = vrot.slane %v1947_v22, 5  ;;  %v3535_v32 = vld [vmem:[#allocation2 + $0x3c] sm:$0x1] }
  0x69   : > { %v1958_v48 = vor.u32 %v1957_v62, %v1954_v25  ;;  %v3540_v11 = vld [vmem:[%s3706_s5 + $0x20] sm:$0xf]  ;;  %v1972_v41 = vor.u32 %v1971_v50, %v1968_v28  ;;  %v1989_v33 = vshll.u32 %v3524_v37, 16  ;;  %v2621_v61 = vcombine.low %v3506_v8, %v3516_v58  ;;  %v3553_v44 = vld [vmem:[#allocation2 + $0x44] sm:$0x1] }
  0x6a   : > { %v1986_v53 = vor.u32 %v1985_v42, %v1982_v57  ;;  %v2022_v2 = vshrl.u32 %v1921_v7, 16  ;;  %v2025_v47 = vshll.u32 %v1921_v7, 16  ;;  %v1184_v16 = vsel %vm3337_vm14, %v2618_v0, %v1183_v23  ;;  %v1411_v22 = vld [vmem:[#allocation2 + $0x28] sm:$0xf]  ;;  %v1413_v25 = vld [vmem:[#allocation2 + $0x30] sm:$0xf] }
  0x6b   : > { %2803 = vmatmul.mubr.msk.bf16.gmra.mrb[4].mxu1 %vm944_vm11, %v2606_v45  ;;  %v1919_v45 = vld [vmem:[#allocation2 + $0x40] sm:$0xf]  ;;  %v1936_v14 = vsel %vm3239_vm10, %v1931_v59, %v1935_v1  ;;  %v2000_v19 = vor.u32 %v1999_v6, %v1996_v18  ;;  %v2003_v63 = vshll.u32 %v3535_v32, 16  ;;  %v1950_v8 = vsel %vm3239_vm10, %v1945_v36, %v1949_v10  ;;  %v2985_v6 = vld [vmem:[#allocation2 + $0x8] ss:$8 sps:$4 sm:$0xff]  }
  0x6c   : > { %2808 = vmatprep.mubr.msk.bf16.mxu1 %vm944_vm11, %v2619_v49  ;;  %v1975_v49 = vshll.u32 %v3521_v4, 16  ;;  %v2008_v12 = vshrl.u32 %v1919_v45, 16  ;;  %v2011_v13 = vshll.u32 %v1919_v45, 16  ;;  %v1963_v58 = vrot.slane %v1961_v56, 5  ;;  %v2137_v36 = vld [vmem:[#allocation2 + $0x18] sm:$0xe] }
  0x6d   : > { %2849 = vmatmul.mubr.msk.bf16.vlgmr.msra.gmra.mrb[0].mxu0 %vm944_vm11, %v2982_v20  ;;  %v1973_v0 = vrot.slane %v1972_v41, 4  ;;  %v1991_v23 = vrot.slane %v1989_v33, 5  ;;  %v643_v62 = vld [vmem:[#allocation2 + $0x4c] sm:$0x1]  ;;  %v1987_v28 = vrot.slane %v1986_v53, 4  ;;  %v2024_v52 = vrot.slane %v2022_v2, 4 }
  0x6e   : > { %2857 = vmatpush3.bf16.msra.mxu0 %v3453_v21  ;;  %2852 = vmatprep.mubr.msk.bf16.mxu0 %vm944_vm11, %v2983_v29  ;;  %v1959_v21 = vrot.slane %v1958_v48, 4  ;;  %v1977_v20 = vrot.slane %v1975_v49, 5  ;;  %v2010_v39 = vrot.slane %v2008_v12, 4  ;;  %v2013_v27 = vrot.slane %v2011_v13, 5  ;;  %v2984_v29 = vld [vmem:[#allocation2 + $0x40] ss:$8 sps:$4 sm:$0xff]  }
  0x6f   : > { %2951 = vmatprep.subr.msk.bf16.mxu0 %vm957_vm0, %v3540_v11  ;;  %v644_v50 = vsel %vm3088_vm3, %v615_v46, %v643_v62  ;;  %v2027_v30 = vrot.slane %v2025_v47, 5  ;;  %v2667_v15 = vcombine.low %v1936_v14, %v1950_v8  ;;  %v2001_v55 = vrot.slane %v2000_v19, 4  ;;  %v1415_v8 = vld [vmem:[#allocation2 + $0x38] sm:$0xf] }
  0x70   : > { %645 = vst [vmem:[#allocation2 + $0x4c] sm:$0x1] %v644_v50  ;;  %v2622_v1 = vcombine.low %v3531_v35, %v1184_v16  ;;  %v2017_v57 = vshll.u32 %v3553_v44, 16  ;;  %v1476_v31 = vshrl.u32 %v1411_v22, 16  ;;  %v2014_v42 = vor.u32 %v2013_v27, %v2010_v39 }
  0x71   : > { %v1479_v46 = vshll.u32 %v1411_v22, 16  ;;  %v1490_v45 = vshrl.u32 %v1413_v25, 16  ;;  %v1493_v59 = vshll.u32 %v1413_v25, 16  ;;  %v1964_v56 = vsel %vm3239_vm10, %v1959_v21, %v1963_v58  ;;  %v1417_v25 = vld [vmem:[#allocation2 + $0x40] sm:$0xf] }
  0x72   : > { %v1978_v18 = vsel %vm3239_vm10, %v1973_v0, %v1977_v20  ;;  %v1992_v35 = vsel %vm3239_vm10, %v1987_v28, %v1991_v23  ;;  %v2028_v7 = vor.u32 %v2027_v30, %v2024_v52  ;;  %v1478_v48 = vrot.slane %v1476_v31, 4  ;;  %v2986_v0 = vld [vmem:[#allocation2 + $0x18] ss:$8 sps:$4 sm:$0xff]   ;;  %v2987_v23 = vld [vmem:[#allocation2 + $0x28] ss:$8 sps:$4 sm:$0xff]  }
  0x73   : > { %2809 = vmatmul.mubr.msk.bf16.vlgmr.msra.gmra.mrb[0].mxu1 %vm944_vm11, %v2620_v54  ;;  %v2989_v54 = vld [vmem:[%s3706_s5 + $0x10] sm:$0xf]  ;;  %v1481_v49 = vrot.slane %v1479_v46, 5  ;;  %v1492_v41 = vrot.slane %v1490_v45, 4  ;;  %v2675_v33 = vrot.slane %v2136_v5, 9  ;;  %v2162_v12 = vrot.slane %v3492_v60, 5 }
  0x74   : > { %2817 = vmatpush3.bf16.msra.mxu1 %v3468_v24  ;;  %2812 = vmatprep.mubr.msk.bf16.mxu1 %vm944_vm11, %v2621_v61  ;;  %v2005_v24 = vrot.slane %v2003_v63, 5  ;;  %v1495_v13 = vrot.slane %v1493_v59, 5  ;;  %v2015_v61 = vrot.slane %v2014_v42, 4  ;;  %v2019_v53 = vrot.slane %v2017_v57, 5  ;;  %v2139_v28 = vld [vmem:[#allocation2 + $0x28] sm:$0xe] }
  0x75   : > { %2947 = vmatprep.subr.msk.bf16.mxu1 %vm957_vm0, %v2989_v54  ;;  %2853 = vmatmul.mubr.msk.bf16.gmra.mrb[4].mxu0 %vm944_vm11, %v2984_v29  ;;  %v2676_v2 = vrot.slane %v2137_v36, 9  ;;  %v2166_v47 = vrot.slane %v3502_v43, 5  ;;  %v2668_v16 = vcombine.low %v1964_v56, %v1978_v18  ;;  %v2029_v63 = vrot.slane %v2028_v7, 4  ;;  %v2138_v29 = vld [vmem:[#allocation2 + $0x20] sm:$0xe] }
  0x76   : > { %2858 = vmatprep.mubr.msk.bf16.mxu0 %vm944_vm11, %v2667_v15  ;;  %v2006_v10 = vsel %vm3239_vm10, %v2001_v55, %v2005_v24  ;;  %v1485_v22 = vshll.u32 %v3369_v40, 16  ;;  %v1482_v21 = vor.u32 %v1481_v49, %v1478_v48  ;;  %v1496_v58 = vor.u32 %v1495_v13, %v1492_v41  ;;  %v2140_v52 = vld [vmem:[#allocation2 + $0x30] sm:$0xe]  ;;  %v2141_v46 = vld [vmem:[#allocation2 + $0x38] sm:$0xe] }
  0x77   : > { %v2669_v14 = vcombine.low %v1992_v35, %v2006_v10  ;;  %v3589_v19 = vld [vmem:[#allocation2 + $0x4c] sm:$0x1]  ;;  %v1499_v20 = vshll.u32 %v3395_v17, 16  ;;  %v2218_v43 = vsel %vm957_vm0, %v3540_v11, 0  ;;  %v2163_v62 = vsel %vm3337_vm14, %v2675_v33, %v2162_v12 }
  0x78   : > { %v2031_v60 = vshll.u32 %v3589_v19, 16  ;;  %v2020_v39 = vsel %vm3239_vm10, %v2015_v61, %v2019_v53  ;;  %v2167_v27 = vsel %vm3337_vm14, %v2676_v2, %v2166_v47  ;;  %v1504_v50 = vshrl.u32 %v1415_v8, 16  ;;  %v2143_v53 = vld [vmem:[#allocation2 + $0x48] sm:$0xe] }
  0x79   : > { %v1487_v17 = vrot.slane %v1485_v22, 5  ;;  %v1507_v11 = vshll.u32 %v1415_v8, 16  ;;  %v1518_v30 = vshrl.u32 %v1417_v25, 16  ;;  %v1521_v15 = vshll.u32 %v1417_v25, 16 }
  0x7a   : > { %v2033_v40 = vrot.slane %v2031_v60, 5  ;;  %v1483_v55 = vrot.slane %v1482_v21, 4  ;;  %v1497_v24 = vrot.slane %v1496_v58, 4  ;;  %v2683_v57 = vcombine.low %v2163_v62, %v2167_v27 }
  0x7b   : > { %2813 = vmatmul.mubr.msk.bf16.gmra.mrb[4].mxu1 %vm944_vm11, %v2622_v1  ;;  %v1501_v1 = vrot.slane %v1499_v20, 5  ;;  %v2677_v31 = vrot.slane %v2138_v29, 9  ;;  %v2170_v42 = vrot.slane %v3519_v51, 5  ;;  %v2678_v5 = vrot.slane %v2139_v28, 9 }
  0x7c   : > { %2818 = vmatprep.mubr.msk.bf16.mxu1 %vm944_vm11, %v2985_v6  ;;  %v2034_v54 = vsel %vm3239_vm10, %v2029_v63, %v2033_v40  ;;  %v2174_v45 = vrot.slane %v3521_v4, 5  ;;  %v2679_v59 = vrot.slane %v2140_v52, 9  ;;  %v2178_v56 = vrot.slane %v3524_v37, 5 }
  0x7d   : > { %2859 = vmatmul.mubr.msk.bf16.vlgmr.msra.gmra.mrb[0].mxu0 %vm944_vm11, %v2668_v16  ;;  %v1506_v18 = vrot.slane %v1504_v50, 4  ;;  %v2670_v6 = vcombine.low %v2020_v39, %v2034_v54  ;;  %v1509_v35 = vrot.slane %v1507_v11, 5  ;;  %v1520_v7 = vrot.slane %v1518_v30, 4 }
  0x7e   : > { %2867 = vmatpush3.bf16.msra.mxu0 %v2218_v43  ;;  %2862 = vmatprep.mubr.msk.bf16.mxu0 %vm944_vm11, %v2669_v14  ;;  %v1523_v36 = vrot.slane %v1521_v15, 5  ;;  %v1488_v51 = vsel %vm3239_vm10, %v1483_v55, %v1487_v17  ;;  %v1502_v10 = vsel %vm3239_vm10, %v1497_v24, %v1501_v1  ;;  %v2680_v48 = vrot.slane %v2141_v46, 9 }
  0x7f   : > { %v2182_v4 = vrot.slane %v3535_v32, 5  ;;  %v1513_v37 = vshll.u32 %v3436_v9, 16  ;;  %v1527_v49 = vshll.u32 %v3479_v38, 16  ;;  %v2637_v41 = vcombine.low %v1488_v51, %v1502_v10  ;;  %v2142_v38 = vld [vmem:[#allocation2 + $0x40] sm:$0xe] }
  0x80   : > { %v1510_v33 = vor.u32 %v1509_v35, %v1506_v18  ;;  %v1524_v12 = vor.u32 %v1523_v36, %v1520_v7  ;;  %v2171_v13 = vsel %vm3337_vm14, %v2677_v31, %v2170_v42  ;;  %v2175_v61 = vsel %vm3337_vm14, %v2678_v5, %v2174_v45 }
  0x81   : > { %v2179_v32 = vsel %vm3337_vm14, %v2679_v59, %v2178_v56  ;;  %v2183_v9 = vsel %vm3337_vm14, %v2680_v48, %v2182_v4  ;;  %v1515_v2 = vrot.slane %v1513_v37, 5  ;;  %v1529_v47 = vrot.slane %v1527_v49, 5 }
  0x82   : > { %v2684_v16 = vcombine.low %v2171_v13, %v2175_v61  ;;  %v2685_v14 = vcombine.low %v2179_v32, %v2183_v9  ;;  %v1511_v63 = vrot.slane %v1510_v33, 4  ;;  %v1525_v22 = vrot.slane %v1524_v12, 4 }
  0x83   : > { %2819 = vmatmul.mubr.msk.bf16.vlgmr.msra.gmra.mrb[0].mxu1 %vm944_vm11, %v2986_v0  ;;  %v2681_v8 = vrot.slane %v2142_v38, 9  ;;  %v2186_v60 = vrot.slane %v3553_v44, 5  ;;  %v2682_v21 = vrot.slane %v2143_v53, 9  ;;  %v2190_v58 = vrot.slane %v3589_v19, 5 }
  0x84   : > { %2877 = vmatpush3.bf16.msra.mxu1 %v3083_v3  ;;  %2822 = vmatprep.mubr.msk.bf16.mxu1 %vm944_vm11, %v2987_v23  ;;  %v2988_v3 = vld [vmem:[#allocation2 + $0x38] ss:$8 sps:$4 sm:$0xff]   ;;  %v1516_v20 = vsel %vm3239_vm10, %v1511_v63, %v1515_v2  ;;  %v1530_v25 = vsel %vm3239_vm10, %v1525_v22, %v1529_v47  ;;  %vm2403_vm0 = vcmask 58368  }
  0x85   : > { %2863 = vmatmul.mubr.msk.bf16.gmra.mrb[4].mxu0 %vm944_vm11, %v2670_v6  ;;  %v2187_v43 = vsel %vm3337_vm14, %v2681_v8, %v2186_v60  ;;  %v2191_v44 = vsel %vm3337_vm14, %v2682_v21, %v2190_v58  ;;  %v2638_v0 = vcombine.low %v1516_v20, %v1530_v25 }
  0x86   : > { %2868 = vmatprep.mubr.msk.bf16.mxu0 %vm944_vm11, %v2683_v57  ;;  %v2686_v23 = vcombine.low %v2187_v43, %v2191_v44 }
  0x8b   : > { %2823 = vmatmul.mubr.msk.bf16.gmra.mrb[4].mxu1 %vm944_vm11, %v2988_v3 }
  0x8c   : > { %2832 = vmatprep.mubr.msk.bf16.mxu1 %vm944_vm11, %v2637_v41 }
  0x8d   : > { %2869 = vmatmul.mubr.msk.bf16.vlgmr.msra.gmra.mrb[0].mxu0 %vm944_vm11, %v2684_v16 }
  0x8e   : > { %2872 = vmatprep.mubr.msk.bf16.mxu0 %vm944_vm11, %v2685_v14 }
  0x95   : > { %2873 = vmatmul.mubr.msk.bf16.gmra.mrb[4].mxu0 %vm944_vm11, %v2686_v23 }
  0x97   : > { %2833 = vmatmul.mubr.msk.bf16.vlgmr.msra.gmra.mrb[4].mxu1 %vm944_vm11, %v2638_v0 }
 0x156   : > { %v2820_v19 = vpop.f32.mrb[0].mxu1 }
 0x157   : > { %v1364_v62 = vpop.f32.mrb[1].mxu1 }
 0x158   : > { %v2821_v39 = vpop.f32.mrb[2].mxu1 }
 0x159   : > { %v1367_v26 = vpop.f32.mrb[3].mxu1 }
 0x160   : > { %v2870_v40 = vpop.f32.mrb[0].mxu0 }
 0x161   : > { %v2878_v27 = vadd.f32 %v2870_v40, %v2820_v19  ;;  %v2254_v29 = vpop.f32.mrb[1].mxu0 }
 0x162   : > { %v2879_v34 = vadd.f32 %v2254_v29, %v1364_v62  ;;  %v2871_v28 = vpop.f32.mrb[2].mxu0 }
 0x163   : > { %v2716_v50 = vpack.c.bf16 %v2878_v27, %v2878_v27  ;;  %v2880_v17 = vadd.f32 %v2871_v28, %v2821_v39  ;;  %v2257_v52 = vpop.f32.mrb[3].mxu0 }
 0x164   : > { %v2714_v11 = vpack.c.bf16 %v2879_v34, %v2879_v34  ;;  %v2881_v30 = vadd.f32 %v2257_v52, %v1367_v26 }
 0x165   : > { %2328 = vst.msk [vmem:[%s3650_s13 + $0x8] sm:$0xf] %vm618_vm6, %v2716_v50  ;;  %v3654_v15 = vpack.c.bf16 %v2880_v17, %v2878_v27  ;;  %v2717_v54 = vpack.c.bf16 %v2880_v17, %v2880_v17 }
 0x166   : > { %2326 = vst.msk [vmem:[%s3650_s13] sm:$0xf] %vm618_vm6, %v2714_v11  ;;  %v2293_v55 = vpack.c.bf16 %v2881_v30, %v2879_v34  ;;  %v2715_v24 = vpack.c.bf16 %v2881_v30, %v2881_v30 }
 0x167   : > { %2329 = vst.msk [vmem:[%s3650_s13 + $0xc] sm:$0xf] %vm618_vm6, %v2717_v54  ;;  %v2336_v57 = vunpack.c.l.bf16 %v3654_v15  ;;  %v2337_v18 = vunpack.c.h.bf16 %v3654_v15 }
 0x168   : > { %2327 = vst.msk [vmem:[%s3650_s13 + $0x4] sm:$0xf] %vm618_vm6, %v2715_v24  ;;  %v2334_v31 = vunpack.c.l.bf16 %v2293_v55  ;;  %v2335_v42 = vunpack.c.h.bf16 %v2293_v55  ;;  %v2874_v5 = vpop.f32.mrb[4].mxu0 }
 0x169   : > { %v2270_v59 = vpop.f32.mrb[5].mxu0  ;;  %v2345_v49 = vsel %vm944_vm11, %v2336_v57, 0.0  ;;  %v2347_v61 = vsel %vm944_vm11, %v2337_v18, 0.0 }
 0x16a   : > { %v2834_v1 = vpop.f32.mrb[4].mxu1  ;;  %v2342_v6 = vsel %vm944_vm11, %v2334_v31, 0.0  ;;  %v2343_v35 = vsel %vm944_vm11, %v2335_v42, 0.0  ;;  %v2875_v36 = vpop.f32.mrb[6].mxu0 }
 0x16b   : > { %v1609_v46 = vpop.f32.mrb[5].mxu1  ;;  %v2882_v45 = vadd.f32 %v2874_v5, %v2834_v1  ;;  %v2344_v10 = vadd.f32 %v2343_v35, %v2342_v6  ;;  %v2273_v37 = vpop.f32.mrb[7].mxu0 }
 0x16c   : > { %v2835_v56 = vpop.f32.mrb[6].mxu1  ;;  %v2883_v7 = vadd.f32 %v2270_v59, %v1609_v46 }
 0x16d   : > { %v1612_v51 = vpop.f32.mrb[7].mxu1  ;;  %v2720_v48 = vpack.c.bf16 %v2882_v45, %v2882_v45  ;;  %v2884_v4 = vadd.f32 %v2875_v36, %v2835_v56  ;;  %v2346_v33 = vadd.f32 %v2345_v49, %v2344_v10 }
 0x16e   : > { %v2718_v3 = vpack.c.bf16 %v2883_v7, %v2883_v7  ;;  %v2885_v41 = vadd.f32 %v2273_v37, %v1612_v51 }
 0x16f   : > { %2332 = vst.msk [vmem:[%s3650_s13 + $0x18] sm:$0xf] %vm618_vm6, %v2720_v48  ;;  %v2296_v12 = vpack.c.bf16 %v2884_v4, %v2882_v45  ;;  %v2721_v13 = vpack.c.bf16 %v2884_v4, %v2884_v4  ;;  %v2348_v38 = vadd.f32 %v2347_v61, %v2346_v33 }
 0x170   : > { %2330 = vst.msk [vmem:[%s3650_s13 + $0x10] sm:$0xf] %vm618_vm6, %v2718_v3  ;;  %v2295_v32 = vpack.c.bf16 %v2885_v41, %v2883_v7  ;;  %v2719_v9 = vpack.c.bf16 %v2885_v41, %v2885_v41 }
 0x171   : > { %2333 = vst.msk [vmem:[%s3650_s13 + $0x1c] sm:$0xf] %vm618_vm6, %v2721_v13  ;;  %v2340_v47 = vunpack.c.l.bf16 %v2296_v12  ;;  %v2341_v63 = vunpack.c.h.bf16 %v2296_v12 }
 0x172   : > { %2331 = vst.msk [vmem:[%s3650_s13 + $0x14] sm:$0xf] %vm618_vm6, %v2719_v9  ;;  %v2338_v53 = vunpack.c.l.bf16 %v2295_v32  ;;  %v2339_v2 = vunpack.c.h.bf16 %v2295_v32 }
 0x173   : > { %v2353_v60 = vsel %vm944_vm11, %v2340_v47, 0.0  ;;  %v2355_v58 = vsel %vm944_vm11, %v2341_v63, 0.0 }
 0x174   : > { %v2349_v16 = vsel %vm944_vm11, %v2338_v53, 0.0  ;;  %v2351_v22 = vsel %vm944_vm11, %v2339_v2, 0.0 }
 0x175   : > { %v2350_v14 = vadd.f32 %v2349_v16, %v2348_v38 }
 0x177   : > { %v2352_v8 = vadd.f32 %v2351_v22, %v2350_v14 }
 0x179   : > { %v2354_v21 = vadd.f32 %v2353_v60, %v2352_v8 }
 0x17b   : > { %v2356_v20 = vadd.f32 %v2355_v58, %v2354_v21 }
 0x17d   : > { %v2357_v25 = vrot.slane %v2356_v20, 4 }
 0x17f   : > { %v2358_v43 = vadd.f32 %v2357_v25, %v2356_v20 }
 0x181   : > { %v2359_v44 = vrot.slane %v2358_v43, 2 }
 0x183   : > { %v2360_v0 = vadd.f32 %v2359_v44, %v2358_v43 }
 0x185   : > { %v2361_v23 = vrot.slane %v2360_v0, 1 }
 0x187   : > { %v2362_v19 = vadd.f32 %v2361_v23, %v2360_v0 }
 0x189   : > { %v2363_v62 = vmul.f32 0.015625, %v2362_v19 }
 0x18b   : > { %v2364_v39 = vsub.f32 %v2334_v31, %v2363_v62  ;;  %v2365_v26 = vsub.f32 %v2335_v42, %v2363_v62  ;;  %v2366_v40 = vsub.f32 %v2336_v57, %v2363_v62  ;;  %v2367_v27 = vsub.f32 %v2337_v18, %v2363_v62 }
 0x18c   : > { %v2368_v29 = vsub.f32 %v2338_v53, %v2363_v62  ;;  %v2369_v34 = vsub.f32 %v2339_v2, %v2363_v62  ;;  %v2370_v28 = vsub.f32 %v2340_v47, %v2363_v62  ;;  %v2371_v50 = vsub.f32 %v2341_v63, %v2363_v62 }
 0x18d   : > { %v2372_v17 = vmul.f32 %v2364_v39, %v2364_v39  ;;  %v2373_v52 = vmul.f32 %v2365_v26, %v2365_v26  ;;  %v2374_v11 = vmul.f32 %v2366_v40, %v2366_v40  ;;  %v2375_v30 = vmul.f32 %v2367_v27, %v2367_v27 }
 0x18e   : > { %v2376_v24 = vmul.f32 %v2368_v29, %v2368_v29  ;;  %v2377_v42 = vmul.f32 %v2369_v34, %v2369_v34  ;;  %v2378_v46 = vmul.f32 %v2370_v28, %v2370_v28  ;;  %v2379_v56 = vmul.f32 %v2371_v50, %v2371_v50 }
 0x18f   : > { %v2380_v15 = vsel %vm944_vm11, %v2372_v17, 0.0  ;;  %v2381_v54 = vsel %vm944_vm11, %v2373_v52, 0.0  ;;  %v2383_v1 = vsel %vm944_vm11, %v2374_v11, 0.0  ;;  %v2385_v57 = vsel %vm944_vm11, %v2375_v30, 0.0 }
 0x190   : > { %v2382_v55 = vadd.f32 %v2381_v54, %v2380_v15  ;;  %v2387_v45 = vsel %vm944_vm11, %v2376_v24, 0.0  ;;  %v2389_v18 = vsel %vm944_vm11, %v2377_v42, 0.0  ;;  %v2391_v35 = vsel %vm944_vm11, %v2378_v46, 0.0 }
 0x191   : > { %v2393_v36 = vsel %vm944_vm11, %v2379_v56, 0.0 }
 0x192   : > { %v2384_v31 = vadd.f32 %v2383_v1, %v2382_v55 }
 0x194   : > { %v2386_v5 = vadd.f32 %v2385_v57, %v2384_v31 }
 0x196   : > { %v2388_v59 = vadd.f32 %v2387_v45, %v2386_v5 }
 0x198   : > { %v2390_v6 = vadd.f32 %v2389_v18, %v2388_v59 }
 0x19a   : > { %v2392_v7 = vadd.f32 %v2391_v35, %v2390_v6 }
 0x19c   : > { %v2394_v51 = vadd.f32 %v2393_v36, %v2392_v7 }
 0x19e   : > { %v2395_v10 = vrot.slane %v2394_v51, 4 }
 0x1a0   : > { %v2396_v48 = vadd.f32 %v2395_v10, %v2394_v51 }
 0x1a2   : > { %v2397_v4 = vrot.slane %v2396_v48, 2 }
 0x1a4   : > { %v2398_v37 = vadd.f32 %v2397_v4, %v2396_v48 }
 0x1a6   : > { %v2399_v49 = vrot.slane %v2398_v37, 1 }
 0x1a8   : > { %v2400_v3 = vadd.f32 %v2399_v49, %v2398_v37 }
 0x1aa   : > { %v2402_v41 = vsel %vm2401_vm15, %v2362_v19, %v2400_v3 }
 0x1ab   : > { %2404 = vst.msk [vmem:[%s454_s16] sm:$0x3] %vm2403_vm0, %v2402_v41 }
 0x1ac PF: > { %s18_s2 = sadd.s32 1, %s3012_s2   ;;  %s3719_s24 = smov %s3008_s1 }
 0x1ad   : > { %p15_p5 = scmp.ge.s32.totalorder %s18_s2, 4   ;;  %s3720_s1 = smov %s3722_s25 }
 0x1af   :  { %17 = sbr.rel (!%p15_p5) target bundleno = 2 (0x2), region = 95 }

// kernel: res_down.3
= control target key start
LH: loop header
LB: loop body
LE: loop exit
PB: predicated region body
PF: predicated region fallthrough
CT: control target
= control target key end

     0   :  { %s3432_s26 = smov 0   ;;  %s3434_s2 = smov 0   ;;  %s4042_s0 = inlined_call_operand.vmem [shape: f32[2,2,2,8,8,4], index: 0, kind: input, shape index: {}, may-alias: {0,1,2}]   ;;  %s4043_s1 = inlined_call_operand.vmem [shape: f32[2,2,2,8,8,4], index: 1, kind: input, shape index: {}, may-alias: {0,1,2}]   ;;  %s4044_s2 = inlined_call_operand.vmem [shape: f32[2,2,2,8,8,4], index: 2, kind: input, shape index: {}, may-alias: {0,1,2}]   ;;  %s4045_s3 = inlined_call_operand.vmem [shape: bf16[36,8], index: 3, kind: input, shape index: {}]   ;;  %s4046_s4 = inlined_call_operand.vmem [shape: bf16[4,8], index: 4, kind: input, shape index: {}]   ;;  %s4047_s5 = inlined_call_operand.vmem [shape: f32[1,8], index: 5, kind: input, shape index: {}]   ;;  %s4048_s6 = inlined_call_operand.vmem [shape: bf16[2,8,8,8], index: 6, kind: output, shape index: {0}]   ;;  %s4049_s7 = inlined_call_operand.vmem [shape: bf16[2,8,8,8], index: 7, kind: output, shape index: {1}]   ;;  %s4050_s8 = inlined_call_operand.vmem [shape: f32[2,1,2,8], index: 8, kind: output, shape index: {2}]  }
   0x1   :  { %s3436_s27 = smov 0  }
   0x2 LB: > { %s31_s28 = sadd.s32 1, %s3380_s2  ;;  %p2870_p1 = scmp.ge.s32.totalorder %s3384_s27, 2  ;;  %s3384_s27 = sphi %s3436_s27, %s19_s27   ;;  %s3380_s2 = sphi %s3434_s2, %s4062_s2   ;;  %s3376_s26 = sphi %s3432_s26, %s4061_s26  }
   0x3   : > { %p33_p0 = scmp.ge.s32.totalorder %s31_s28, 2  ;;  %p2877_p2 = scmp.ge.s32.totalorder %s3384_s27, 1 }
   0x4   : > { %p434_p3 = scmp.lt.s32.totalorder %s3384_s27, 3 }
   0x5   : > { %s4064_s28 = smov (%p33_p0, %s31_s28), 0 }
   0x6   : > { %p435_p4 = pnand %p2877_p2, %p434_p3 }
   0x7   : > { %v647_v0 = vld [vmem:[%s4046_s4] sm:$0x3] (!%p435_p4)  ;;  %vm688_vm0 = vcmask (!%p435_p4), 1041408   ;;  %p515_p5 = scmp.lt.s32.totalorder (!%p435_p4), %s3376_s26, 1  ;;  %vm786_vm1 = vcmask (!%p435_p4), 24576   ;;  %v3386_v13 = vmov (!%p435_p4), 0.0|0.0  }
   0x8   : > { %438 = sbr.rel (%p435_p4) target bundleno = 444 (0x1bc), region = 112  ;;  %3287 = vmatprep.subr.msk.bf16.mxu0 (!%p435_p4), %vm688_vm0, %v647_v0  ;;  %v690_v1 = vsel (!%p435_p4), %vm688_vm0, %v647_v0, 0  ;;  %vm787_vm2 = vsmask.f32 (!%p435_p4), 256  ;;  %v792_v2 = vld [vmem:[#allocation2 + $0x8] sm:$0x1] (!%p435_p4)  ;;  %v3476_v14 = vcombine.low (!%p435_p4), %v3386_v13, %v3386_v13 }
   0x9   : > { %3124 = vmatpush3.bf16.msra.mxu0 (!%p435_p4), %v690_v1  ;;  %vm3458_vm3 = vmand (!%p435_p4), %vm786_vm1, %vm787_vm2  ;;  %v795_v4 = vld [vmem:[#allocation2 + $0x10] sm:$0x1] (!%p435_p4)  ;;  %vm819_vm4 = vsmask.f32 (!%p435_p4), 7938  ;;  %v824_v8 = vld [vmem:[#allocation2 + $0xc] sm:$0x1] (!%p435_p4) }
   0xa   : > { %v793_v5 = vsel (!%p435_p4), %vm3458_vm3, 0, %v792_v2  ;;  %v796_v6 = vsel (!%p435_p4), %vm3458_vm3, 0, %v795_v4  ;;  %vm3467_vm5 = vmand (!%p435_p4), %vm786_vm1, %vm819_vm4  ;;  %v827_v9 = vld [vmem:[#allocation2 + $0x14] sm:$0x1] (!%p435_p4)  ;;  %v798_v12 = vld [vmem:[#allocation2 + $0x18] sm:$0x1] (!%p435_p4) }
   0xb   : > { %794 = vst [vmem:[#allocation2 + $0x8] sm:$0x1] (!%p435_p4), %v793_v5  ;;  %797 = vst [vmem:[#allocation2 + $0x10] sm:$0x1] (!%p435_p4), %v796_v6  ;;  %v825_v10 = vsel (!%p435_p4), %vm3467_vm5, 0, %v824_v8  ;;  %v828_v11 = vsel (!%p435_p4), %vm3467_vm5, 0, %v827_v9 }
   0xc   : > { %826 = vst [vmem:[#allocation2 + $0xc] sm:$0x1] (!%p435_p4), %v825_v10  ;;  %829 = vst [vmem:[#allocation2 + $0x14] sm:$0x1] (!%p435_p4), %v828_v11  ;;  %v799_v15 = vsel (!%p435_p4), %vm3458_vm3, 0, %v798_v12  ;;  %v855_v31 = vshrl.u32 (!%p435_p4), %v3476_v14, 16 }
   0xd   : > { %v801_v16 = vld [vmem:[#allocation2 + $0x20] sm:$0x1] (!%p435_p4)  ;;  %v830_v17 = vld [vmem:[#allocation2 + $0x1c] sm:$0x1] (!%p435_p4)  ;;  %800 = vst [vmem:[#allocation2 + $0x18] sm:$0x1] (!%p435_p4), %v799_v15 }
   0xe   : > { %v802_v21 = vsel (!%p435_p4), %vm3458_vm3, 0, %v801_v16  ;;  %v831_v22 = vsel (!%p435_p4), %vm3467_vm5, 0, %v830_v17  ;;  %vm675_vm6 = vcmask (!%p435_p4), 31744   ;;  %vm864_vm7 = vcmask (!%p435_p4), 27648   ;;  %v833_v47 = vld [vmem:[#allocation2 + $0x24] sm:$0x1] (!%p435_p4) }
   0xf   : > { %s4066_s26 = smov (!%p515_p5, %s3376_s26), 1  ;;  %803 = vst [vmem:[#allocation2 + $0x20] sm:$0x1] %v802_v21  ;;  %832 = vst [vmem:[#allocation2 + $0x1c] sm:$0x1] %v831_v22  ;;  %v3506_v48 = vrot.slane %v855_v31, 7 }
  0x10   : > { %s3049_s9 = sshll.u32 %s4066_s26, 8  ;;  %v834_v55 = vsel %vm3467_vm5, 0, %v833_v47  ;;  %v858_v58 = vshll.u32 %v3476_v14, 16  ;;  %vm3526_vm8 = vmand %vm864_vm7, %vm819_vm4  ;;  %vm1046_vm9 = vsmask.f32 3328  ;;  %vm1382_vm12 = vcmask 1042432  }
  0x11   : > { %s3481_s12 = scalar_lea.vmem %s4042_s0, %s3049_s9  ;;  %v861_v59 = vrot.slane %v3506_v48, 4  ;;  %835 = vst [vmem:[#allocation2 + $0x24] sm:$0x1] %v834_v55  ;;  %vm1047_vm10 = vsmask.f32 7440  ;;  %vm1383_vm13 = vcmask 1046532  }
  0x12   : > { %v560_v18 = vld [vmem:[%s3481_s12] sm:$0xff]  ;;  %v561_v19 = vld [vmem:[%s3481_s12 + $0x8] sm:$0xff]  ;;  %v562_v30 = vld [vmem:[%s3481_s12 + $0x10] sm:$0xff]  ;;  %s3050_s13 = sshll.u32 %s4066_s26, 5  ;;  %vm765_vm15 = vcmask 60416   ;;  %s2886_s20 = sshll.u32 %s4066_s26, 1 }
  0x13   : > { %v2887_v20 = vld [vmem:[%s3481_s12 + $0x40] sm:$0xff]  ;;  %v2888_v23 = vld [vmem:[%s3481_s12 + $0x48] sm:$0xff]  ;;  %v563_v34 = vld [vmem:[%s3481_s12 + $0x18] sm:$0xff]  ;;  %s550_s16 = scalar_lea.vmem %s4049_s7, %s3050_s13  ;;  %s3995_s19 = scalar_lea.vmem %s4048_s6, %s3050_s13  ;;  %vm2645_vm1 = vcmask 1040384   ;;  %vm2647_vm2 = vcmask 58368  }
  0x14   : > { %v577_v24 = vmax.f32 %v560_v18, %v2887_v20  ;;  %v2895_v25 = vld [vmem:[%s3481_s12 + $0x80] sm:$0xff]  ;;  %v2896_v26 = vld [vmem:[%s3481_s12 + $0x88] sm:$0xff]  ;;  %v578_v27 = vmax.f32 %v561_v19, %v2888_v23  ;;  %v2889_v35 = vld [vmem:[%s3481_s12 + $0x50] sm:$0xff]  ;;  %s558_s23 = scalar_lea.vmem %s4050_s8, %s2886_s20 }
  0x15   : > { %v2903_v28 = vld [vmem:[%s3481_s12 + $0xc0] sm:$0xff]  ;;  %v2904_v29 = vld [vmem:[%s3481_s12 + $0xc8] sm:$0xff]  ;;  %v2890_v36 = vld [vmem:[%s3481_s12 + $0x58] sm:$0xff]  ;;  %v579_v37 = vmax.f32 %v562_v30, %v2889_v35 }
  0x16   : > { %v603_v32 = vmax.f32 %v2895_v25, %v2903_v28  ;;  %v604_v33 = vmax.f32 %v2896_v26, %v2904_v29  ;;  %v580_v38 = vmax.f32 %v563_v34, %v2890_v36  ;;  %v2897_v39 = vld [vmem:[%s3481_s12 + $0x90] sm:$0xff]  ;;  %v2898_v40 = vld [vmem:[%s3481_s12 + $0x98] sm:$0xff]  ;;  %v564_v53 = vld [vmem:[%s3481_s12 + $0x20] sm:$0xff] }
  0x17   : > { %v2905_v41 = vld [vmem:[%s3481_s12 + $0xd0] sm:$0xff]  ;;  %v2906_v44 = vld [vmem:[%s3481_s12 + $0xd8] sm:$0xff]  ;;  %v3512_v56 = vld [vmem:[%s3481_s12 + $0x28] sm:$0xff] }
  0x18   : > { %v611_v42 = vmax.f32 %v577_v24, %v603_v32  ;;  %v612_v43 = vmax.f32 %v578_v27, %v604_v33  ;;  %v605_v45 = vmax.f32 %v2897_v39, %v2905_v41  ;;  %v606_v46 = vmax.f32 %v2898_v40, %v2906_v44  ;;  %v2891_v57 = vld [vmem:[%s3481_s12 + $0x60] sm:$0xff]  ;;  %v2892_v0 = vld [vmem:[%s3481_s12 + $0x68] sm:$0xff]  ;;  %v987_v4 = vld [vmem:[#allocation2 + $0x10] sm:$0xf] }
  0x19   : > { %v2899_v1 = vld [vmem:[%s3481_s12 + $0xa0] sm:$0xff]  ;;  %v981_v2 = vld [vmem:[#allocation2 + $0x8] sm:$0xf]  ;;  %v581_v9 = vmax.f32 %v564_v53, %v2891_v57  ;;  %v984_v13 = vld [vmem:[#allocation2 + $0xc] sm:$0x1]  ;;  %v582_v15 = vmax.f32 %v3512_v56, %v2892_v0 }
  0x1a   : > { %v3052_v49 = vpack.c.bf16 %v612_v43, %v611_v42  ;;  %v3056_v50 = vpack.c.bf16 %v611_v42, %v611_v42  ;;  %v3057_v51 = vpack.c.bf16 %v612_v43, %v612_v43  ;;  %v613_v52 = vmax.f32 %v579_v37, %v605_v45  ;;  %v2907_v10 = vld [vmem:[%s3481_s12 + $0xe0] sm:$0xff]  ;;  %v2900_v16 = vld [vmem:[%s3481_s12 + $0xa8] sm:$0xff]  ;;  %v990_v20 = vld [vmem:[#allocation2 + $0x14] sm:$0x1] }
  0x1b   : > { %v614_v54 = vmax.f32 %v580_v38, %v606_v46  ;;  %v2908_v17 = vld [vmem:[%s3481_s12 + $0xe8] sm:$0xff]  ;;  %v607_v18 = vmax.f32 %v2899_v1, %v2907_v10  ;;  %v993_v29 = vld [vmem:[#allocation2 + $0x18] sm:$0xf]  ;;  %v996_v30 = vld [vmem:[#allocation2 + $0x1c] sm:$0x1] }
  0x1c   : > { %3125 = vmatprep.mubr.msk.bf16.mxu0 %vm675_vm6, %v3052_v49  ;;  %v901_v60 = vshrl.u32 %v3056_v50, 16  ;;  %v904_v61 = vshll.u32 %v3056_v50, 16  ;;  %v909_v62 = vshrl.u32 %v3057_v51, 16  ;;  %v912_v63 = vshll.u32 %v3057_v51, 16  ;;  %v999_v31 = vld [vmem:[#allocation2 + $0x20] sm:$0xf]  ;;  %vm3654_vm11 = vmor %vm1046_vm9, %vm1047_vm10 }
  0x1d   : > { %v3053_v5 = vpack.c.bf16 %v614_v54, %v613_v52  ;;  %v3058_v6 = vpack.c.bf16 %v613_v52, %v613_v52  ;;  %v3059_v8 = vpack.c.bf16 %v614_v54, %v614_v54  ;;  %v804_v32 = vld [vmem:[#allocation2 + $0x28] sm:$0x1]  ;;  %v807_v33 = vld [vmem:[#allocation2 + $0x30] sm:$0x1]  ;;  %v608_v36 = vmax.f32 %v2900_v16, %v2908_v17  ;;  %v836_v38 = vld [vmem:[#allocation2 + $0x2c] sm:$0x1] }
  0x1e   : > { %v903_v11 = vrot.slane %v901_v60, 7  ;;  %v911_v12 = vrot.slane %v909_v62, 7  ;;  %v615_v37 = vmax.f32 %v581_v9, %v607_v18  ;;  %v839_v39 = vld [vmem:[#allocation2 + $0x34] sm:$0x1]  ;;  %v567_v45 = vld [vmem:[%s3481_s12 + $0x38] sm:$0xff]  ;;  %v805_v60 = vsel %vm3458_vm3, 0, %v804_v32  ;;  %vm3774_vm14 = vmor %vm1382_vm12, %vm1383_vm13 }
  0x1f   : > { %3126 = vmatmul.mubr.msk.bf16.vlgmr.msra.gmra.mrb[0].mxu0 %vm675_vm6, %v3053_v5  ;;  %v917_v21 = vshrl.u32 %v3058_v6, 16  ;;  %v920_v22 = vshll.u32 %v3058_v6, 16  ;;  %v925_v23 = vshrl.u32 %v3059_v8, 16  ;;  %v928_v24 = vshll.u32 %v3059_v8, 16  ;;  %v566_v44 = vld [vmem:[%s3481_s12 + $0x30] sm:$0xff]  ;;  %v2894_v47 = vld [vmem:[%s3481_s12 + $0x78] sm:$0xff] }
  0x20   : > { %v906_v25 = vor.u32 %v904_v61, %v903_v11  ;;  %v907_v26 = vrot.slane %v903_v11, 4  ;;  %v914_v27 = vor.u32 %v912_v63, %v911_v12  ;;  %v915_v28 = vrot.slane %v911_v12, 4  ;;  %v2893_v46 = vld [vmem:[%s3481_s12 + $0x70] sm:$0xff]  ;;  %v1002_v54 = vld [vmem:[#allocation2 + $0x24] sm:$0x1]  ;;  %v2902_v55 = vld [vmem:[%s3481_s12 + $0xb8] sm:$0xff] }
  0x21   : > { %v919_v34 = vrot.slane %v917_v21, 7  ;;  %v927_v35 = vrot.slane %v925_v23, 7  ;;  %v2901_v49 = vld [vmem:[%s3481_s12 + $0xb0] sm:$0xff]  ;;  %v616_v57 = vmax.f32 %v582_v15, %v608_v36  ;;  %v808_v61 = vsel %vm3458_vm3, 0, %v807_v33  ;;  %v2910_v63 = vld [vmem:[%s3481_s12 + $0xf8] sm:$0xff] }
  0x22   : > { %v982_v40 = vsel %vm3526_vm8, %v906_v25, %v981_v2  ;;  %v985_v41 = vsel %vm3458_vm3, %v907_v26, %v984_v13  ;;  %v988_v42 = vsel %vm3526_vm8, %v914_v27, %v987_v4  ;;  %v991_v43 = vsel %vm3458_vm3, %v915_v28, %v990_v20  ;;  %v2909_v56 = vld [vmem:[%s3481_s12 + $0xf0] sm:$0xff]  ;;  %v810_v0 = vld [vmem:[#allocation2 + $0x38] sm:$0x1]  ;;  %806 = vst [vmem:[#allocation2 + $0x28] sm:$0x1] %v805_v60 }
  0x23   : > { %983 = vst [vmem:[#allocation2 + $0x8] sm:$0xf] %v982_v40  ;;  %986 = vst [vmem:[#allocation2 + $0xc] sm:$0x1] %v985_v41  ;;  %v922_v50 = vor.u32 %v920_v22, %v919_v34  ;;  %v923_v51 = vrot.slane %v919_v34, 4  ;;  %v930_v52 = vor.u32 %v928_v24, %v927_v35  ;;  %v931_v53 = vrot.slane %v927_v35, 4 }
  0x24   : > { %989 = vst [vmem:[#allocation2 + $0x10] sm:$0xf] %v988_v42  ;;  %992 = vst [vmem:[#allocation2 + $0x14] sm:$0x1] %v991_v43  ;;  %v837_v62 = vsel %vm3467_vm5, 0, %v836_v38  ;;  %v3054_v10 = vpack.c.bf16 %v616_v57, %v615_v37  ;;  %v840_v11 = vsel %vm3467_vm5, 0, %v839_v39  ;;  %v3060_v12 = vpack.c.bf16 %v615_v37, %v615_v37 }
  0x25   : > { %v994_v1 = vsel %vm3526_vm8, %v922_v50, %v993_v29  ;;  %v997_v2 = vsel %vm3458_vm3, %v923_v51, %v996_v30  ;;  %v1000_v4 = vsel %vm3526_vm8, %v930_v52, %v999_v31  ;;  %v1003_v5 = vsel %vm3458_vm3, %v931_v53, %v1002_v54  ;;  %809 = vst [vmem:[#allocation2 + $0x30] sm:$0x1] %v808_v61  ;;  %v813_v6 = vld [vmem:[#allocation2 + $0x40] sm:$0x1]  ;;  %v842_v8 = vld [vmem:[#allocation2 + $0x3c] sm:$0x1] }
  0x26   : > { %838 = vst [vmem:[#allocation2 + $0x2c] sm:$0x1] %v837_v62  ;;  %v1767_v9 = vld [vmem:[%s4045_s3 + $0x8] sm:$0x3]  ;;  %995 = vst [vmem:[#allocation2 + $0x18] sm:$0xf] %v994_v1  ;;  %v3061_v13 = vpack.c.bf16 %v616_v57, %v616_v57  ;;  %v583_v16 = vmax.f32 %v566_v44, %v2893_v46  ;;  %v584_v17 = vmax.f32 %v567_v45, %v2894_v47  ;;  %3129 = vmatprep.mubr.msk.bf16.mxu0 %vm675_vm6, %v3054_v10 }
  0x27   : > { %998 = vst [vmem:[#allocation2 + $0x1c] sm:$0x1] %v997_v2  ;;  %1001 = vst [vmem:[#allocation2 + $0x20] sm:$0xf] %v1000_v4  ;;  %v845_v15 = vld [vmem:[#allocation2 + $0x44] sm:$0x1]  ;;  %3292 = vmatprep.subr.msk.bf16.mxu1 %vm688_vm0, %v1767_v9  ;;  %v609_v18 = vmax.f32 %v2901_v49, %v2909_v56  ;;  %v610_v20 = vmax.f32 %v2902_v55, %v2910_v63 }
  0x28   : > { %1004 = vst [vmem:[#allocation2 + $0x24] sm:$0x1] %v1003_v5  ;;  %841 = vst [vmem:[#allocation2 + $0x34] sm:$0x1] %v840_v11  ;;  %v933_v22 = vshrl.u32 %v3060_v12, 16  ;;  %v936_v23 = vshll.u32 %v3060_v12, 16 }
  0x29   : > { %v3338_v21 = vld [vmem:[%s4045_s3] ss:$0 sps:$4 sm:$0xcc]   ;;  %v941_v24 = vshrl.u32 %v3061_v13, 16  ;;  %v944_v25 = vshll.u32 %v3061_v13, 16  ;;  %v617_v26 = vmax.f32 %v583_v16, %v609_v18  ;;  %v618_v27 = vmax.f32 %v584_v17, %v610_v20 }
  0x2a   : > { %v811_v28 = vsel %vm3458_vm3, 0, %v810_v0  ;;  %v814_v29 = vsel %vm3458_vm3, 0, %v813_v6  ;;  %v935_v30 = vrot.slane %v933_v22, 7  ;;  %v843_v32 = vsel %vm3467_vm5, 0, %v842_v8  ;;  %v789_v38 = vld [vmem:[#allocation2] sm:$0x1] }
  0x2b   : > { %v943_v31 = vrot.slane %v941_v24, 7  ;;  %812 = vst [vmem:[#allocation2 + $0x38] sm:$0x1] %v811_v28  ;;  %815 = vst [vmem:[#allocation2 + $0x40] sm:$0x1] %v814_v29  ;;  %v846_v33 = vsel %vm3467_vm5, 0, %v845_v15  ;;  %v3055_v34 = vpack.c.bf16 %v618_v27, %v617_v26  ;;  %v3062_v35 = vpack.c.bf16 %v617_v26, %v617_v26 }
  0x2c   : > { %844 = vst [vmem:[#allocation2 + $0x3c] sm:$0x1] %v843_v32  ;;  %847 = vst [vmem:[#allocation2 + $0x44] sm:$0x1] %v846_v33  ;;  %v3063_v36 = vpack.c.bf16 %v618_v27, %v618_v27  ;;  %v1177_v37 = vrot.slane %v3338_v21, 2  ;;  %v938_v41 = vor.u32 %v936_v23, %v935_v30  ;;  %v939_v42 = vrot.slane %v935_v30, 4 }
  0x2d   : > { %v821_v39 = vld [vmem:[#allocation2 + $0x4] sm:$0x1]  ;;  %v3579_v40 = vld [vmem:[#allocation2 + $0x8] sm:$0xf]  ;;  %v946_v43 = vor.u32 %v944_v25, %v943_v31  ;;  %v947_v44 = vrot.slane %v943_v31, 4  ;;  %3130 = vmatmul.mubr.msk.bf16.gmra.mrb[4].mxu0 %vm675_vm6, %v3055_v34  ;;  %v949_v49 = vshrl.u32 %v3062_v35, 16  ;;  %v3615_v22 = vor.u32 %v858_v58, %v3506_v48 }
  0x2e   : > { %v1005_v45 = vld [vmem:[#allocation2 + $0x28] sm:$0xf]  ;;  %v1008_v46 = vld [vmem:[#allocation2 + $0x2c] sm:$0x1]  ;;  %v1011_v47 = vld [vmem:[#allocation2 + $0x30] sm:$0xf]  ;;  %3288 = vmatprep.subr.msk.bf16.mxu0 %vm688_vm0, %v1177_v37 }
  0x2f   : > { %v952_v50 = vshll.u32 %v3062_v35, 16  ;;  %v957_v51 = vshrl.u32 %v3063_v36, 16  ;;  %v960_v52 = vshll.u32 %v3063_v36, 16  ;;  %v1006_v53 = vsel %vm3526_vm8, %v938_v41, %v1005_v45  ;;  %v1014_v56 = vld [vmem:[#allocation2 + $0x34] sm:$0x1] }
  0x30   : > { %v1009_v54 = vsel %vm3458_vm3, %v939_v42, %v1008_v46  ;;  %v1012_v55 = vsel %vm3526_vm8, %v946_v43, %v1011_v47  ;;  %v1793_v57 = vsel %vm688_vm0, %v1767_v9, 0  ;;  %v3593_v60 = vld [vmem:[%s4045_s3] sm:$0x3]  ;;  %1007 = vst [vmem:[#allocation2 + $0x28] sm:$0xf] %v1006_v53  ;;  %v1015_v61 = vsel %vm3458_vm3, %v947_v44, %v1014_v56 }
  0x31   : > { %1010 = vst [vmem:[#allocation2 + $0x2c] sm:$0x1] %v1009_v54  ;;  %1013 = vst [vmem:[#allocation2 + $0x30] sm:$0xf] %v1012_v55  ;;  %v951_v62 = vrot.slane %v949_v49, 7  ;;  %v959_v63 = vrot.slane %v957_v51, 7  ;;  %3174 = vmatpush3.bf16.msra.mxu1 %v1793_v57 }
  0x32   : > { %v1191_v0 = vsel %vm688_vm0, %v1177_v37, 0  ;;  %v3598_v1 = vld [vmem:[#allocation2 + $0xc] sm:$0x1]  ;;  %v1639_v2 = vld [vmem:[#allocation2 + $0x8] sm:$0xf]  ;;  %v790_v4 = vsel %vm3458_vm3, 0, %v789_v38 }
  0x33   : > { %1016 = vst [vmem:[#allocation2 + $0x34] sm:$0x1] %v1015_v61  ;;  %3134 = vmatpush3.bf16.msra.mxu0 %v1191_v0  ;;  %v822_v5 = vsel %vm3467_vm5, 0, %v821_v39  ;;  %v1064_v6 = vshrl.u32 %v3579_v40, 16  ;;  %v1067_v8 = vshll.u32 %v3579_v40, 16  ;;  %v954_v12 = vor.u32 %v952_v50, %v951_v62 }
  0x34   : > { %v3606_v9 = vld [vmem:[#allocation2 + $0xc] sm:$0x1]  ;;  %v1641_v10 = vld [vmem:[#allocation2 + $0x10] sm:$0xf]  ;;  %v3608_v11 = vld [vmem:[#allocation2 + $0x14] sm:$0x1]  ;;  %v962_v15 = vor.u32 %v960_v52, %v959_v63  ;;  %3289 = vmatprep.subr.msk.bf16.mxu0 %vm688_vm0, %v3593_v60 }
  0x35   : > { %v955_v13 = vrot.slane %v951_v62, 4  ;;  %v963_v16 = vrot.slane %v959_v63, 4  ;;  %v1017_v17 = vld [vmem:[#allocation2 + $0x38] sm:$0xf]  ;;  %v1023_v18 = vld [vmem:[#allocation2 + $0x40] sm:$0xf] }
  0x36   : > { %791 = vst [vmem:[#allocation2] sm:$0x1] %v790_v4  ;;  %823 = vst [vmem:[#allocation2 + $0x4] sm:$0x1] %v822_v5  ;;  %v1020_v20 = vld [vmem:[#allocation2 + $0x3c] sm:$0x1]  ;;  %v1018_v25 = vsel %vm3526_vm8, %v954_v12, %v1017_v17  ;;  %v1024_v27 = vsel %vm3526_vm8, %v962_v15, %v1023_v18 }
  0x37   : > { %v1026_v21 = vld [vmem:[#allocation2 + $0x44] sm:$0x1]  ;;  %v1066_v23 = vrot.slane %v1064_v6, 4  ;;  %v1069_v24 = vrot.slane %v1067_v8, 5  ;;  %v1021_v26 = vsel %vm3458_vm3, %v955_v13, %v1020_v20  ;;  %1019 = vst [vmem:[#allocation2 + $0x38] sm:$0xf] %v1018_v25 }
  0x38   : > { %v1027_v28 = vsel %vm3458_vm3, %v963_v16, %v1026_v21  ;;  %1022 = vst [vmem:[#allocation2 + $0x3c] sm:$0x1] %v1021_v26  ;;  %1025 = vst [vmem:[#allocation2 + $0x40] sm:$0xf] %v1024_v27  ;;  %v1073_v58 = vshll.u32 %v3598_v1, 16  ;;  %v1656_v29 = vshrl.u32 %v1639_v2, 16 }
  0x39   : > { %1028 = vst [vmem:[#allocation2 + $0x44] sm:$0x1] %v1027_v28  ;;  %v1070_v14 = vor.u32 %v1069_v24, %v1066_v23  ;;  %v1659_v30 = vshll.u32 %v1639_v2, 16  ;;  %v3629_v31 = vld [vmem:[%s4045_s3 + $0x8] ss:$0 sps:$4 sm:$0xcc]  }
  0x3a   : > { %v1665_v32 = vshll.u32 %v3606_v9, 16  ;;  %v1670_v33 = vshrl.u32 %v1641_v10, 16  ;;  %v1673_v34 = vshll.u32 %v1641_v10, 16  ;;  %v1679_v35 = vshll.u32 %v3608_v11, 16  ;;  %v3633_v36 = vld [vmem:[#allocation2 + $0x10] sm:$0xf] }
  0x3b   : > { %v1658_v37 = vrot.slane %v1656_v29, 4  ;;  %v1661_v38 = vrot.slane %v1659_v30, 5  ;;  %v3635_v39 = vld [vmem:[#allocation2 + $0x18] sm:$0xf]  ;;  %v3637_v41 = vld [vmem:[#allocation2 + $0x14] sm:$0x1] }
  0x3c   : > { %v3639_v42 = vrot.slane %v1070_v14, 4  ;;  %v3641_v43 = vrot.slane %v1073_v58, 5  ;;  %v1672_v44 = vrot.slane %v1670_v33, 4  ;;  %v1675_v45 = vrot.slane %v1673_v34, 5  ;;  %v3643_v46 = vld [vmem:[#allocation2 + $0x1c] sm:$0x1] }
  0x3d   : > { %v866_v47 = vld [vmem:[#allocation2] sm:$0xf]  ;;  %v869_v49 = vld [vmem:[#allocation2 + $0x4] sm:$0x1]  ;;  %v1662_v50 = vor.u32 %v1661_v38, %v1658_v37  ;;  %v1667_v51 = vrot.slane %v1665_v32, 5  ;;  %v1681_v52 = vrot.slane %v1679_v35, 5 }
  0x3e   : > { %v867_v53 = vsel %vm3526_vm8, %v3615_v22, %v866_v47  ;;  %v870_v54 = vsel %vm3458_vm3, %v861_v59, %v869_v49  ;;  %v1676_v56 = vor.u32 %v1675_v45, %v1672_v44  ;;  %v1940_v57 = vrot.slane %v3629_v31, 2  ;;  %v1643_v2 = vld [vmem:[#allocation2 + $0x18] sm:$0xf]  ;;  %v3666_v10 = vld [vmem:[#allocation2 + $0x1c] sm:$0x1] }
  0x3f   : > { %868 = vst [vmem:[#allocation2] sm:$0xf] %v867_v53  ;;  %871 = vst [vmem:[#allocation2 + $0x4] sm:$0x1] %v870_v54  ;;  %v1663_v61 = vrot.slane %v1662_v50, 4  ;;  %v1078_v62 = vshrl.u32 %v3633_v36, 16 }
  0x40   : > { %v1081_v63 = vshll.u32 %v3633_v36, 16  ;;  %v1087_v0 = vshll.u32 %v3637_v41, 16  ;;  %v1677_v4 = vrot.slane %v1676_v56, 4  ;;  %3293 = vmatprep.subr.msk.bf16.mxu1 %vm688_vm0, %v1940_v57  ;;  %v1092_v5 = vshrl.u32 %v3635_v39, 16  ;;  %v1645_v17 = vld [vmem:[#allocation2 + $0x20] sm:$0xf] }
  0x41   : > { %v1095_v6 = vshll.u32 %v3635_v39, 16  ;;  %v1101_v8 = vshll.u32 %v3643_v46, 16  ;;  %v1668_v12 = vsel %vm3654_vm11, %v1663_v61, %v1667_v51  ;;  %v1080_v13 = vrot.slane %v1078_v62, 4  ;;  %v3672_v24 = vld [vmem:[#allocation2 + $0x24] sm:$0x1] }
  0x42   : > { %v1083_v15 = vrot.slane %v1081_v63, 5  ;;  %v1089_v16 = vrot.slane %v1087_v0, 5  ;;  %v1682_v18 = vsel %vm3654_vm11, %v1677_v4, %v1681_v52  ;;  %v1094_v20 = vrot.slane %v1092_v5, 4  ;;  %v3688_v56 = vld [vmem:[#allocation2 + $0x20] sm:$0xf] }
  0x43   : > { %v1097_v21 = vrot.slane %v1095_v6, 5  ;;  %v1103_v23 = vrot.slane %v1101_v8, 5  ;;  %v2978_v25 = vcombine.low %v1668_v12, %v1682_v18  ;;  %v1684_v27 = vshrl.u32 %v1643_v2, 16  ;;  %v3697_v12 = vld [vmem:[#allocation2 + $0x28] sm:$0xf] }
  0x44   : > { %v1084_v26 = vor.u32 %v1083_v15, %v1080_v13  ;;  %v1687_v28 = vshll.u32 %v1643_v2, 16  ;;  %v1693_v58 = vshll.u32 %v3666_v10, 16  ;;  %v1698_v29 = vshrl.u32 %v1645_v17, 16  ;;  %v3695_v2 = vld [vmem:[#allocation2 + $0x24] sm:$0x1] }
  0x45   : > { %v1098_v14 = vor.u32 %v1097_v21, %v1094_v20  ;;  %v1701_v30 = vshll.u32 %v1645_v17, 16  ;;  %3175 = vmatprep.mubr.msk.bf16.mxu1 %vm675_vm6, %v2978_v25  ;;  %v1686_v32 = vrot.slane %v1684_v27, 4  ;;  %v1707_v34 = vshll.u32 %v3672_v24, 16  ;;  %v3700_v17 = vld [vmem:[#allocation2 + $0x2c] sm:$0x1] }
  0x46   : > { %v1085_v31 = vrot.slane %v1084_v26, 4  ;;  %v1689_v33 = vrot.slane %v1687_v28, 5  ;;  %v3677_v35 = vld [vmem:[#allocation2] sm:$0xf]  ;;  %v3679_v37 = vld [vmem:[#allocation2 + $0x4] sm:$0x1]  ;;  %v1076_v63 = vsel %vm3654_vm11, %v3639_v42, %v3641_v43 }
  0x47   : > { %v1099_v38 = vrot.slane %v1098_v14, 4  ;;  %v1695_v44 = vrot.slane %v1693_v58, 5  ;;  %v1050_v45 = vshrl.u32 %v3677_v35, 16  ;;  %v1053_v47 = vshll.u32 %v3677_v35, 16  ;;  %v3347_v19 = vld [vmem:[#allocation2 + $0x30] ss:$8 sps:$4 sm:$0xff]  }
  0x48   : > { %v1059_v49 = vshll.u32 %v3679_v37, 16  ;;  %v1090_v50 = vsel %vm3654_vm11, %v1085_v31, %v1089_v16  ;;  %v1690_v52 = vor.u32 %v1689_v33, %v1686_v32  ;;  %v1700_v53 = vrot.slane %v1698_v29, 4  ;;  %v1649_v31 = vld [vmem:[#allocation2 + $0x30] sm:$0xf] }
  0x49   : > { %v1104_v51 = vsel %vm3654_vm11, %v1099_v38, %v1103_v23  ;;  %v1703_v54 = vrot.slane %v1701_v30, 5  ;;  %v1052_v61 = vrot.slane %v1050_v45, 4  ;;  %v1055_v62 = vrot.slane %v1053_v47, 5  ;;  %v1647_v23 = vld [vmem:[#allocation2 + $0x28] sm:$0xf] }
  0x4a   : > { %v1894_v0 = vrot.slane %v3606_v9, 5  ;;  %v1061_v4 = vrot.slane %v1059_v49, 5  ;;  %v1691_v5 = vrot.slane %v1690_v52, 4  ;;  %v1709_v8 = vrot.slane %v1707_v34, 5 }
  0x4b   : > { %v1704_v6 = vor.u32 %v1703_v54, %v1700_v53  ;;  %v1056_v13 = vor.u32 %v1055_v62, %v1052_v61  ;;  %v2937_v15 = vcombine.low %v1090_v50, %v1104_v51  ;;  %v1954_v16 = vsel %vm688_vm0, %v1940_v57, 0  ;;  %v3709_v57 = vld [vmem:[#allocation2 + $0x2c] sm:$0x1]  ;;  %v3725_v62 = vld [vmem:[#allocation2 + $0x30] sm:$0xf] }
  0x4c   : > { %v1106_v18 = vshrl.u32 %v3688_v56, 16  ;;  %v1696_v42 = vsel %vm3654_vm11, %v1691_v5, %v1695_v44  ;;  %v1109_v20 = vshll.u32 %v3688_v56, 16  ;;  %v1115_v21 = vshll.u32 %v3695_v2, 16  ;;  %v3716_v44 = vld [vmem:[#allocation2 + $0x34] sm:$0x1] }
  0x4d   : > { %v1705_v43 = vrot.slane %v1704_v6, 4  ;;  %v1057_v25 = vrot.slane %v1056_v13, 4  ;;  %v1120_v27 = vshrl.u32 %v3697_v12, 16  ;;  %v1123_v28 = vshll.u32 %v3697_v12, 16  ;;  %v3721_v51 = vld [vmem:[%s4045_s3 + $0xc] sm:$0x3] }
  0x4e   : > { %v1108_v26 = vrot.slane %v1106_v18, 4  ;;  %v1111_v58 = vrot.slane %v1109_v20, 5  ;;  %v1117_v29 = vrot.slane %v1115_v21, 5  ;;  %v1129_v30 = vshll.u32 %v3700_v17, 16  ;;  %v3732_v20 = vld [vmem:[#allocation2 + $0x38] sm:$0xf] }
  0x4f   : > { %v1710_v14 = vsel %vm3654_vm11, %v1705_v43, %v1709_v8  ;;  %v1062_v32 = vsel %vm3654_vm11, %v1057_v25, %v1061_v4  ;;  %v1122_v34 = vrot.slane %v1120_v27, 4  ;;  %v1125_v38 = vrot.slane %v1123_v28, 5  ;;  %v3729_v8 = vld [vmem:[#allocation2 + $0x34] sm:$0x1]  ;;  %v3741_v27 = vld [vmem:[#allocation2 + $0x3c] sm:$0x1] }
  0x50   : > { %v2979_v33 = vcombine.low %v1696_v42, %v1710_v14  ;;  %v2936_v45 = vcombine.low %v1062_v32, %v1076_v63  ;;  %v1112_v47 = vor.u32 %v1111_v58, %v1108_v26  ;;  %v1131_v49 = vrot.slane %v1129_v30, 5  ;;  %v1651_v58 = vld [vmem:[#allocation2 + $0x38] sm:$0xf] }
  0x51   : > { %v1712_v50 = vshrl.u32 %v1647_v23, 16  ;;  %v1126_v52 = vor.u32 %v1125_v38, %v1122_v34  ;;  %v1715_v53 = vshll.u32 %v1647_v23, 16  ;;  %v1721_v54 = vshll.u32 %v3709_v57, 16 }
  0x52   : > { %3176 = vmatmul.mubr.msk.bf16.vlgmr.msra.gmra.mrb[0].mxu1 %vm675_vm6, %v2979_v33  ;;  %v1726_v61 = vshrl.u32 %v1649_v31, 16  ;;  %3135 = vmatprep.mubr.msk.bf16.mxu0 %vm675_vm6, %v2936_v45  ;;  %v1113_v63 = vrot.slane %v1112_v47, 4  ;;  %v1729_v5 = vshll.u32 %v1649_v31, 16  ;;  %v1735_v6 = vshll.u32 %v3716_v44, 16  ;;  %v3747_v47 = vld [vmem:[#allocation2 + $0x3c] sm:$0x1] }
  0x53   : > { %3184 = vmatpush3.bf16.msra.mxu1 %v1954_v16  ;;  %v1714_v4 = vrot.slane %v1712_v50, 4  ;;  %3136 = vmatmul.mubr.msk.bf16.vlgmr.msra.gmra.mrb[8].mxu0 %vm675_vm6, %v2937_v15  ;;  %v1127_v13 = vrot.slane %v1126_v52, 4  ;;  %v1717_v18 = vrot.slane %v1715_v53, 5  ;;  %v1723_v42 = vrot.slane %v1721_v54, 5 }
  0x54   : > { %v1728_v43 = vrot.slane %v1726_v61, 4  ;;  %3294 = vmatprep.subr.msk.bf16.mxu1 %vm688_vm0, %v3721_v51  ;;  %v1118_v16 = vsel %vm3654_vm11, %v1113_v63, %v1117_v29  ;;  %v1731_v21 = vrot.slane %v1729_v5, 5  ;;  %v1737_v23 = vrot.slane %v1735_v6, 5  ;;  %v3753_v5 = vld [vmem:[#allocation2 + $0x44] sm:$0x1] }
  0x55   : > { %v1134_v25 = vshrl.u32 %v3725_v62, 16  ;;  %v1132_v15 = vsel %vm3654_vm11, %v1127_v13, %v1131_v49  ;;  %v1718_v26 = vor.u32 %v1717_v18, %v1714_v4  ;;  %v1137_v28 = vshll.u32 %v3725_v62, 16  ;;  %v1653_v4 = vld [vmem:[#allocation2 + $0x40] sm:$0xf] }
  0x56   : > { %v1143_v14 = vshll.u32 %v3729_v8, 16  ;;  %v2938_v30 = vcombine.low %v1118_v16, %v1132_v15  ;;  %v1732_v31 = vor.u32 %v1731_v21, %v1728_v43  ;;  %v1148_v29 = vshrl.u32 %v3732_v20, 16  ;;  %v1868_v21 = vld [vmem:[#allocation2 + $0x8] sm:$0xe] }
  0x57   : > { %v1136_v32 = vrot.slane %v1134_v25, 4  ;;  %v1719_v33 = vrot.slane %v1718_v26, 4  ;;  %v1139_v34 = vrot.slane %v1137_v28, 5  ;;  %v1151_v45 = vshll.u32 %v3732_v20, 16  ;;  %v1869_v25 = vld [vmem:[#allocation2 + $0x10] sm:$0xe] }
  0x58   : > { %v1145_v38 = vrot.slane %v1143_v14, 5  ;;  %3139 = vmatprep.mubr.msk.bf16.mxu0 %vm675_vm6, %v2938_v30  ;;  %v1733_v49 = vrot.slane %v1732_v31, 4  ;;  %v1150_v50 = vrot.slane %v1148_v29, 4  ;;  %v1157_v52 = vshll.u32 %v3741_v27, 16 }
  0x59   : > { %v1740_v53 = vshrl.u32 %v1651_v58, 16  ;;  %v1724_v54 = vsel %vm3654_vm11, %v1719_v33, %v1723_v42  ;;  %v1140_v61 = vor.u32 %v1139_v34, %v1136_v32  ;;  %v1153_v63 = vrot.slane %v1151_v45, 5  ;;  %v3761_v42 = vld [vmem:[%s4045_s3 + $0x4] sm:$0x3]  ;;  %v1870_v45 = vld [vmem:[#allocation2 + $0x18] sm:$0xe] }
  0x5a   : > { %v1743_v6 = vshll.u32 %v1651_v58, 16  ;;  %v1738_v13 = vsel %vm3654_vm11, %v1733_v49, %v1737_v23  ;;  %v1159_v18 = vrot.slane %v1157_v52, 5  ;;  %v1749_v16 = vshll.u32 %v3747_v47, 16 }
  0x5b   : > { %v1742_v43 = vrot.slane %v1740_v53, 4  ;;  %v2980_v15 = vcombine.low %v1724_v54, %v1738_v13  ;;  %v1141_v26 = vrot.slane %v1140_v61, 4  ;;  %v1154_v28 = vor.u32 %v1153_v63, %v1150_v50  ;;  %v1872_v13 = vld [vmem:[#allocation2 + $0x28] sm:$0xe] }
  0x5c   : > { %v1745_v14 = vrot.slane %v1743_v6, 5  ;;  %v1898_v58 = vrot.slane %v3608_v11, 5  ;;  %v1754_v30 = vshrl.u32 %v1653_v4, 16  ;;  %v1757_v31 = vshll.u32 %v1653_v4, 16 }
  0x5d   : > { %v1763_v23 = vshll.u32 %v3753_v5, 16  ;;  %3179 = vmatprep.mubr.msk.bf16.mxu1 %vm675_vm6, %v2980_v15  ;;  %v1146_v32 = vsel %vm3654_vm11, %v1141_v26, %v1145_v38  ;;  %v1155_v29 = vrot.slane %v1154_v28, 4  ;;  %v1291_v34 = vsel %vm688_vm0, %v3593_v60, 0  ;;  %v1871_v38 = vld [vmem:[#allocation2 + $0x20] sm:$0xe] }
  0x5e   : > { %v1746_v33 = vor.u32 %v1745_v14, %v1742_v43  ;;  %v1751_v49 = vrot.slane %v1749_v16, 5  ;;  %v1756_v50 = vrot.slane %v1754_v30, 4  ;;  %v1759_v52 = vrot.slane %v1757_v31, 5  ;;  %3144 = vmatpush3.bf16.msra.mxu0 %v1291_v34  ;;  %v1874_v28 = vld [vmem:[#allocation2 + $0x38] sm:$0xe] }
  0x5f   : > { %v2945_v11 = vcombine.low %v3677_v35, %v3579_v40  ;;  %v1160_v54 = vsel %vm3654_vm11, %v1155_v29, %v1159_v18  ;;  %v2986_v60 = vrot.slane %v1868_v21, 9  ;;  %v2987_v63 = vrot.slane %v1869_v25, 9  ;;  %3290 = vmatprep.subr.msk.bf16.mxu0 %vm688_vm0, %v3761_v42  ;;  %v1873_v25 = vld [vmem:[#allocation2 + $0x30] sm:$0xe]  ;;  %v1875_v14 = vld [vmem:[#allocation2 + $0x40] sm:$0xe] }
  0x60   : > { %v1747_v61 = vrot.slane %v1746_v33, 4  ;;  %v1902_v4 = vrot.slane %v3666_v10, 5  ;;  %v2939_v6 = vcombine.low %v1146_v32, %v1160_v54  ;;  %v1760_v40 = vor.u32 %v1759_v52, %v1756_v50  ;;  %v1359_v32 = vld [vmem:[#allocation2 + $0x8] sm:$0xe] }
  0x61   : > { %v1765_v35 = vrot.slane %v1763_v23, 5  ;;  %v1906_v43 = vrot.slane %v3672_v24, 5  ;;  %v1895_v16 = vsel %vm3774_vm14, %v2986_v60, %v1894_v0  ;;  %v1899_v18 = vsel %vm3774_vm14, %v2987_v63, %v1898_v58  ;;  %v1358_v23 = vld [vmem:[#allocation2] sm:$0xe] }
  0x62   : > { %v2988_v21 = vrot.slane %v1870_v45, 9  ;;  %3140 = vmatmul.mubr.msk.bf16.gmra.mrb[12].mxu0 %vm675_vm6, %v2939_v6  ;;  %v1752_v10 = vsel %vm3654_vm11, %v1747_v61, %v1751_v49  ;;  %v1761_v15 = vrot.slane %v1760_v40, 4  ;;  %v2989_v26 = vrot.slane %v1871_v38, 9  ;;  %v1360_v61 = vld [vmem:[#allocation2 + $0x10] sm:$0xe] }
  0x63   : > { %3145 = vmatprep.mubr.msk.bf16.mxu0 %vm675_vm6, %v2945_v11  ;;  %v2990_v24 = vrot.slane %v1872_v13, 9  ;;  %v1910_v9 = vrot.slane %v3709_v57, 5  ;;  %v2994_v58 = vcombine.low %v1895_v16, %v1899_v18  ;;  %v2991_v30 = vrot.slane %v1873_v25, 9  ;;  %v1362_v60 = vld [vmem:[#allocation2 + $0x20] sm:$0xe] }
  0x64   : > { %v1766_v0 = vsel %vm3654_vm11, %v1761_v15, %v1765_v35  ;;  %v1914_v31 = vrot.slane %v3716_v44, 5  ;;  %v2946_v33 = vcombine.low %v3633_v36, %v3635_v39  ;;  %v1903_v34 = vsel %vm3774_vm14, %v2988_v21, %v1902_v4  ;;  %v816_v35 = vld [vmem:[#allocation2 + $0x48] sm:$0x1]  ;;  %v2147_v16 = vld [vmem:[#allocation2 + $0x10] sm:$0xf] }
  0x65   : > { %v2981_v29 = vcombine.low %v1752_v10, %v1766_v0  ;;  %v2947_v57 = vcombine.low %v3688_v56, %v3697_v12  ;;  %v1907_v45 = vsel %vm3774_vm14, %v2989_v26, %v1906_v43  ;;  %v1911_v49 = vsel %vm3774_vm14, %v2990_v24, %v1910_v9  ;;  %v1363_v43 = vld [vmem:[#allocation2 + $0x28] sm:$0xe]  ;;  %v3845_v15 = vld [vmem:[#allocation2 + $0x30] sm:$0xe]  ;;  %v2149_v26 = vld [vmem:[#allocation2 + $0x18] sm:$0xf] }
  0x66   : > { %v2992_v50 = vrot.slane %v1874_v28, 9  ;;  %v1918_v44 = vrot.slane %v3747_v47, 5  ;;  %v2993_v52 = vrot.slane %v1875_v14, 9  ;;  %v2953_v11 = vrot.slane %v1358_v23, 9 }
  0x67   : > { %3180 = vmatmul.mubr.msk.bf16.gmra.mrb[4].mxu1 %vm675_vm6, %v2981_v29  ;;  %v1387_v36 = vrot.slane %v3679_v37, 5  ;;  %v2954_v39 = vrot.slane %v1359_v32, 9  ;;  %v1915_v56 = vsel %vm3774_vm14, %v2991_v30, %v1914_v31  ;;  %v1922_v12 = vrot.slane %v3753_v5, 5  ;;  %v3821_v47 = vld [vmem:[%s4045_s3 + $0xc] ss:$0 sps:$4 sm:$0xcc]  }
  0x68   : > { %3185 = vmatprep.mubr.msk.bf16.mxu1 %vm675_vm6, %v2994_v58  ;;  %v1443_v38 = vsel %vm688_vm0, %v3761_v42, 0  ;;  %v1391_v54 = vrot.slane %v3598_v1, 5  ;;  %v1361_v37 = vld [vmem:[#allocation2 + $0x18] sm:$0xe]  ;;  %v2995_v63 = vcombine.low %v1903_v34, %v1907_v45  ;;  %v2948_v4 = vcombine.low %v3725_v62, %v3732_v20  ;;  %v3867_v45 = vld [vmem:[#allocation2 + $0x14] sm:$0x1] }
  0x69   : > { %v3829_v5 = vld [vmem:[%s4045_s3 + $0x4] ss:$0 sps:$4 sm:$0xcc]   ;;  %v2072_v1 = vsel %vm688_vm0, %v3721_v51, 0  ;;  %v2996_v42 = vcombine.low %v1911_v49, %v1915_v56  ;;  %v1388_v6 = vsel %vm3774_vm14, %v2953_v11, %v1387_v36  ;;  %v1919_v62 = vsel %vm3774_vm14, %v2992_v50, %v1918_v44  ;;  %v1365_v30 = vld [vmem:[#allocation2 + $0x38] sm:$0xe] }
  0x6a   : > { %3146 = vmatmul.mubr.msk.bf16.vlgmr.msra.gmra.mrb[8].mxu0 %vm675_vm6, %v2946_v33  ;;  %v1392_v40 = vsel %vm3774_vm14, %v2954_v39, %v1391_v54  ;;  %v1923_v20 = vsel %vm3774_vm14, %v2993_v52, %v1922_v12  ;;  %v2291_v13 = vrot.slane %v3821_v47, 2  ;;  %v2955_v51 = vrot.slane %v1360_v61, 9  ;;  %v3872_v44 = vld [vmem:[#allocation2 + $0x1c] sm:$0x1]  ;;  %v2151_v36 = vld [vmem:[#allocation2 + $0x20] sm:$0xf] }
  0x6b   : > { %3149 = vmatprep.mubr.msk.bf16.mxu0 %vm675_vm6, %v2947_v57  ;;  %3154 = vmatpush3.bf16.msra.mxu0 %v1443_v38  ;;  %v1395_v18 = vrot.slane %v3637_v41, 5  ;;  %v2956_v21 = vrot.slane %v1361_v37, 9  ;;  %v1399_v25 = vrot.slane %v3643_v46, 5  ;;  %v2957_v10 = vrot.slane %v1362_v60, 9  ;;  %v2153_v12 = vld [vmem:[#allocation2 + $0x28] sm:$0xf] }
  0x6c   : > { %v2961_v28 = vcombine.low %v1388_v6, %v1392_v40  ;;  %v1403_v24 = vrot.slane %v3695_v2, 5  ;;  %v817_v9 = vsel %vm3458_vm3, 0, %v816_v35  ;;  %v1550_v14 = vrot.slane %v3829_v5, 2  ;;  %v2155_v54 = vld [vmem:[#allocation2 + $0x30] sm:$0xf] }
  0x6d   : > { %v2958_v0 = vrot.slane %v1363_v43, 9  ;;  %v1407_v41 = vrot.slane %v3700_v17, 5  ;;  %818 = vst [vmem:[#allocation2 + $0x48] sm:$0x1] %v817_v9  ;;  %v2164_v58 = vshrl.u32 %v2147_v16, 16  ;;  %v2167_v46 = vshll.u32 %v2147_v16, 16 }
  0x6e   : > { %v2178_v31 = vshrl.u32 %v2149_v26, 16  ;;  %v2997_v23 = vcombine.low %v1919_v62, %v1923_v20  ;;  %v1396_v2 = vsel %vm3774_vm14, %v2955_v51, %v1395_v18  ;;  %3291 = vmatprep.subr.msk.bf16.mxu0 %vm688_vm0, %v1550_v14  ;;  %v2181_v32 = vshll.u32 %v2149_v26, 16  ;;  %v3344_v17 = vld [vmem:[#allocation2 + $0x10] ss:$8 sps:$4 sm:$0xff]   ;;  %v3346_v20 = vld [vmem:[#allocation2 + $0x20] ss:$8 sps:$4 sm:$0xff]  }
  0x6f   : > { %3186 = vmatmul.mubr.msk.bf16.vlgmr.msra.gmra.mrb[0].mxu1 %vm675_vm6, %v2995_v63  ;;  %v1400_v29 = vsel %vm3774_vm14, %v2956_v21, %v1399_v25  ;;  %v1404_v33 = vsel %vm3774_vm14, %v2957_v10, %v1403_v24  ;;  %v2959_v34 = vrot.slane %v3845_v15, 9  ;;  %v1411_v57 = vrot.slane %v3729_v8, 5  ;;  %v2157_v5 = vld [vmem:[#allocation2 + $0x38] sm:$0xf]  ;;  %v848_v21 = vld [vmem:[#allocation2 + $0x4c] sm:$0x1] }
  0x70   : > { %3194 = vmatpush3.bf16.msra.mxu1 %v2072_v1  ;;  %3189 = vmatprep.mubr.msk.bf16.mxu1 %vm675_vm6, %v2996_v42  ;;  %v1408_v49 = vsel %vm3774_vm14, %v2958_v0, %v1407_v41  ;;  %v2960_v50 = vrot.slane %v1365_v30, 9  ;;  %v2166_v52 = vrot.slane %v2164_v58, 4  ;;  %v2169_v11 = vrot.slane %v2167_v46, 5  ;;  %v3888_v15 = vld [vmem:[#allocation2 + $0x24] sm:$0x1] }
  0x71   : > { %3295 = vmatprep.subr.msk.bf16.mxu1 %vm688_vm0, %v2291_v13  ;;  %v2180_v39 = vrot.slane %v2178_v31, 4  ;;  %v2183_v56 = vrot.slane %v2181_v32, 5  ;;  %v1415_v38 = vrot.slane %v3741_v27, 5  ;;  %v2173_v8 = vshll.u32 %v3867_v45, 16  ;;  %v3891_v24 = vld [vmem:[#allocation2 + $0x2c] sm:$0x1] }
  0x72   : > { %3150 = vmatmul.mubr.msk.bf16.gmra.mrb[12].mxu0 %vm675_vm6, %v2948_v4  ;;  %v2962_v61 = vcombine.low %v1396_v2, %v1400_v29  ;;  %v2963_v37 = vcombine.low %v1404_v33, %v1408_v49  ;;  %v2192_v63 = vshrl.u32 %v2151_v36, 16  ;;  %v2195_v4 = vshll.u32 %v2151_v36, 16  ;;  %v3896_v30 = vld [vmem:[#allocation2 + $0x34] sm:$0x1]  ;;  %v2159_v29 = vld [vmem:[#allocation2 + $0x40] sm:$0xf] }
  0x73   : > { %3155 = vmatprep.mubr.msk.bf16.mxu0 %vm675_vm6, %v2961_v28  ;;  %v2170_v42 = vor.u32 %v2169_v11, %v2166_v52  ;;  %v2206_v6 = vshrl.u32 %v2153_v12, 16  ;;  %v2209_v40 = vshll.u32 %v2153_v12, 16  ;;  %v1564_v27 = vsel %vm688_vm0, %v1550_v14, 0  ;;  %v2436_v47 = vld [vmem:[%s4045_s3 + $0x10] sm:$0x3] }
  0x74   : > { %v886_v60 = vld [vmem:[#allocation2 + $0x48] sm:$0xf]  ;;  %v2184_v35 = vor.u32 %v2183_v56, %v2180_v39  ;;  %v2187_v62 = vshll.u32 %v3872_v44, 16  ;;  %v2220_v51 = vshrl.u32 %v2155_v54, 16  ;;  %v2223_v43 = vshll.u32 %v2155_v54, 16 }
  0x75   : > { %v887_v1 = vsel %vm3526_vm8, %v3615_v22, %v886_v60  ;;  %v2234_v16 = vshrl.u32 %v2157_v5, 16  ;;  %v2237_v18 = vshll.u32 %v2157_v5, 16  ;;  %v1412_v22 = vsel %vm3774_vm14, %v2959_v34, %v1411_v57  ;;  %v3904_v34 = vld [vmem:[#allocation2 + $0x3c] sm:$0x1]  ;;  %v3350_v57 = vld [vmem:[#allocation2 + $0x8] ss:$8 sps:$4 sm:$0xff]  }
  0x76   : > { %888 = vst [vmem:[#allocation2 + $0x48] sm:$0xf] %v887_v1  ;;  %v1416_v25 = vsel %vm3774_vm14, %v2960_v50, %v1415_v38  ;;  %v2175_v10 = vrot.slane %v2173_v8, 5  ;;  %v2194_v26 = vrot.slane %v2192_v63, 4  ;;  %v2171_v28 = vrot.slane %v2170_v42, 4 }
  0x77   : > { %3190 = vmatmul.mubr.msk.bf16.gmra.mrb[4].mxu1 %vm675_vm6, %v2997_v23  ;;  %v2197_v9 = vrot.slane %v2195_v4, 5  ;;  %v2208_v14 = vrot.slane %v2206_v6, 4  ;;  %v2211_v0 = vrot.slane %v2209_v40, 5  ;;  %v2305_v41 = vsel %vm688_vm0, %v2291_v13, 0 }
  0x78   : > { %3195 = vmatprep.mubr.msk.bf16.mxu1 %vm675_vm6, %v3344_v17  ;;  %v2185_v58 = vrot.slane %v2184_v35, 4  ;;  %v2189_v46 = vrot.slane %v2187_v62, 5  ;;  %v849_v31 = vsel %vm3467_vm5, 0, %v848_v21  ;;  %v2222_v23 = vrot.slane %v2220_v51, 4 }
  0x79   : > { %v2225_v2 = vrot.slane %v2223_v43, 5  ;;  %v2236_v32 = vrot.slane %v2234_v16, 4  ;;  %v2239_v17 = vrot.slane %v2237_v18, 5  ;;  %850 = vst [vmem:[#allocation2 + $0x4c] sm:$0x1] %v849_v31  ;;  %v2964_v33 = vcombine.low %v1412_v22, %v1416_v25 }
  0x7a   : > { %3156 = vmatmul.mubr.msk.bf16.vlgmr.msra.gmra.mrb[8].mxu0 %vm675_vm6, %v2962_v61  ;;  %v2201_v13 = vshll.u32 %v3888_v15, 16  ;;  %v2176_v7 = vsel %vm3654_vm11, %v2171_v28, %v2175_v10  ;;  %v2198_v49 = vor.u32 %v2197_v9, %v2194_v26  ;;  %v2212_v50 = vor.u32 %v2211_v0, %v2208_v14  ;;  %v3922_v16 = vld [vmem:[#allocation2 + $0x44] sm:$0x1]  ;;  %v3351_v18 = vld [vmem:[#allocation2 + $0x18] ss:$8 sps:$4 sm:$0xff]  }
  0x7b   : > { %3159 = vmatprep.mubr.msk.bf16.mxu0 %vm675_vm6, %v2963_v37  ;;  %3164 = vmatpush3.bf16.msra.mxu0 %v1564_v27  ;;  %v2215_v52 = vshll.u32 %v3891_v24, 16  ;;  %v2190_v11 = vsel %vm3654_vm11, %v2185_v58, %v2189_v46  ;;  %v2229_v36 = vshll.u32 %v3896_v30, 16  ;;  %v2248_v56 = vshrl.u32 %v2159_v29, 16  ;;  %v3352_v22 = vld [vmem:[#allocation2 + $0x28] ss:$8 sps:$4 sm:$0xff]  }
  0x7c   : > { %v2251_v12 = vshll.u32 %v2159_v29, 16  ;;  %v2226_v38 = vor.u32 %v2225_v2, %v2222_v23  ;;  %v2240_v8 = vor.u32 %v2239_v17, %v2236_v32  ;;  %v2243_v54 = vshll.u32 %v3904_v34, 16  ;;  %v2380_v9 = vld [vmem:[#allocation2 + $0x10] sm:$0xe]  ;;  %v2381_v14 = vld [vmem:[#allocation2 + $0x18] sm:$0xe] }
  0x7d   : > { %v2161_v39 = vld [vmem:[#allocation2 + $0x48] sm:$0xf]  ;;  %v3011_v63 = vcombine.low %v2176_v7, %v2190_v11  ;;  %v2199_v4 = vrot.slane %v2198_v49, 4  ;;  %v2203_v5 = vrot.slane %v2201_v13, 5  ;;  %v2217_v1 = vrot.slane %v2215_v52, 5 }
  0x7e   : > { %v2262_v61 = vshrl.u32 %v2161_v39, 16  ;;  %v2265_v37 = vshll.u32 %v2161_v39, 16  ;;  %v3348_v60 = vld [vmem:[#allocation2 + $0x40] ss:$8 sps:$4 sm:$0xff]   ;;  %v2213_v42 = vrot.slane %v2212_v50, 4  ;;  %v2231_v6 = vrot.slane %v2229_v36, 5 }
  0x7f   : > { %3196 = vmatmul.mubr.msk.bf16.vlgmr.msra.gmra.mrb[0].mxu1 %vm675_vm6, %v3346_v20  ;;  %v2250_v27 = vrot.slane %v2248_v56, 4  ;;  %v2253_v35 = vrot.slane %v2251_v12, 5  ;;  %v2227_v62 = vrot.slane %v2226_v38, 4  ;;  %v2241_v20 = vrot.slane %v2240_v8, 4  ;;  %v2382_v49 = vld [vmem:[#allocation2 + $0x20] sm:$0xe] }
  0x80   : > { %3204 = vmatpush3.bf16.msra.mxu1 %v2305_v41  ;;  %3199 = vmatprep.mubr.msk.bf16.mxu1 %vm675_vm6, %v3347_v19  ;;  %v889_v40 = vld [vmem:[#allocation2 + $0x4c] sm:$0x1]  ;;  %v2245_v51 = vrot.slane %v2243_v54, 5  ;;  %v2264_v21 = vrot.slane %v2262_v61, 4  ;;  %v2267_v19 = vrot.slane %v2265_v37, 5  ;;  %v2204_v25 = vsel %vm3654_vm11, %v2199_v4, %v2203_v5 }
  0x81   : > { %3296 = vmatprep.subr.msk.bf16.mxu1 %vm688_vm0, %v2436_v47  ;;  %v890_v43 = vsel %vm3458_vm3, %v861_v59, %v889_v40  ;;  %v2218_v48 = vsel %vm3654_vm11, %v2213_v42, %v2217_v1  ;;  %v2254_v10 = vor.u32 %v2253_v35, %v2250_v27  ;;  %v2257_v3 = vshll.u32 %v3922_v16, 16  ;;  %v2384_v11 = vld [vmem:[#allocation2 + $0x30] sm:$0xe]  ;;  %v2385_v36 = vld [vmem:[#allocation2 + $0x38] sm:$0xe] }
  0x82   : > { %3160 = vmatmul.mubr.msk.bf16.gmra.mrb[12].mxu0 %vm675_vm6, %v2964_v33  ;;  %891 = vst [vmem:[#allocation2 + $0x4c] sm:$0x1] %v890_v43  ;;  %v2232_v59 = vsel %vm3654_vm11, %v2227_v62, %v2231_v6  ;;  %v2246_v26 = vsel %vm3654_vm11, %v2241_v20, %v2245_v51  ;;  %v2268_v28 = vor.u32 %v2267_v19, %v2264_v21  ;;  %v2462_v41 = vsel %vm688_vm0, %v2436_v47, 0  ;;  %v3353_v33 = vld [vmem:[#allocation2 + $0x38] ss:$8 sps:$4 sm:$0xff]  }
  0x83   : > { %3165 = vmatprep.mubr.msk.bf16.mxu0 %vm675_vm6, %v3350_v57  ;;  %v3012_v0 = vcombine.low %v2204_v25, %v2218_v48  ;;  %v3013_v58 = vcombine.low %v2232_v59, %v2246_v26  ;;  %v2255_v46 = vrot.slane %v2254_v10, 4  ;;  %v2259_v31 = vrot.slane %v2257_v3, 5  ;;  %v2387_v5 = vld [vmem:[#allocation2 + $0x48] sm:$0xe]  ;;  %v2917_v51 = vld [vmem:[%s4047_s5] ss:$0 sm:$0xff] }
  0x84   : > { %v3020_v2 = vrot.slane %v2380_v9, 9  ;;  %v2406_v32 = vrot.slane %v3867_v45, 5  ;;  %v3021_v17 = vrot.slane %v2381_v14, 9  ;;  %v2410_v29 = vrot.slane %v3872_v44, 5  ;;  %v2383_v44 = vld [vmem:[#allocation2 + $0x28] sm:$0xe] }
  0x85   : > { %v2269_v13 = vrot.slane %v2268_v28, 4  ;;  %v2260_v47 = vsel %vm3654_vm11, %v2255_v46, %v2259_v31  ;;  %v3022_v56 = vrot.slane %v2382_v49, 9  ;;  %v2414_v38 = vrot.slane %v3888_v15, 5  ;;  %v2386_v15 = vld [vmem:[#allocation2 + $0x40] sm:$0xe] }
  0x86   : > { %v2407_v50 = vsel %vm3774_vm14, %v3020_v2, %v2406_v32  ;;  %v2411_v45 = vsel %vm3774_vm14, %v3021_v17, %v2410_v29  ;;  %v3023_v8 = vrot.slane %v2383_v44, 9  ;;  %v2418_v54 = vrot.slane %v3891_v24, 5 }
  0x87   : > { %3200 = vmatmul.mubr.msk.bf16.gmra.mrb[4].mxu1 %vm675_vm6, %v3348_v60  ;;  %v3028_v12 = vcombine.low %v2407_v50, %v2411_v45  ;;  %v3024_v61 = vrot.slane %v2384_v11, 9  ;;  %v2422_v37 = vrot.slane %v3896_v30, 5  ;;  %v3025_v60 = vrot.slane %v2385_v36, 9 }
  0x88   : > { %3205 = vmatprep.mubr.msk.bf16.mxu1 %vm675_vm6, %v3011_v63  ;;  %v2426_v63 = vrot.slane %v3904_v34, 5  ;;  %v2415_v55 = vsel %vm3774_vm14, %v3022_v56, %v2414_v38  ;;  %v2419_v4 = vsel %vm3774_vm14, %v3023_v8, %v2418_v54  ;;  %v3026_v1 = vrot.slane %v2386_v15, 9 }
  0x89   : > { %v2162_v23 = vld [vmem:[#allocation2 + $0x4c] sm:$0x1]  ;;  %v2423_v24 = vsel %vm3774_vm14, %v3024_v61, %v2422_v37  ;;  %v3029_v34 = vcombine.low %v2415_v55, %v2419_v4  ;;  %v2430_v6 = vrot.slane %v3922_v16, 5  ;;  %v3027_v40 = vrot.slane %v2387_v5, 9 }
  0x8a   : > { %3166 = vmatmul.mubr.msk.bf16.vlgmr.msra.gmra.mrb[8].mxu0 %vm675_vm6, %v3351_v18  ;;  %v2271_v57 = vshll.u32 %v2162_v23, 16  ;;  %v2427_v30 = vsel %vm3774_vm14, %v3025_v60, %v2426_v63  ;;  %v2434_v27 = vrot.slane %v2162_v23, 5  ;;  %vm2585_vm0 = vcmask 64512  }
  0x8b   : > { %3169 = vmatprep.mubr.msk.bf16.mxu0 %vm675_vm6, %v3352_v22  ;;  %v3030_v42 = vcombine.low %v2423_v24, %v2427_v30  ;;  %v2431_v35 = vsel %vm3774_vm14, %v3026_v1, %v2430_v6 }
  0x8c   : > { %v2273_v7 = vrot.slane %v2271_v57, 5  ;;  %v2435_v62 = vsel %vm3774_vm14, %v3027_v40, %v2434_v27 }
  0x8d   : > { %v3031_v20 = vcombine.low %v2431_v35, %v2435_v62 }
  0x8e   : > { %v2274_v52 = vsel %vm3654_vm11, %v2269_v13, %v2273_v7 }
  0x8f   : > { %3206 = vmatmul.mubr.msk.bf16.vlgmr.msra.gmra.mrb[0].mxu1 %vm675_vm6, %v3012_v0  ;;  %v3014_v39 = vcombine.low %v2260_v47, %v2274_v52 }
  0x90   : > { %3214 = vmatpush3.bf16.msra.mxu1 %v2462_v41  ;;  %3209 = vmatprep.mubr.msk.bf16.mxu1 %vm675_vm6, %v3013_v58 }
  0x92   : > { %3170 = vmatmul.mubr.msk.bf16.gmra.mrb[12].mxu0 %vm675_vm6, %v3353_v33 }
  0x97   : > { %3210 = vmatmul.mubr.msk.bf16.gmra.mrb[4].mxu1 %vm675_vm6, %v3014_v39 }
  0x98   : > { %3215 = vmatprep.mubr.msk.bf16.mxu1 %vm675_vm6, %v3028_v12 }
  0x9f   : > { %3216 = vmatmul.mubr.msk.bf16.vlgmr.msra.gmra.mrb[0].mxu1 %vm675_vm6, %v3029_v34 }
  0xa0   : > { %3219 = vmatprep.mubr.msk.bf16.mxu1 %vm675_vm6, %v3030_v42 }
  0xa7   : > { %3220 = vmatmul.mubr.msk.bf16.gmra.mrb[4].mxu1 %vm675_vm6, %v3031_v20 }
  0xf2   : > { %v3127_v43 = vpop.f32.mrb[0].mxu0 }
  0xf3   : > { %v735_v16 = vadd.f32 %v3127_v43, %v2917_v51  ;;  %v726_v18 = vpop.f32.mrb[1].mxu0 }
  0xf4   : > { %v727_v21 = vadd.f32 %v2917_v51, %v726_v18  ;;  %v3128_v53 = vpop.f32.mrb[2].mxu0 }
  0xf5   : > { %v759_v19 = vpack.c.bf16 %v735_v16, %v735_v16  ;;  %v738_v22 = vadd.f32 %v3128_v53, %v2917_v51  ;;  %v729_v25 = vpop.f32.mrb[3].mxu0 }
  0xf6   : > { %v757_v48 = vpack.c.bf16 %v727_v21, %v727_v21  ;;  %v730_v10 = vadd.f32 %v2917_v51, %v729_v25 }
  0xf7   : > { %768 = vst.msk [vmem:[%s550_s16 + $0x8] sm:$0xf] %vm765_vm15, %v759_v19  ;;  %v760_v3 = vpack.c.bf16 %v738_v22, %v738_v22 }
  0xf8   : > { %766 = vst.msk [vmem:[%s550_s16] sm:$0xf] %vm765_vm15, %v757_v48  ;;  %v758_v59 = vpack.c.bf16 %v730_v10, %v730_v10 }
  0xf9   : > { %769 = vst.msk [vmem:[%s550_s16 + $0xc] sm:$0xf] %vm765_vm15, %v760_v3 }
  0xfa   : > { %767 = vst.msk [vmem:[%s550_s16 + $0x4] sm:$0xf] %vm765_vm15, %v758_v59 }
 0x100   : > { %v3131_v26 = vpop.f32.mrb[4].mxu0 }
 0x101   : > { %v751_v28 = vadd.f32 %v3131_v26, %v2917_v51  ;;  %v742_v9 = vpop.f32.mrb[5].mxu0 }
 0x102   : > { %v743_v14 = vadd.f32 %v2917_v51, %v742_v9  ;;  %v3132_v0 = vpop.f32.mrb[6].mxu0 }
 0x103   : > { %v763_v41 = vpack.c.bf16 %v751_v28, %v751_v28  ;;  %v754_v58 = vadd.f32 %v3132_v0, %v2917_v51  ;;  %v745_v46 = vpop.f32.mrb[7].mxu0 }
 0x104   : > { %v761_v31 = vpack.c.bf16 %v743_v14, %v743_v14  ;;  %v746_v23 = vadd.f32 %v2917_v51, %v745_v46 }
 0x105   : > { %772 = vst.msk [vmem:[%s550_s16 + $0x18] sm:$0xf] %vm765_vm15, %v763_v41  ;;  %v764_v2 = vpack.c.bf16 %v754_v58, %v754_v58 }
 0x106   : > { %770 = vst.msk [vmem:[%s550_s16 + $0x10] sm:$0xf] %vm765_vm15, %v761_v31  ;;  %v762_v32 = vpack.c.bf16 %v746_v23, %v746_v23 }
 0x107   : > { %773 = vst.msk [vmem:[%s550_s16 + $0x1c] sm:$0xf] %vm765_vm15, %v764_v2 }
 0x108   : > { %771 = vst.msk [vmem:[%s550_s16 + $0x14] sm:$0xf] %vm765_vm15, %v762_v32 }
 0x15d   : > { %v3167_v17 = vpop.f32.mrb[8].mxu0 }
 0x15e   : > { %v1600_v29 = vpop.f32.mrb[9].mxu0 }
 0x15f   : > { %v3168_v33 = vpop.f32.mrb[10].mxu0 }
 0x160   : > { %v1603_v13 = vpop.f32.mrb[11].mxu0 }
 0x165   : > { %v3171_v57 = vpop.f32.mrb[12].mxu0 }
 0x166   : > { %v1616_v47 = vpop.f32.mrb[13].mxu0 }
 0x167   : > { %v3172_v7 = vpop.f32.mrb[14].mxu0 }
 0x168   : > { %v1619_v49 = vpop.f32.mrb[15].mxu0 }
 0x172   : > { %v3217_v50 = vpop.f32.mrb[0].mxu1 }
 0x173   : > { %v3223_v45 = vadd.f32 %v3217_v50, %v3167_v17  ;;  %v2498_v44 = vpop.f32.mrb[1].mxu1 }
 0x174   : > { %v3224_v52 = vadd.f32 %v2498_v44, %v1600_v29  ;;  %v3218_v11 = vpop.f32.mrb[2].mxu1 }
 0x175   : > { %v3066_v36 = vpack.c.bf16 %v3223_v45, %v3223_v45  ;;  %v3225_v39 = vadd.f32 %v3218_v11, %v3168_v33  ;;  %v2501_v56 = vpop.f32.mrb[3].mxu1 }
 0x176   : > { %v3064_v12 = vpack.c.bf16 %v3224_v52, %v3224_v52  ;;  %v3226_v38 = vadd.f32 %v2501_v56, %v1603_v13 }
 0x177   : > { %2571 = vst.msk [vmem:[%s3995_s19 + $0x8] sm:$0xf] %vm765_vm15, %v3066_v36  ;;  %v2538_v8 = vpack.c.bf16 %v3225_v39, %v3223_v45  ;;  %v3067_v54 = vpack.c.bf16 %v3225_v39, %v3225_v39 }
 0x178   : > { %2569 = vst.msk [vmem:[%s3995_s19] sm:$0xf] %vm765_vm15, %v3064_v12  ;;  %v2537_v61 = vpack.c.bf16 %v3226_v38, %v3224_v52  ;;  %v3065_v37 = vpack.c.bf16 %v3226_v38, %v3226_v38 }
 0x179   : > { %2572 = vst.msk [vmem:[%s3995_s19 + $0xc] sm:$0xf] %vm765_vm15, %v3067_v54  ;;  %v2579_v60 = vunpack.c.l.bf16 %v2538_v8  ;;  %v2580_v30 = vunpack.c.h.bf16 %v2538_v8 }
 0x17a   : > { %2570 = vst.msk [vmem:[%s3995_s19 + $0x4] sm:$0xf] %vm765_vm15, %v3065_v37  ;;  %v2577_v63 = vunpack.c.l.bf16 %v2537_v61  ;;  %v2578_v55 = vunpack.c.h.bf16 %v2537_v61  ;;  %v3221_v4 = vpop.f32.mrb[4].mxu1 }
 0x17b   : > { %v3227_v15 = vadd.f32 %v3221_v4, %v3171_v57  ;;  %v2514_v24 = vpop.f32.mrb[5].mxu1  ;;  %v2589_v62 = vsel %vm2585_vm0, %v2579_v60, 0.0  ;;  %v2591_v21 = vsel %vm2585_vm0, %v2580_v30, 0.0 }
 0x17c   : > { %v2586_v5 = vsel %vm2585_vm0, %v2577_v63, 0.0  ;;  %v2587_v34 = vsel %vm2585_vm0, %v2578_v55, 0.0  ;;  %v3228_v1 = vadd.f32 %v2514_v24, %v1616_v47  ;;  %v3222_v42 = vpop.f32.mrb[6].mxu1 }
 0x17d   : > { %v2588_v6 = vadd.f32 %v2587_v34, %v2586_v5  ;;  %v3070_v40 = vpack.c.bf16 %v3227_v15, %v3227_v15  ;;  %v3229_v27 = vadd.f32 %v3222_v42, %v3172_v7  ;;  %v2517_v35 = vpop.f32.mrb[7].mxu1 }
 0x17e   : > { %v3068_v20 = vpack.c.bf16 %v3228_v1, %v3228_v1  ;;  %v3230_v51 = vadd.f32 %v2517_v35, %v1619_v49 }
 0x17f   : > { %v2590_v43 = vadd.f32 %v2589_v62, %v2588_v6  ;;  %2575 = vst.msk [vmem:[%s3995_s19 + $0x18] sm:$0xf] %vm765_vm15, %v3070_v40  ;;  %v2540_v16 = vpack.c.bf16 %v3229_v27, %v3227_v15  ;;  %v3071_v18 = vpack.c.bf16 %v3229_v27, %v3229_v27 }
 0x180   : > { %2573 = vst.msk [vmem:[%s3995_s19 + $0x10] sm:$0xf] %vm765_vm15, %v3068_v20  ;;  %v2539_v53 = vpack.c.bf16 %v3230_v51, %v3228_v1  ;;  %v3069_v19 = vpack.c.bf16 %v3230_v51, %v3230_v51 }
 0x181   : > { %2576 = vst.msk [vmem:[%s3995_s19 + $0x1c] sm:$0xf] %vm765_vm15, %v3071_v18  ;;  %v2592_v22 = vadd.f32 %v2591_v21, %v2590_v43  ;;  %v2583_v10 = vunpack.c.l.bf16 %v2540_v16  ;;  %v2584_v26 = vunpack.c.h.bf16 %v2540_v16 }
 0x182   : > { %2574 = vst.msk [vmem:[%s3995_s19 + $0x14] sm:$0xf] %vm765_vm15, %v3069_v19  ;;  %v2581_v25 = vunpack.c.l.bf16 %v2539_v53  ;;  %v2582_v48 = vunpack.c.h.bf16 %v2539_v53 }
 0x183   : > { %v2597_v14 = vsel %vm2585_vm0, %v2583_v10, 0.0  ;;  %v2599_v41 = vsel %vm2585_vm0, %v2584_v26, 0.0 }
 0x184   : > { %v2593_v3 = vsel %vm2585_vm0, %v2581_v25, 0.0  ;;  %v2595_v28 = vsel %vm2585_vm0, %v2582_v48, 0.0 }
 0x185   : > { %v2594_v59 = vadd.f32 %v2593_v3, %v2592_v22 }
 0x187   : > { %v2596_v9 = vadd.f32 %v2595_v28, %v2594_v59 }
 0x189   : > { %v2598_v0 = vadd.f32 %v2597_v14, %v2596_v9 }
 0x18b   : > { %v2600_v58 = vadd.f32 %v2599_v41, %v2598_v0 }
 0x18d   : > { %v2601_v46 = vrot.slane %v2600_v58, 4 }
 0x18f   : > { %v2602_v31 = vadd.f32 %v2601_v46, %v2600_v58 }
 0x191   : > { %v2603_v23 = vrot.slane %v2602_v31, 2 }
 0x193   : > { %v2604_v2 = vadd.f32 %v2603_v23, %v2602_v31 }
 0x195   : > { %v2605_v32 = vrot.slane %v2604_v2, 1 }
 0x197   : > { %v2606_v17 = vadd.f32 %v2605_v32, %v2604_v2 }
 0x199   : > { %v2607_v29 = vmul.f32 0.015625, %v2606_v17 }
 0x19b   : > { %v2608_v33 = vsub.f32 %v2577_v63, %v2607_v29  ;;  %v2609_v13 = vsub.f32 %v2578_v55, %v2607_v29  ;;  %v2610_v57 = vsub.f32 %v2579_v60, %v2607_v29  ;;  %v2611_v47 = vsub.f32 %v2580_v30, %v2607_v29 }
 0x19c   : > { %v2612_v7 = vsub.f32 %v2581_v25, %v2607_v29  ;;  %v2613_v49 = vsub.f32 %v2582_v48, %v2607_v29  ;;  %v2614_v50 = vsub.f32 %v2583_v10, %v2607_v29  ;;  %v2615_v45 = vsub.f32 %v2584_v26, %v2607_v29 }
 0x19d   : > { %v2616_v44 = vmul.f32 %v2608_v33, %v2608_v33  ;;  %v2617_v52 = vmul.f32 %v2609_v13, %v2609_v13  ;;  %v2618_v11 = vmul.f32 %v2610_v57, %v2610_v57  ;;  %v2619_v36 = vmul.f32 %v2611_v47, %v2611_v47 }
 0x19e   : > { %v2620_v38 = vmul.f32 %v2612_v7, %v2612_v7  ;;  %v2621_v61 = vmul.f32 %v2613_v49, %v2613_v49  ;;  %v2622_v63 = vmul.f32 %v2614_v50, %v2614_v50  ;;  %v2623_v15 = vmul.f32 %v2615_v45, %v2615_v45 }
 0x19f   : > { %v2624_v39 = vsel %vm2585_vm0, %v2616_v44, 0.0  ;;  %v2625_v56 = vsel %vm2585_vm0, %v2617_v52, 0.0  ;;  %v2627_v8 = vsel %vm2585_vm0, %v2618_v11, 0.0  ;;  %v2629_v37 = vsel %vm2585_vm0, %v2619_v36, 0.0 }
 0x1a0   : > { %v2626_v12 = vadd.f32 %v2625_v56, %v2624_v39  ;;  %v2631_v55 = vsel %vm2585_vm0, %v2620_v38, 0.0  ;;  %v2633_v24 = vsel %vm2585_vm0, %v2621_v61, 0.0  ;;  %v2635_v5 = vsel %vm2585_vm0, %v2622_v63, 0.0 }
 0x1a1   : > { %v2637_v1 = vsel %vm2585_vm0, %v2623_v15, 0.0 }
 0x1a2   : > { %v2628_v54 = vadd.f32 %v2627_v8, %v2626_v12 }
 0x1a4   : > { %v2630_v60 = vadd.f32 %v2629_v37, %v2628_v54 }
 0x1a6   : > { %v2632_v4 = vadd.f32 %v2631_v55, %v2630_v60 }
 0x1a8   : > { %v2634_v30 = vadd.f32 %v2633_v24, %v2632_v4 }
 0x1aa   : > { %v2636_v34 = vadd.f32 %v2635_v5, %v2634_v30 }
 0x1ac   : > { %v2638_v42 = vadd.f32 %v2637_v1, %v2636_v34 }
 0x1ae   : > { %v2639_v6 = vrot.slane %v2638_v42, 4 }
 0x1b0   : > { %v2640_v40 = vadd.f32 %v2639_v6, %v2638_v42 }
 0x1b2   : > { %v2641_v27 = vrot.slane %v2640_v40, 2 }
 0x1b4   : > { %v2642_v35 = vadd.f32 %v2641_v27, %v2640_v40 }
 0x1b6   : > { %v2643_v62 = vrot.slane %v2642_v35, 1 }
 0x1b8   : > { %v2644_v20 = vadd.f32 %v2643_v62, %v2642_v35 }
 0x1ba   : > { %v2646_v51 = vsel %vm2645_vm1, %v2606_v17, %v2644_v20 }
 0x1bb   : > { %2648 = vst.msk [vmem:[%s558_s23] sm:$0x3] %vm2647_vm2, %v2646_v51 }
 0x1bc PF: > { %s19_s27 = sadd.s32 1, %s3384_s27   ;;  %s4061_s26 = smov %s3380_s2 }
 0x1bd   : > { %p16_p6 = scmp.ge.s32.totalorder %s19_s27, 4   ;;  %s4062_s2 = smov %s4064_s28 }
 0x1bf   :  { %18 = sbr.rel (!%p16_p6) target bundleno = 2 (0x2), region = 202 }

</bundles_post_ra>
